<compile_context>
chip_gen: v7x
topology: tpu7x:2x2x1
jax: 0.10.0
libtpu: 0.0.40
codegen_flags: <defaults>
</compile_context>

<pallas_src>
import jax
import jax.numpy as jnp
import numpy as np
from jax.experimental import pallas as pl
from jax.experimental.pallas import tpu as pltpu

HI = jax.lax.Precision.HIGHEST        # only used by the plain-JAX reference
GN_EPS = 1e-5


# ----------------------------- in-kernel math helpers -----------------------------
def _gelu_exact(x):
    # torch nn.GELU() default: 0.5 * x * (1 + erf(x / sqrt(2)))
    # erf via Abramowitz & Stegun 7.1.26; divide done on the EUP (approx reciprocal).
    a1, a2, a3, a4, a5 = 0.254829592, -0.284496736, 1.421413741, -1.453152027, 1.061405429
    p = 0.3275911
    z = x * 0.7071067811865476
    sgn = jnp.where(z >= 0.0, 1.0, -1.0)
    az = jnp.abs(z)
    t = pl.reciprocal(1.0 + p * az, approx=True)
    poly = ((((a5 * t + a4) * t + a3) * t + a2) * t + a1) * t
    erf = sgn * (1.0 - poly * jnp.exp(-az * az))
    return 0.5 * x * (1.0 + erf)


# ------------------------------ constant selector matrices --------------------------
def _pool_select_mats(H, W):
    """(4, H*W, (H//2)*(W//2)) 0/1 matrices; x_flat @ P[o] gathers window element o."""
    Ho, Wo = H // 2, W // 2
    mats = np.zeros((4, H * W, Ho * Wo), np.float32)
    for o, (dy, dx) in enumerate(((0, 0), (0, 1), (1, 0), (1, 1))):
        for r in range(Ho):
            for c in range(Wo):
                mats[o, (2 * r + dy) * W + (2 * c + dx), r * Wo + c] = 1.0
    return mats


def _conv_tap_mats(Ho, Wo):
    """(9, HW, HW) 0/1 shift matrices; h @ T[k] = zero-padded (kh,kw)-shifted window."""
    HW = Ho * Wo
    mats = np.zeros((9, HW, HW), np.float32)
    for k in range(9):
        dy, dx = k // 3 - 1, k % 3 - 1
        for r in range(Ho):
            for c in range(Wo):
                rr, cc = r + dy, c + dx
                if 0 <= rr < Ho and 0 <= cc < Wo:
                    mats[k, rr * Wo + cc, r * Wo + c] = 1.0
    return mats


# ----------------------------------- fused kernel ------------------------------------
def _downsample_kernel(x_ref, t_ref, pool_ref, tap_ref,
                       w1_ref, g1_ref, b1_ref,
                       w2_ref, g2_ref, b2_ref,
                       w3_ref, g3_ref, b3_ref,
                       w4_ref, g4_ref, b4_ref,
                       lw_ref, lb_ref, o_ref):
    f32 = jnp.float32
    hw = tap_ref.shape[1]                                    # pooled spatial size

    # ---- MaxPool2d(2): 4 exact selection matmuls + elementwise max --------------
    x = x_ref[...]                                           # (Cin, H*W)
    h = jnp.dot(x, pool_ref[0], preferred_element_type=f32)  # (Cin, hw)
    for o in range(1, 4):
        h = jnp.maximum(h, jnp.dot(x, pool_ref[o], preferred_element_type=f32))

    # ---- Conv3x3 (no bias) + GroupNorm(1, C) [+ GELU], fully VMEM-resident -------
    def conv_gn(hin, w_ref, g_ref, b_ref, gelu):
        co = w_ref.shape[1]
        acc = jnp.zeros((co, hw), f32)
        for k in range(9):
            xs = jnp.dot(hin, tap_ref[k], preferred_element_type=f32)       # (Ci, hw)
            acc = acc + jnp.dot(w_ref[k], xs, preferred_element_type=f32)   # (Co, hw)
        # GroupNorm(num_groups=1): stats over all (C, H, W) of this sample.
        mu = jnp.mean(acc, keepdims=True)                                   # (1, 1)
        var = jnp.mean((acc - mu) ** 2, keepdims=True)
        y = (acc - mu) * jax.lax.rsqrt(var + GN_EPS)
        y = y * g_ref[...] + b_ref[...]                                     # (C,1) affine
        return _gelu_exact(y) if gelu else y

    h = conv_gn(h, w1_ref, g1_ref, b1_ref, True)      # Conv_Doublet(inC, inC, inC)
    h = conv_gn(h, w2_ref, g2_ref, b2_ref, False)
    h = conv_gn(h, w3_ref, g3_ref, b3_ref, True)      # Conv_Doublet(inC, outC, outC)
    h = conv_gn(h, w4_ref, g4_ref, b4_ref, False)

    # ---- Embedding_Model: SiLU -> Linear -> broadcast-add over spatial ----------
    tv = t_ref[...]                                                          # (E, 1)
    sv = tv * jax.nn.sigmoid(tv)
    emb = jnp.dot(lw_ref[...], sv, preferred_element_type=f32) + lb_ref[...] # (Cout, 1)
    o_ref[...] = (h + emb).astype(o_ref.dtype)


# --------------------------------- host-side prep / wrapper --------------------------
def prepare_params(P, H, W):
    """One-time parameter re-layout (hoisted out of the forward call)."""
    Ho, Wo = H // 2, W // 2

    def taps(w):                     # OIHW -> (9, O, I), tap index k = kh*3 + kw
        co, ci = w.shape[0], w.shape[1]
        return jnp.transpose(w, (2, 3, 0, 1)).reshape(9, co, ci)

    def colv(v):                     # per-channel vector -> (C, 1) column
        return v.reshape(-1, 1)

    return {
        "pool": jnp.asarray(_pool_select_mats(H, W)),
        "tap": jnp.asarray(_conv_tap_mats(Ho, Wo)),
        "w1": taps(P["d1_w1"]), "g1": colv(P["d1_g1"]), "b1": colv(P["d1_b1"]),
        "w2": taps(P["d1_w2"]), "g2": colv(P["d1_g2"]), "b2": colv(P["d1_b2"]),
        "w3": taps(P["d2_w1"]), "g3": colv(P["d2_g1"]), "b3": colv(P["d2_b1"]),
        "w4": taps(P["d2_w2"]), "g4": colv(P["d2_g2"]), "b4": colv(P["d2_b2"]),
        "lw": P["lin_w"], "lb": colv(P["lin_b"]),
    }


def downsample_forward(x_nchw, t, PP):
    N, Cin, H, W = x_nchw.shape
    Ho, Wo = H // 2, W // 2
    HWi, HWo = H * W, Ho * Wo
    E = t.shape[1]
    Cout = PP["w4"].shape[1]

    x_flat = x_nchw.reshape(N, Cin, HWi)      # free reshape; HW on the lane dim
    t_col = t.reshape(N, E, 1)                # per-sample column for the emb matmul

    def fullspec(a):
        rank = a.ndim
        return pl.BlockSpec(a.shape, lambda i, _r=rank: (0,) * _r)

    in_specs = [
        pl.BlockSpec((None, Cin, HWi), lambda i: (i, 0, 0)),   # x, one sample per step
        pl.BlockSpec((None, E, 1), lambda i: (i, 0, 0)),       # t column
        fullspec(PP["pool"]), fullspec(PP["tap"]),
        fullspec(PP["w1"]), fullspec(PP["g1"]), fullspec(PP["b1"]),
        fullspec(PP["w2"]), fullspec(PP["g2"]), fullspec(PP["b2"]),
        fullspec(PP["w3"]), fullspec(PP["g3"]), fullspec(PP["b3"]),
        fullspec(PP["w4"]), fullspec(PP["g4"]), fullspec(PP["b4"]),
        fullspec(PP["lw"]), fullspec(PP["lb"]),
    ]

    out = pl.pallas_call(
        _downsample_kernel,
        out_shape=jax.ShapeDtypeStruct((N, Cout, HWo), jnp.float32),
        grid=(N,),
        in_specs=in_specs,
        out_specs=pl.BlockSpec((None, Cout, HWo), lambda i: (i, 0, 0)),
        compiler_params=pltpu.CompilerParams(
            dimension_semantics=("parallel",),          # batch axis -> both v7x TCs
            vmem_limit_bytes=32 * 1024 * 1024),
    )(x_flat, t_col, PP["pool"], PP["tap"],
      PP["w1"], PP["g1"], PP["b1"], PP["w2"], PP["g2"], PP["b2"],
      PP["w3"], PP["g3"], PP["b3"], PP["w4"], PP["g4"], PP["b4"],
      PP["lw"], PP["lb"])
    return out.reshape(N, Cout, Ho, Wo)                 # already NCHW


# ------------------------------- plain-JAX reference --------------------------------
def _reference(x, t, P):
    N, C, H, W = x.shape
    h = x.reshape(N, C, H // 2, 2, W // 2, 2).max(axis=(3, 5))

    def conv(v, w):
        return jax.lax.conv_general_dilated(
            v, w, (1, 1), ((1, 1), (1, 1)),
            dimension_numbers=("NCHW", "OIHW", "NCHW"), precision=HI)

    def gn(v, g, b):
        mu = v.mean(axis=(1, 2, 3), keepdims=True)
        var = ((v - mu) ** 2).mean(axis=(1, 2, 3), keepdims=True)
        return (v - mu) * jax.lax.rsqrt(var + GN_EPS) * g[None, :, None, None] \
            + b[None, :, None, None]

    gelu = lambda v: jax.nn.gelu(v, approximate=False)
    h = gelu(gn(conv(h, P["d1_w1"]), P["d1_g1"], P["d1_b1"]))
    h = gn(conv(h, P["d1_w2"]), P["d1_g2"], P["d1_b2"])
    h = gelu(gn(conv(h, P["d2_w1"]), P["d2_g1"], P["d2_b1"]))
    h = gn(conv(h, P["d2_w2"]), P["d2_g2"], P["d2_b2"])
    emb = jax.nn.silu(t) @ P["lin_w"].T + P["lin_b"]
    return h + emb[:, :, None, None]


# ------------------------------------- main ------------------------------------------
if __name__ == "__main__":
    # Small shapes: batch=2, in_channels=4, out_channels=8, spatial=16, embedding=32
    N, Cin, Cout, H, W, E = 2, 4, 8, 16, 16, 32

    key = jax.random.PRNGKey(0)
    ks = jax.random.split(key, 16)
    f32 = jnp.float32

    P = {
        "d1_w1": 0.2 * jax.random.normal(ks[0], (Cin, Cin, 3, 3), f32),
        "d1_g1": 1.0 + 0.1 * jax.random.normal(ks[1], (Cin,), f32),
        "d1_b1": 0.1 * jax.random.normal(ks[2], (Cin,), f32),
        "d1_w2": 0.2 * jax.random.normal(ks[3], (Cin, Cin, 3, 3), f32),
        "d1_g2": 1.0 + 0.1 * jax.random.normal(ks[4], (Cin,), f32),
        "d1_b2": 0.1 * jax.random.normal(ks[5], (Cin,), f32),
        "d2_w1": 0.2 * jax.random.normal(ks[6], (Cout, Cin, 3, 3), f32),
        "d2_g1": 1.0 + 0.1 * jax.random.normal(ks[7], (Cout,), f32),
        "d2_b1": 0.1 * jax.random.normal(ks[8], (Cout,), f32),
        "d2_w2": 0.2 * jax.random.normal(ks[9], (Cout, Cout, 3, 3), f32),
        "d2_g2": 1.0 + 0.1 * jax.random.normal(ks[10], (Cout,), f32),
        "d2_b2": 0.1 * jax.random.normal(ks[11], (Cout,), f32),
        "lin_w": 0.2 * jax.random.normal(ks[12], (Cout, E), f32),   # torch Linear (out,in)
        "lin_b": 0.1 * jax.random.normal(ks[13], (Cout,), f32),
    }

    x = jax.random.normal(ks[14], (N, Cin, H, W), f32)
    t = jax.random.normal(ks[15], (N, E), f32)

    PP = prepare_params(P, H, W)                 # one-time weight/selector re-layout
    fwd = jax.jit(downsample_forward)

    out = jax.block_until_ready(fwd(x, t, PP))
    assert out.shape == (N, Cout, H // 2, W // 2), out.shape
    assert bool(jnp.all(jnp.isfinite(out)))

    ref = jax.block_until_ready(_reference(x, t, P))
    # Kernel matmuls run at default (bf16-pass) MXU precision with f32 accumulation,
    # so compare against the f32-HIGHEST reference at a bf16-class tolerance.
    np.testing.assert_allclose(np.asarray(out), np.asarray(ref), rtol=2e-2, atol=2e-2)

    print("KERNEL_OK")
</pallas_src>

<mosaic_0001>
module attributes {stable_mosaic.version = 11 : i64} {
  func.func @_downsample_kernel(%arg0: i32, %arg1: memref<1x4x256xf32, #tpu.memory_space<vmem>>, %arg2: memref<1x32x1xf32, #tpu.memory_space<vmem>>, %arg3: memref<4x256x64xf32, #tpu.memory_space<vmem>>, %arg4: memref<9x64x64xf32, #tpu.memory_space<vmem>>, %arg5: memref<9x4x4xf32, #tpu.memory_space<vmem>>, %arg6: memref<4x1xf32, #tpu.memory_space<vmem>>, %arg7: memref<4x1xf32, #tpu.memory_space<vmem>>, %arg8: memref<9x4x4xf32, #tpu.memory_space<vmem>>, %arg9: memref<4x1xf32, #tpu.memory_space<vmem>>, %arg10: memref<4x1xf32, #tpu.memory_space<vmem>>, %arg11: memref<9x8x4xf32, #tpu.memory_space<vmem>>, %arg12: memref<8x1xf32, #tpu.memory_space<vmem>>, %arg13: memref<8x1xf32, #tpu.memory_space<vmem>>, %arg14: memref<9x8x8xf32, #tpu.memory_space<vmem>>, %arg15: memref<8x1xf32, #tpu.memory_space<vmem>>, %arg16: memref<8x1xf32, #tpu.memory_space<vmem>>, %arg17: memref<8x32xf32, #tpu.memory_space<vmem>>, %arg18: memref<8x1xf32, #tpu.memory_space<vmem>>, %arg19: memref<1x8x64xf32, #tpu.memory_space<vmem>>) attributes {dimension_semantics = [#tpu.dimension_semantics<parallel>], iteration_bounds = array<i64: 2>, scalar_prefetch = 0 : i64, scratch_operands = 0 : i64, tpu.core_type = #tpu.core_type<tc>, window_params = [{transform_indices = @transform_0, window_bounds = array<i64: 1, 4, 256>}, {transform_indices = @transform_1, window_bounds = array<i64: 1, 32, 1>}, {pipeline_mode = #tpu.pipeline_mode<synchronous>, transform_indices = @transform_2, window_bounds = array<i64: 4, 256, 64>}, {pipeline_mode = #tpu.pipeline_mode<synchronous>, transform_indices = @transform_3, window_bounds = array<i64: 9, 64, 64>}, {pipeline_mode = #tpu.pipeline_mode<synchronous>, transform_indices = @transform_4, window_bounds = array<i64: 9, 4, 4>}, {pipeline_mode = #tpu.pipeline_mode<synchronous>, transform_indices = @transform_5, window_bounds = array<i64: 4, 1>}, {pipeline_mode = #tpu.pipeline_mode<synchronous>, transform_indices = @transform_6, window_bounds = array<i64: 4, 1>}, {pipeline_mode = #tpu.pipeline_mode<synchronous>, transform_indices = @transform_7, window_bounds = array<i64: 9, 4, 4>}, {pipeline_mode = #tpu.pipeline_mode<synchronous>, transform_indices = @transform_8, window_bounds = array<i64: 4, 1>}, {pipeline_mode = #tpu.pipeline_mode<synchronous>, transform_indices = @transform_9, window_bounds = array<i64: 4, 1>}, {pipeline_mode = #tpu.pipeline_mode<synchronous>, transform_indices = @transform_10, window_bounds = array<i64: 9, 8, 4>}, {pipeline_mode = #tpu.pipeline_mode<synchronous>, transform_indices = @transform_11, window_bounds = array<i64: 8, 1>}, {pipeline_mode = #tpu.pipeline_mode<synchronous>, transform_indices = @transform_12, window_bounds = array<i64: 8, 1>}, {pipeline_mode = #tpu.pipeline_mode<synchronous>, transform_indices = @transform_13, window_bounds = array<i64: 9, 8, 8>}, {pipeline_mode = #tpu.pipeline_mode<synchronous>, transform_indices = @transform_14, window_bounds = array<i64: 8, 1>}, {pipeline_mode = #tpu.pipeline_mode<synchronous>, transform_indices = @transform_15, window_bounds = array<i64: 8, 1>}, {pipeline_mode = #tpu.pipeline_mode<synchronous>, transform_indices = @transform_16, window_bounds = array<i64: 8, 32>}, {pipeline_mode = #tpu.pipeline_mode<synchronous>, transform_indices = @transform_17, window_bounds = array<i64: 8, 1>}, {transform_indices = @transform_18, window_bounds = array<i64: 1, 8, 64>}]} {
    %c0 = arith.constant 0 : index
    %c0_0 = arith.constant 0 : index
    %c0_1 = arith.constant 0 : index
    %0 = vector.load %arg1[%c0, %c0_0, %c0_1] : memref<1x4x256xf32, #tpu.memory_space<vmem>>, vector<1x4x256xf32>
    %1 = vector.shape_cast %0 : vector<1x4x256xf32> to vector<4x256xf32>
    %c0_2 = arith.constant 0 : index
    %c0_3 = arith.constant 0 : index
    %c0_4 = arith.constant 0 : index
    %2 = vector.load %arg3[%c0_2, %c0_3, %c0_4] : memref<4x256x64xf32, #tpu.memory_space<vmem>>, vector<1x256x64xf32>
    %3 = vector.shape_cast %2 : vector<1x256x64xf32> to vector<256x64xf32>
    %cst = arith.constant dense<0.000000e+00> : vector<4x64xf32>
    %4 = tpu.matmul %1, %3, %cst {dimension_numbers = #tpu.dot_dimension_numbers<[1], [0], [0], [1], [0, 0, 1, 1], [], []>} : vector<4x256xf32>, vector<256x64xf32>, vector<4x64xf32> -> vector<4x64xf32>
    %c1 = arith.constant 1 : index
    %c0_5 = arith.constant 0 : index
    %c0_6 = arith.constant 0 : index
    %5 = vector.load %arg3[%c1, %c0_5, %c0_6] : memref<4x256x64xf32, #tpu.memory_space<vmem>>, vector<1x256x64xf32>
    %6 = vector.shape_cast %5 : vector<1x256x64xf32> to vector<256x64xf32>
    %cst_7 = arith.constant dense<0.000000e+00> : vector<4x64xf32>
    %7 = tpu.matmul %1, %6, %cst_7 {dimension_numbers = #tpu.dot_dimension_numbers<[1], [0], [0], [1], [0, 0, 1, 1], [], []>} : vector<4x256xf32>, vector<256x64xf32>, vector<4x64xf32> -> vector<4x64xf32>
    %8 = arith.maximumf %4, %7 : vector<4x64xf32>
    %c2 = arith.constant 2 : index
    %c0_8 = arith.constant 0 : index
    %c0_9 = arith.constant 0 : index
    %9 = vector.load %arg3[%c2, %c0_8, %c0_9] : memref<4x256x64xf32, #tpu.memory_space<vmem>>, vector<1x256x64xf32>
    %10 = vector.shape_cast %9 : vector<1x256x64xf32> to vector<256x64xf32>
    %cst_10 = arith.constant dense<0.000000e+00> : vector<4x64xf32>
    %11 = tpu.matmul %1, %10, %cst_10 {dimension_numbers = #tpu.dot_dimension_numbers<[1], [0], [0], [1], [0, 0, 1, 1], [], []>} : vector<4x256xf32>, vector<256x64xf32>, vector<4x64xf32> -> vector<4x64xf32>
    %12 = arith.maximumf %8, %11 : vector<4x64xf32>
    %c3 = arith.constant 3 : index
    %c0_11 = arith.constant 0 : index
    %c0_12 = arith.constant 0 : index
    %13 = vector.load %arg3[%c3, %c0_11, %c0_12] : memref<4x256x64xf32, #tpu.memory_space<vmem>>, vector<1x256x64xf32>
    %14 = vector.shape_cast %13 : vector<1x256x64xf32> to vector<256x64xf32>
    %cst_13 = arith.constant dense<0.000000e+00> : vector<4x64xf32>
    %15 = tpu.matmul %1, %14, %cst_13 {dimension_numbers = #tpu.dot_dimension_numbers<[1], [0], [0], [1], [0, 0, 1, 1], [], []>} : vector<4x256xf32>, vector<256x64xf32>, vector<4x64xf32> -> vector<4x64xf32>
    %16 = arith.maximumf %12, %15 : vector<4x64xf32>
    %cst_14 = arith.constant 0.000000e+00 : f32
    %17 = vector.broadcast %cst_14 : f32 to vector<4x64xf32>
    %c0_15 = arith.constant 0 : index
    %c0_16 = arith.constant 0 : index
    %c0_17 = arith.constant 0 : index
    %18 = vector.load %arg4[%c0_15, %c0_16, %c0_17] : memref<9x64x64xf32, #tpu.memory_space<vmem>>, vector<1x64x64xf32>
    %19 = vector.shape_cast %18 : vector<1x64x64xf32> to vector<64x64xf32>
    %cst_18 = arith.constant dense<0.000000e+00> : vector<4x64xf32>
    %20 = tpu.matmul %16, %19, %cst_18 {dimension_numbers = #tpu.dot_dimension_numbers<[1], [0], [0], [1], [0, 0, 1, 1], [], []>} : vector<4x64xf32>, vector<64x64xf32>, vector<4x64xf32> -> vector<4x64xf32>
    %c0_19 = arith.constant 0 : index
    %c0_20 = arith.constant 0 : index
    %c0_21 = arith.constant 0 : index
    %21 = vector.load %arg5[%c0_19, %c0_20, %c0_21] : memref<9x4x4xf32, #tpu.memory_space<vmem>>, vector<1x4x4xf32>
    %22 = vector.shape_cast %21 : vector<1x4x4xf32> to vector<4x4xf32>
    %cst_22 = arith.constant dense<0.000000e+00> : vector<4x64xf32>
    %23 = tpu.matmul %22, %20, %cst_22 {dimension_numbers = #tpu.dot_dimension_numbers<[1], [0], [0], [1], [0, 0, 1, 1], [], []>} : vector<4x4xf32>, vector<4x64xf32>, vector<4x64xf32> -> vector<4x64xf32>
    %24 = arith.addf %17, %23 : vector<4x64xf32>
    %c1_23 = arith.constant 1 : index
    %c0_24 = arith.constant 0 : index
    %c0_25 = arith.constant 0 : index
    %25 = vector.load %arg4[%c1_23, %c0_24, %c0_25] : memref<9x64x64xf32, #tpu.memory_space<vmem>>, vector<1x64x64xf32>
    %26 = vector.shape_cast %25 : vector<1x64x64xf32> to vector<64x64xf32>
    %cst_26 = arith.constant dense<0.000000e+00> : vector<4x64xf32>
    %27 = tpu.matmul %16, %26, %cst_26 {dimension_numbers = #tpu.dot_dimension_numbers<[1], [0], [0], [1], [0, 0, 1, 1], [], []>} : vector<4x64xf32>, vector<64x64xf32>, vector<4x64xf32> -> vector<4x64xf32>
    %c1_27 = arith.constant 1 : index
    %c0_28 = arith.constant 0 : index
    %c0_29 = arith.constant 0 : index
    %28 = vector.load %arg5[%c1_27, %c0_28, %c0_29] : memref<9x4x4xf32, #tpu.memory_space<vmem>>, vector<1x4x4xf32>
    %29 = vector.shape_cast %28 : vector<1x4x4xf32> to vector<4x4xf32>
    %cst_30 = arith.constant dense<0.000000e+00> : vector<4x64xf32>
    %30 = tpu.matmul %29, %27, %cst_30 {dimension_numbers = #tpu.dot_dimension_numbers<[1], [0], [0], [1], [0, 0, 1, 1], [], []>} : vector<4x4xf32>, vector<4x64xf32>, vector<4x64xf32> -> vector<4x64xf32>
    %31 = arith.addf %24, %30 : vector<4x64xf32>
    %c2_31 = arith.constant 2 : index
    %c0_32 = arith.constant 0 : index
    %c0_33 = arith.constant 0 : index
    %32 = vector.load %arg4[%c2_31, %c0_32, %c0_33] : memref<9x64x64xf32, #tpu.memory_space<vmem>>, vector<1x64x64xf32>
    %33 = vector.shape_cast %32 : vector<1x64x64xf32> to vector<64x64xf32>
    %cst_34 = arith.constant dense<0.000000e+00> : vector<4x64xf32>
    %34 = tpu.matmul %16, %33, %cst_34 {dimension_numbers = #tpu.dot_dimension_numbers<[1], [0], [0], [1], [0, 0, 1, 1], [], []>} : vector<4x64xf32>, vector<64x64xf32>, vector<4x64xf32> -> vector<4x64xf32>
    %c2_35 = arith.constant 2 : index
    %c0_36 = arith.constant 0 : index
    %c0_37 = arith.constant 0 : index
    %35 = vector.load %arg5[%c2_35, %c0_36, %c0_37] : memref<9x4x4xf32, #tpu.memory_space<vmem>>, vector<1x4x4xf32>
    %36 = vector.shape_cast %35 : vector<1x4x4xf32> to vector<4x4xf32>
    %cst_38 = arith.constant dense<0.000000e+00> : vector<4x64xf32>
    %37 = tpu.matmul %36, %34, %cst_38 {dimension_numbers = #tpu.dot_dimension_numbers<[1], [0], [0], [1], [0, 0, 1, 1], [], []>} : vector<4x4xf32>, vector<4x64xf32>, vector<4x64xf32> -> vector<4x64xf32>
    %38 = arith.addf %31, %37 : vector<4x64xf32>
    %c3_39 = arith.constant 3 : index
    %c0_40 = arith.constant 0 : index
    %c0_41 = arith.constant 0 : index
    %39 = vector.load %arg4[%c3_39, %c0_40, %c0_41] : memref<9x64x64xf32, #tpu.memory_space<vmem>>, vector<1x64x64xf32>
    %40 = vector.shape_cast %39 : vector<1x64x64xf32> to vector<64x64xf32>
    %cst_42 = arith.constant dense<0.000000e+00> : vector<4x64xf32>
    %41 = tpu.matmul %16, %40, %cst_42 {dimension_numbers = #tpu.dot_dimension_numbers<[1], [0], [0], [1], [0, 0, 1, 1], [], []>} : vector<4x64xf32>, vector<64x64xf32>, vector<4x64xf32> -> vector<4x64xf32>
    %c3_43 = arith.constant 3 : index
    %c0_44 = arith.constant 0 : index
    %c0_45 = arith.constant 0 : index
    %42 = vector.load %arg5[%c3_43, %c0_44, %c0_45] : memref<9x4x4xf32, #tpu.memory_space<vmem>>, vector<1x4x4xf32>
    %43 = vector.shape_cast %42 : vector<1x4x4xf32> to vector<4x4xf32>
    %cst_46 = arith.constant dense<0.000000e+00> : vector<4x64xf32>
    %44 = tpu.matmul %43, %41, %cst_46 {dimension_numbers = #tpu.dot_dimension_numbers<[1], [0], [0], [1], [0, 0, 1, 1], [], []>} : vector<4x4xf32>, vector<4x64xf32>, vector<4x64xf32> -> vector<4x64xf32>
    %45 = arith.addf %38, %44 : vector<4x64xf32>
    %c4 = arith.constant 4 : index
    %c0_47 = arith.constant 0 : index
    %c0_48 = arith.constant 0 : index
    %46 = vector.load %arg4[%c4, %c0_47, %c0_48] : memref<9x64x64xf32, #tpu.memory_space<vmem>>, vector<1x64x64xf32>
    %47 = vector.shape_cast %46 : vector<1x64x64xf32> to vector<64x64xf32>
    %cst_49 = arith.constant dense<0.000000e+00> : vector<4x64xf32>
    %48 = tpu.matmul %16, %47, %cst_49 {dimension_numbers = #tpu.dot_dimension_numbers<[1], [0], [0], [1], [0, 0, 1, 1], [], []>} : vector<4x64xf32>, vector<64x64xf32>, vector<4x64xf32> -> vector<4x64xf32>
    %c4_50 = arith.constant 4 : index
    %c0_51 = arith.constant 0 : index
    %c0_52 = arith.constant 0 : index
    %49 = vector.load %arg5[%c4_50, %c0_51, %c0_52] : memref<9x4x4xf32, #tpu.memory_space<vmem>>, vector<1x4x4xf32>
    %50 = vector.shape_cast %49 : vector<1x4x4xf32> to vector<4x4xf32>
    %cst_53 = arith.constant dense<0.000000e+00> : vector<4x64xf32>
    %51 = tpu.matmul %50, %48, %cst_53 {dimension_numbers = #tpu.dot_dimension_numbers<[1], [0], [0], [1], [0, 0, 1, 1], [], []>} : vector<4x4xf32>, vector<4x64xf32>, vector<4x64xf32> -> vector<4x64xf32>
    %52 = arith.addf %45, %51 : vector<4x64xf32>
    %c5 = arith.constant 5 : index
    %c0_54 = arith.constant 0 : index
    %c0_55 = arith.constant 0 : index
    %53 = vector.load %arg4[%c5, %c0_54, %c0_55] : memref<9x64x64xf32, #tpu.memory_space<vmem>>, vector<1x64x64xf32>
    %54 = vector.shape_cast %53 : vector<1x64x64xf32> to vector<64x64xf32>
    %cst_56 = arith.constant dense<0.000000e+00> : vector<4x64xf32>
    %55 = tpu.matmul %16, %54, %cst_56 {dimension_numbers = #tpu.dot_dimension_numbers<[1], [0], [0], [1], [0, 0, 1, 1], [], []>} : vector<4x64xf32>, vector<64x64xf32>, vector<4x64xf32> -> vector<4x64xf32>
    %c5_57 = arith.constant 5 : index
    %c0_58 = arith.constant 0 : index
    %c0_59 = arith.constant 0 : index
    %56 = vector.load %arg5[%c5_57, %c0_58, %c0_59] : memref<9x4x4xf32, #tpu.memory_space<vmem>>, vector<1x4x4xf32>
    %57 = vector.shape_cast %56 : vector<1x4x4xf32> to vector<4x4xf32>
    %cst_60 = arith.constant dense<0.000000e+00> : vector<4x64xf32>
    %58 = tpu.matmul %57, %55, %cst_60 {dimension_numbers = #tpu.dot_dimension_numbers<[1], [0], [0], [1], [0, 0, 1, 1], [], []>} : vector<4x4xf32>, vector<4x64xf32>, vector<4x64xf32> -> vector<4x64xf32>
    %59 = arith.addf %52, %58 : vector<4x64xf32>
    %c6 = arith.constant 6 : index
    %c0_61 = arith.constant 0 : index
    %c0_62 = arith.constant 0 : index
    %60 = vector.load %arg4[%c6, %c0_61, %c0_62] : memref<9x64x64xf32, #tpu.memory_space<vmem>>, vector<1x64x64xf32>
    %61 = vector.shape_cast %60 : vector<1x64x64xf32> to vector<64x64xf32>
    %cst_63 = arith.constant dense<0.000000e+00> : vector<4x64xf32>
    %62 = tpu.matmul %16, %61, %cst_63 {dimension_numbers = #tpu.dot_dimension_numbers<[1], [0], [0], [1], [0, 0, 1, 1], [], []>} : vector<4x64xf32>, vector<64x64xf32>, vector<4x64xf32> -> vector<4x64xf32>
    %c6_64 = arith.constant 6 : index
    %c0_65 = arith.constant 0 : index
    %c0_66 = arith.constant 0 : index
    %63 = vector.load %arg5[%c6_64, %c0_65, %c0_66] : memref<9x4x4xf32, #tpu.memory_space<vmem>>, vector<1x4x4xf32>
    %64 = vector.shape_cast %63 : vector<1x4x4xf32> to vector<4x4xf32>
    %cst_67 = arith.constant dense<0.000000e+00> : vector<4x64xf32>
    %65 = tpu.matmul %64, %62, %cst_67 {dimension_numbers = #tpu.dot_dimension_numbers<[1], [0], [0], [1], [0, 0, 1, 1], [], []>} : vector<4x4xf32>, vector<4x64xf32>, vector<4x64xf32> -> vector<4x64xf32>
    %66 = arith.addf %59, %65 : vector<4x64xf32>
    %c7 = arith.constant 7 : index
    %c0_68 = arith.constant 0 : index
    %c0_69 = arith.constant 0 : index
    %67 = vector.load %arg4[%c7, %c0_68, %c0_69] : memref<9x64x64xf32, #tpu.memory_space<vmem>>, vector<1x64x64xf32>
    %68 = vector.shape_cast %67 : vector<1x64x64xf32> to vector<64x64xf32>
    %cst_70 = arith.constant dense<0.000000e+00> : vector<4x64xf32>
    %69 = tpu.matmul %16, %68, %cst_70 {dimension_numbers = #tpu.dot_dimension_numbers<[1], [0], [0], [1], [0, 0, 1, 1], [], []>} : vector<4x64xf32>, vector<64x64xf32>, vector<4x64xf32> -> vector<4x64xf32>
    %c7_71 = arith.constant 7 : index
    %c0_72 = arith.constant 0 : index
    %c0_73 = arith.constant 0 : index
    %70 = vector.load %arg5[%c7_71, %c0_72, %c0_73] : memref<9x4x4xf32, #tpu.memory_space<vmem>>, vector<1x4x4xf32>
    %71 = vector.shape_cast %70 : vector<1x4x4xf32> to vector<4x4xf32>
    %cst_74 = arith.constant dense<0.000000e+00> : vector<4x64xf32>
    %72 = tpu.matmul %71, %69, %cst_74 {dimension_numbers = #tpu.dot_dimension_numbers<[1], [0], [0], [1], [0, 0, 1, 1], [], []>} : vector<4x4xf32>, vector<4x64xf32>, vector<4x64xf32> -> vector<4x64xf32>
    %73 = arith.addf %66, %72 : vector<4x64xf32>
    %c8 = arith.constant 8 : index
    %c0_75 = arith.constant 0 : index
    %c0_76 = arith.constant 0 : index
    %74 = vector.load %arg4[%c8, %c0_75, %c0_76] : memref<9x64x64xf32, #tpu.memory_space<vmem>>, vector<1x64x64xf32>
    %75 = vector.shape_cast %74 : vector<1x64x64xf32> to vector<64x64xf32>
    %cst_77 = arith.constant dense<0.000000e+00> : vector<4x64xf32>
    %76 = tpu.matmul %16, %75, %cst_77 {dimension_numbers = #tpu.dot_dimension_numbers<[1], [0], [0], [1], [0, 0, 1, 1], [], []>} : vector<4x64xf32>, vector<64x64xf32>, vector<4x64xf32> -> vector<4x64xf32>
    %c8_78 = arith.constant 8 : index
    %c0_79 = arith.constant 0 : index
    %c0_80 = arith.constant 0 : index
    %77 = vector.load %arg5[%c8_78, %c0_79, %c0_80] : memref<9x4x4xf32, #tpu.memory_space<vmem>>, vector<1x4x4xf32>
    %78 = vector.shape_cast %77 : vector<1x4x4xf32> to vector<4x4xf32>
    %cst_81 = arith.constant dense<0.000000e+00> : vector<4x64xf32>
    %79 = tpu.matmul %78, %76, %cst_81 {dimension_numbers = #tpu.dot_dimension_numbers<[1], [0], [0], [1], [0, 0, 1, 1], [], []>} : vector<4x4xf32>, vector<4x64xf32>, vector<4x64xf32> -> vector<4x64xf32>
    %80 = arith.addf %73, %79 : vector<4x64xf32>
    %81 = vector.shape_cast %80 : vector<4x64xf32> to vector<1x4x64xf32>
    %cst_82 = arith.constant dense<0.000000e+00> : vector<1xf32>
    %82 = vector.multi_reduction <add>, %81, %cst_82 [1, 2] : vector<1x4x64xf32> to vector<1xf32>
    %83 = vector.shape_cast %82 : vector<1xf32> to vector<1x1x1xf32>
    %84 = vector.extract %83[0, 0, 0] : f32 from vector<1x1x1xf32>
    %85 = vector.broadcast %84 : f32 to vector<1x1xf32>
    %cst_83 = arith.constant 2.560000e+02 : f32
    %86 = vector.broadcast %cst_83 : f32 to vector<1x1xf32>
    %87 = arith.divf %85, %86 : vector<1x1xf32>
    %88 = vector.broadcast %87 : vector<1x1xf32> to vector<4x64xf32>
    %89 = arith.subf %80, %88 : vector<4x64xf32>
    %90 = arith.mulf %89, %89 : vector<4x64xf32>
    %91 = vector.shape_cast %90 : vector<4x64xf32> to vector<1x4x64xf32>
    %cst_84 = arith.constant dense<0.000000e+00> : vector<1xf32>
    %92 = vector.multi_reduction <add>, %91, %cst_84 [1, 2] : vector<1x4x64xf32> to vector<1xf32>
    %93 = vector.shape_cast %92 : vector<1xf32> to vector<1x1x1xf32>
    %94 = vector.extract %93[0, 0, 0] : f32 from vector<1x1x1xf32>
    %95 = vector.broadcast %94 : f32 to vector<1x1xf32>
    %cst_85 = arith.constant 2.560000e+02 : f32
    %96 = vector.broadcast %cst_85 : f32 to vector<1x1xf32>
    %97 = arith.divf %95, %96 : vector<1x1xf32>
    %98 = vector.broadcast %87 : vector<1x1xf32> to vector<4x64xf32>
    %99 = arith.subf %80, %98 : vector<4x64xf32>
    %cst_86 = arith.constant 9.99999974E-6 : f32
    %100 = vector.broadcast %cst_86 : f32 to vector<1x1xf32>
    %101 = arith.addf %97, %100 : vector<1x1xf32>
    %102 = math.rsqrt %101 : vector<1x1xf32>
    %103 = vector.broadcast %102 : vector<1x1xf32> to vector<4x64xf32>
    %104 = arith.mulf %99, %103 : vector<4x64xf32>
    %c0_87 = arith.constant 0 : index
    %c0_88 = arith.constant 0 : index
    %105 = vector.load %arg6[%c0_87, %c0_88] : memref<4x1xf32, #tpu.memory_space<vmem>>, vector<4x1xf32>
    %106 = vector.broadcast %105 : vector<4x1xf32> to vector<4x64xf32>
    %107 = arith.mulf %104, %106 : vector<4x64xf32>
    %c0_89 = arith.constant 0 : index
    %c0_90 = arith.constant 0 : index
    %108 = vector.load %arg7[%c0_89, %c0_90] : memref<4x1xf32, #tpu.memory_space<vmem>>, vector<4x1xf32>
    %109 = vector.broadcast %108 : vector<4x1xf32> to vector<4x64xf32>
    %110 = arith.addf %107, %109 : vector<4x64xf32>
    %cst_91 = arith.constant 0.707106769 : f32
    %111 = vector.broadcast %cst_91 : f32 to vector<4x64xf32>
    %112 = arith.mulf %110, %111 : vector<4x64xf32>
    %cst_92 = arith.constant 0.000000e+00 : f32
    %113 = vector.broadcast %cst_92 : f32 to vector<4x64xf32>
    %114 = arith.cmpf oge, %112, %113 : vector<4x64xf32>
    %cst_93 = arith.constant 1.000000e+00 : f32
    %cst_94 = arith.constant -1.000000e+00 : f32
    %115 = vector.broadcast %cst_93 : f32 to vector<4x64xf32>
    %116 = vector.broadcast %cst_94 : f32 to vector<4x64xf32>
    %117 = arith.select %114, %115, %116 : vector<4x64xi1>, vector<4x64xf32>
    %118 = math.absf %112 : vector<4x64xf32>
    %cst_95 = arith.constant 0.327591091 : f32
    %119 = vector.broadcast %cst_95 : f32 to vector<4x64xf32>
    %120 = arith.mulf %119, %118 : vector<4x64xf32>
    %cst_96 = arith.constant 1.000000e+00 : f32
    %121 = vector.broadcast %cst_96 : f32 to vector<4x64xf32>
    %122 = arith.addf %121, %120 : vector<4x64xf32>
    %123 = tpu.reciprocal %122 {approx = true} : vector<4x64xf32> -> vector<4x64xf32>
    %cst_97 = arith.constant 1.06140542 : f32
    %124 = vector.broadcast %cst_97 : f32 to vector<4x64xf32>
    %125 = arith.mulf %124, %123 : vector<4x64xf32>
    %cst_98 = arith.constant -1.45315206 : f32
    %126 = vector.broadcast %cst_98 : f32 to vector<4x64xf32>
    %127 = arith.addf %125, %126 : vector<4x64xf32>
    %128 = arith.mulf %127, %123 : vector<4x64xf32>
    %cst_99 = arith.constant 1.42141378 : f32
    %129 = vector.broadcast %cst_99 : f32 to vector<4x64xf32>
    %130 = arith.addf %128, %129 : vector<4x64xf32>
    %131 = arith.mulf %130, %123 : vector<4x64xf32>
    %cst_100 = arith.constant -0.284496725 : f32
    %132 = vector.broadcast %cst_100 : f32 to vector<4x64xf32>
    %133 = arith.addf %131, %132 : vector<4x64xf32>
    %134 = arith.mulf %133, %123 : vector<4x64xf32>
    %cst_101 = arith.constant 0.254829586 : f32
    %135 = vector.broadcast %cst_101 : f32 to vector<4x64xf32>
    %136 = arith.addf %134, %135 : vector<4x64xf32>
    %137 = arith.mulf %136, %123 : vector<4x64xf32>
    %cst_102 = arith.constant 0.000000e+00 : f32
    %138 = vector.broadcast %cst_102 : f32 to vector<4x64xf32>
    %139 = arith.subf %138, %118 : vector<4x64xf32>
    %140 = arith.mulf %139, %118 : vector<4x64xf32>
    %141 = math.exp %140 : vector<4x64xf32>
    %142 = arith.mulf %137, %141 : vector<4x64xf32>
    %cst_103 = arith.constant 1.000000e+00 : f32
    %143 = vector.broadcast %cst_103 : f32 to vector<4x64xf32>
    %144 = arith.subf %143, %142 : vector<4x64xf32>
    %145 = arith.mulf %117, %144 : vector<4x64xf32>
    %cst_104 = arith.constant 5.000000e-01 : f32
    %146 = vector.broadcast %cst_104 : f32 to vector<4x64xf32>
    %147 = arith.mulf %146, %110 : vector<4x64xf32>
    %cst_105 = arith.constant 1.000000e+00 : f32
    %148 = vector.broadcast %cst_105 : f32 to vector<4x64xf32>
    %149 = arith.addf %148, %145 : vector<4x64xf32>
    %150 = arith.mulf %147, %149 : vector<4x64xf32>
    %cst_106 = arith.constant 0.000000e+00 : f32
    %151 = vector.broadcast %cst_106 : f32 to vector<4x64xf32>
    %c0_107 = arith.constant 0 : index
    %c0_108 = arith.constant 0 : index
    %c0_109 = arith.constant 0 : index
    %152 = vector.load %arg4[%c0_107, %c0_108, %c0_109] : memref<9x64x64xf32, #tpu.memory_space<vmem>>, vector<1x64x64xf32>
    %153 = vector.shape_cast %152 : vector<1x64x64xf32> to vector<64x64xf32>
    %cst_110 = arith.constant dense<0.000000e+00> : vector<4x64xf32>
    %154 = tpu.matmul %150, %153, %cst_110 {dimension_numbers = #tpu.dot_dimension_numbers<[1], [0], [0], [1], [0, 0, 1, 1], [], []>} : vector<4x64xf32>, vector<64x64xf32>, vector<4x64xf32> -> vector<4x64xf32>
    %c0_111 = arith.constant 0 : index
    %c0_112 = arith.constant 0 : index
    %c0_113 = arith.constant 0 : index
    %155 = vector.load %arg8[%c0_111, %c0_112, %c0_113] : memref<9x4x4xf32, #tpu.memory_space<vmem>>, vector<1x4x4xf32>
    %156 = vector.shape_cast %155 : vector<1x4x4xf32> to vector<4x4xf32>
    %cst_114 = arith.constant dense<0.000000e+00> : vector<4x64xf32>
    %157 = tpu.matmul %156, %154, %cst_114 {dimension_numbers = #tpu.dot_dimension_numbers<[1], [0], [0], [1], [0, 0, 1, 1], [], []>} : vector<4x4xf32>, vector<4x64xf32>, vector<4x64xf32> -> vector<4x64xf32>
    %158 = arith.addf %151, %157 : vector<4x64xf32>
    %c1_115 = arith.constant 1 : index
    %c0_116 = arith.constant 0 : index
    %c0_117 = arith.constant 0 : index
    %159 = vector.load %arg4[%c1_115, %c0_116, %c0_117] : memref<9x64x64xf32, #tpu.memory_space<vmem>>, vector<1x64x64xf32>
    %160 = vector.shape_cast %159 : vector<1x64x64xf32> to vector<64x64xf32>
    %cst_118 = arith.constant dense<0.000000e+00> : vector<4x64xf32>
    %161 = tpu.matmul %150, %160, %cst_118 {dimension_numbers = #tpu.dot_dimension_numbers<[1], [0], [0], [1], [0, 0, 1, 1], [], []>} : vector<4x64xf32>, vector<64x64xf32>, vector<4x64xf32> -> vector<4x64xf32>
    %c1_119 = arith.constant 1 : index
    %c0_120 = arith.constant 0 : index
    %c0_121 = arith.constant 0 : index
    %162 = vector.load %arg8[%c1_119, %c0_120, %c0_121] : memref<9x4x4xf32, #tpu.memory_space<vmem>>, vector<1x4x4xf32>
    %163 = vector.shape_cast %162 : vector<1x4x4xf32> to vector<4x4xf32>
    %cst_122 = arith.constant dense<0.000000e+00> : vector<4x64xf32>
    %164 = tpu.matmul %163, %161, %cst_122 {dimension_numbers = #tpu.dot_dimension_numbers<[1], [0], [0], [1], [0, 0, 1, 1], [], []>} : vector<4x4xf32>, vector<4x64xf32>, vector<4x64xf32> -> vector<4x64xf32>
    %165 = arith.addf %158, %164 : vector<4x64xf32>
    %c2_123 = arith.constant 2 : index
    %c0_124 = arith.constant 0 : index
    %c0_125 = arith.constant 0 : index
    %166 = vector.load %arg4[%c2_123, %c0_124, %c0_125] : memref<9x64x64xf32, #tpu.memory_space<vmem>>, vector<1x64x64xf32>
    %167 = vector.shape_cast %166 : vector<1x64x64xf32> to vector<64x64xf32>
    %cst_126 = arith.constant dense<0.000000e+00> : vector<4x64xf32>
    %168 = tpu.matmul %150, %167, %cst_126 {dimension_numbers = #tpu.dot_dimension_numbers<[1], [0], [0], [1], [0, 0, 1, 1], [], []>} : vector<4x64xf32>, vector<64x64xf32>, vector<4x64xf32> -> vector<4x64xf32>
    %c2_127 = arith.constant 2 : index
    %c0_128 = arith.constant 0 : index
    %c0_129 = arith.constant 0 : index
    %169 = vector.load %arg8[%c2_127, %c0_128, %c0_129] : memref<9x4x4xf32, #tpu.memory_space<vmem>>, vector<1x4x4xf32>
    %170 = vector.shape_cast %169 : vector<1x4x4xf32> to vector<4x4xf32>
    %cst_130 = arith.constant dense<0.000000e+00> : vector<4x64xf32>
    %171 = tpu.matmul %170, %168, %cst_130 {dimension_numbers = #tpu.dot_dimension_numbers<[1], [0], [0], [1], [0, 0, 1, 1], [], []>} : vector<4x4xf32>, vector<4x64xf32>, vector<4x64xf32> -> vector<4x64xf32>
    %172 = arith.addf %165, %171 : vector<4x64xf32>
    %c3_131 = arith.constant 3 : index
    %c0_132 = arith.constant 0 : index
    %c0_133 = arith.constant 0 : index
    %173 = vector.load %arg4[%c3_131, %c0_132, %c0_133] : memref<9x64x64xf32, #tpu.memory_space<vmem>>, vector<1x64x64xf32>
    %174 = vector.shape_cast %173 : vector<1x64x64xf32> to vector<64x64xf32>
    %cst_134 = arith.constant dense<0.000000e+00> : vector<4x64xf32>
    %175 = tpu.matmul %150, %174, %cst_134 {dimension_numbers = #tpu.dot_dimension_numbers<[1], [0], [0], [1], [0, 0, 1, 1], [], []>} : vector<4x64xf32>, vector<64x64xf32>, vector<4x64xf32> -> vector<4x64xf32>
    %c3_135 = arith.constant 3 : index
    %c0_136 = arith.constant 0 : index
    %c0_137 = arith.constant 0 : index
    %176 = vector.load %arg8[%c3_135, %c0_136, %c0_137] : memref<9x4x4xf32, #tpu.memory_space<vmem>>, vector<1x4x4xf32>
    %177 = vector.shape_cast %176 : vector<1x4x4xf32> to vector<4x4xf32>
    %cst_138 = arith.constant dense<0.000000e+00> : vector<4x64xf32>
    %178 = tpu.matmul %177, %175, %cst_138 {dimension_numbers = #tpu.dot_dimension_numbers<[1], [0], [0], [1], [0, 0, 1, 1], [], []>} : vector<4x4xf32>, vector<4x64xf32>, vector<4x64xf32> -> vector<4x64xf32>
    %179 = arith.addf %172, %178 : vector<4x64xf32>
    %c4_139 = arith.constant 4 : index
    %c0_140 = arith.constant 0 : index
    %c0_141 = arith.constant 0 : index
    %180 = vector.load %arg4[%c4_139, %c0_140, %c0_141] : memref<9x64x64xf32, #tpu.memory_space<vmem>>, vector<1x64x64xf32>
    %181 = vector.shape_cast %180 : vector<1x64x64xf32> to vector<64x64xf32>
    %cst_142 = arith.constant dense<0.000000e+00> : vector<4x64xf32>
    %182 = tpu.matmul %150, %181, %cst_142 {dimension_numbers = #tpu.dot_dimension_numbers<[1], [0], [0], [1], [0, 0, 1, 1], [], []>} : vector<4x64xf32>, vector<64x64xf32>, vector<4x64xf32> -> vector<4x64xf32>
    %c4_143 = arith.constant 4 : index
    %c0_144 = arith.constant 0 : index
    %c0_145 = arith.constant 0 : index
    %183 = vector.load %arg8[%c4_143, %c0_144, %c0_145] : memref<9x4x4xf32, #tpu.memory_space<vmem>>, vector<1x4x4xf32>
    %184 = vector.shape_cast %183 : vector<1x4x4xf32> to vector<4x4xf32>
    %cst_146 = arith.constant dense<0.000000e+00> : vector<4x64xf32>
    %185 = tpu.matmul %184, %182, %cst_146 {dimension_numbers = #tpu.dot_dimension_numbers<[1], [0], [0], [1], [0, 0, 1, 1], [], []>} : vector<4x4xf32>, vector<4x64xf32>, vector<4x64xf32> -> vector<4x64xf32>
    %186 = arith.addf %179, %185 : vector<4x64xf32>
    %c5_147 = arith.constant 5 : index
    %c0_148 = arith.constant 0 : index
    %c0_149 = arith.constant 0 : index
    %187 = vector.load %arg4[%c5_147, %c0_148, %c0_149] : memref<9x64x64xf32, #tpu.memory_space<vmem>>, vector<1x64x64xf32>
    %188 = vector.shape_cast %187 : vector<1x64x64xf32> to vector<64x64xf32>
    %cst_150 = arith.constant dense<0.000000e+00> : vector<4x64xf32>
    %189 = tpu.matmul %150, %188, %cst_150 {dimension_numbers = #tpu.dot_dimension_numbers<[1], [0], [0], [1], [0, 0, 1, 1], [], []>} : vector<4x64xf32>, vector<64x64xf32>, vector<4x64xf32> -> vector<4x64xf32>
    %c5_151 = arith.constant 5 : index
    %c0_152 = arith.constant 0 : index
    %c0_153 = arith.constant 0 : index
    %190 = vector.load %arg8[%c5_151, %c0_152, %c0_153] : memref<9x4x4xf32, #tpu.memory_space<vmem>>, vector<1x4x4xf32>
    %191 = vector.shape_cast %190 : vector<1x4x4xf32> to vector<4x4xf32>
    %cst_154 = arith.constant dense<0.000000e+00> : vector<4x64xf32>
    %192 = tpu.matmul %191, %189, %cst_154 {dimension_numbers = #tpu.dot_dimension_numbers<[1], [0], [0], [1], [0, 0, 1, 1], [], []>} : vector<4x4xf32>, vector<4x64xf32>, vector<4x64xf32> -> vector<4x64xf32>
    %193 = arith.addf %186, %192 : vector<4x64xf32>
    %c6_155 = arith.constant 6 : index
    %c0_156 = arith.constant 0 : index
    %c0_157 = arith.constant 0 : index
    %194 = vector.load %arg4[%c6_155, %c0_156, %c0_157] : memref<9x64x64xf32, #tpu.memory_space<vmem>>, vector<1x64x64xf32>
    %195 = vector.shape_cast %194 : vector<1x64x64xf32> to vector<64x64xf32>
    %cst_158 = arith.constant dense<0.000000e+00> : vector<4x64xf32>
    %196 = tpu.matmul %150, %195, %cst_158 {dimension_numbers = #tpu.dot_dimension_numbers<[1], [0], [0], [1], [0, 0, 1, 1], [], []>} : vector<4x64xf32>, vector<64x64xf32>, vector<4x64xf32> -> vector<4x64xf32>
    %c6_159 = arith.constant 6 : index
    %c0_160 = arith.constant 0 : index
    %c0_161 = arith.constant 0 : index
    %197 = vector.load %arg8[%c6_159, %c0_160, %c0_161] : memref<9x4x4xf32, #tpu.memory_space<vmem>>, vector<1x4x4xf32>
    %198 = vector.shape_cast %197 : vector<1x4x4xf32> to vector<4x4xf32>
    %cst_162 = arith.constant dense<0.000000e+00> : vector<4x64xf32>
    %199 = tpu.matmul %198, %196, %cst_162 {dimension_numbers = #tpu.dot_dimension_numbers<[1], [0], [0], [1], [0, 0, 1, 1], [], []>} : vector<4x4xf32>, vector<4x64xf32>, vector<4x64xf32> -> vector<4x64xf32>
    %200 = arith.addf %193, %199 : vector<4x64xf32>
    %c7_163 = arith.constant 7 : index
    %c0_164 = arith.constant 0 : index
    %c0_165 = arith.constant 0 : index
    %201 = vector.load %arg4[%c7_163, %c0_164, %c0_165] : memref<9x64x64xf32, #tpu.memory_space<vmem>>, vector<1x64x64xf32>
    %202 = vector.shape_cast %201 : vector<1x64x64xf32> to vector<64x64xf32>
    %cst_166 = arith.constant dense<0.000000e+00> : vector<4x64xf32>
    %203 = tpu.matmul %150, %202, %cst_166 {dimension_numbers = #tpu.dot_dimension_numbers<[1], [0], [0], [1], [0, 0, 1, 1], [], []>} : vector<4x64xf32>, vector<64x64xf32>, vector<4x64xf32> -> vector<4x64xf32>
    %c7_167 = arith.constant 7 : index
    %c0_168 = arith.constant 0 : index
    %c0_169 = arith.constant 0 : index
    %204 = vector.load %arg8[%c7_167, %c0_168, %c0_169] : memref<9x4x4xf32, #tpu.memory_space<vmem>>, vector<1x4x4xf32>
    %205 = vector.shape_cast %204 : vector<1x4x4xf32> to vector<4x4xf32>
    %cst_170 = arith.constant dense<0.000000e+00> : vector<4x64xf32>
    %206 = tpu.matmul %205, %203, %cst_170 {dimension_numbers = #tpu.dot_dimension_numbers<[1], [0], [0], [1], [0, 0, 1, 1], [], []>} : vector<4x4xf32>, vector<4x64xf32>, vector<4x64xf32> -> vector<4x64xf32>
    %207 = arith.addf %200, %206 : vector<4x64xf32>
    %c8_171 = arith.constant 8 : index
    %c0_172 = arith.constant 0 : index
    %c0_173 = arith.constant 0 : index
    %208 = vector.load %arg4[%c8_171, %c0_172, %c0_173] : memref<9x64x64xf32, #tpu.memory_space<vmem>>, vector<1x64x64xf32>
    %209 = vector.shape_cast %208 : vector<1x64x64xf32> to vector<64x64xf32>
    %cst_174 = arith.constant dense<0.000000e+00> : vector<4x64xf32>
    %210 = tpu.matmul %150, %209, %cst_174 {dimension_numbers = #tpu.dot_dimension_numbers<[1], [0], [0], [1], [0, 0, 1, 1], [], []>} : vector<4x64xf32>, vector<64x64xf32>, vector<4x64xf32> -> vector<4x64xf32>
    %c8_175 = arith.constant 8 : index
    %c0_176 = arith.constant 0 : index
    %c0_177 = arith.constant 0 : index
    %211 = vector.load %arg8[%c8_175, %c0_176, %c0_177] : memref<9x4x4xf32, #tpu.memory_space<vmem>>, vector<1x4x4xf32>
    %212 = vector.shape_cast %211 : vector<1x4x4xf32> to vector<4x4xf32>
    %cst_178 = arith.constant dense<0.000000e+00> : vector<4x64xf32>
    %213 = tpu.matmul %212, %210, %cst_178 {dimension_numbers = #tpu.dot_dimension_numbers<[1], [0], [0], [1], [0, 0, 1, 1], [], []>} : vector<4x4xf32>, vector<4x64xf32>, vector<4x64xf32> -> vector<4x64xf32>
    %214 = arith.addf %207, %213 : vector<4x64xf32>
    %215 = vector.shape_cast %214 : vector<4x64xf32> to vector<1x4x64xf32>
    %cst_179 = arith.constant dense<0.000000e+00> : vector<1xf32>
    %216 = vector.multi_reduction <add>, %215, %cst_179 [1, 2] : vector<1x4x64xf32> to vector<1xf32>
    %217 = vector.shape_cast %216 : vector<1xf32> to vector<1x1x1xf32>
    %218 = vector.extract %217[0, 0, 0] : f32 from vector<1x1x1xf32>
    %219 = vector.broadcast %218 : f32 to vector<1x1xf32>
    %cst_180 = arith.constant 2.560000e+02 : f32
    %220 = vector.broadcast %cst_180 : f32 to vector<1x1xf32>
    %221 = arith.divf %219, %220 : vector<1x1xf32>
    %222 = vector.broadcast %221 : vector<1x1xf32> to vector<4x64xf32>
    %223 = arith.subf %214, %222 : vector<4x64xf32>
    %224 = arith.mulf %223, %223 : vector<4x64xf32>
    %225 = vector.shape_cast %224 : vector<4x64xf32> to vector<1x4x64xf32>
    %cst_181 = arith.constant dense<0.000000e+00> : vector<1xf32>
    %226 = vector.multi_reduction <add>, %225, %cst_181 [1, 2] : vector<1x4x64xf32> to vector<1xf32>
    %227 = vector.shape_cast %226 : vector<1xf32> to vector<1x1x1xf32>
    %228 = vector.extract %227[0, 0, 0] : f32 from vector<1x1x1xf32>
    %229 = vector.broadcast %228 : f32 to vector<1x1xf32>
    %cst_182 = arith.constant 2.560000e+02 : f32
    %230 = vector.broadcast %cst_182 : f32 to vector<1x1xf32>
    %231 = arith.divf %229, %230 : vector<1x1xf32>
    %232 = vector.broadcast %221 : vector<1x1xf32> to vector<4x64xf32>
    %233 = arith.subf %214, %232 : vector<4x64xf32>
    %cst_183 = arith.constant 9.99999974E-6 : f32
    %234 = vector.broadcast %cst_183 : f32 to vector<1x1xf32>
    %235 = arith.addf %231, %234 : vector<1x1xf32>
    %236 = math.rsqrt %235 : vector<1x1xf32>
    %237 = vector.broadcast %236 : vector<1x1xf32> to vector<4x64xf32>
    %238 = arith.mulf %233, %237 : vector<4x64xf32>
    %c0_184 = arith.constant 0 : index
    %c0_185 = arith.constant 0 : index
    %239 = vector.load %arg9[%c0_184, %c0_185] : memref<4x1xf32, #tpu.memory_space<vmem>>, vector<4x1xf32>
    %240 = vector.broadcast %239 : vector<4x1xf32> to vector<4x64xf32>
    %241 = arith.mulf %238, %240 : vector<4x64xf32>
    %c0_186 = arith.constant 0 : index
    %c0_187 = arith.constant 0 : index
    %242 = vector.load %arg10[%c0_186, %c0_187] : memref<4x1xf32, #tpu.memory_space<vmem>>, vector<4x1xf32>
    %243 = vector.broadcast %242 : vector<4x1xf32> to vector<4x64xf32>
    %244 = arith.addf %241, %243 : vector<4x64xf32>
    %cst_188 = arith.constant 0.000000e+00 : f32
    %245 = vector.broadcast %cst_188 : f32 to vector<8x64xf32>
    %c0_189 = arith.constant 0 : index
    %c0_190 = arith.constant 0 : index
    %c0_191 = arith.constant 0 : index
    %246 = vector.load %arg4[%c0_189, %c0_190, %c0_191] : memref<9x64x64xf32, #tpu.memory_space<vmem>>, vector<1x64x64xf32>
    %247 = vector.shape_cast %246 : vector<1x64x64xf32> to vector<64x64xf32>
    %cst_192 = arith.constant dense<0.000000e+00> : vector<4x64xf32>
    %248 = tpu.matmul %244, %247, %cst_192 {dimension_numbers = #tpu.dot_dimension_numbers<[1], [0], [0], [1], [0, 0, 1, 1], [], []>} : vector<4x64xf32>, vector<64x64xf32>, vector<4x64xf32> -> vector<4x64xf32>
    %c0_193 = arith.constant 0 : index
    %c0_194 = arith.constant 0 : index
    %c0_195 = arith.constant 0 : index
    %249 = vector.load %arg11[%c0_193, %c0_194, %c0_195] : memref<9x8x4xf32, #tpu.memory_space<vmem>>, vector<1x8x4xf32>
    %250 = vector.shape_cast %249 : vector<1x8x4xf32> to vector<8x4xf32>
    %cst_196 = arith.constant dense<0.000000e+00> : vector<8x64xf32>
    %251 = tpu.matmul %250, %248, %cst_196 {dimension_numbers = #tpu.dot_dimension_numbers<[1], [0], [0], [1], [0, 0, 1, 1], [], []>} : vector<8x4xf32>, vector<4x64xf32>, vector<8x64xf32> -> vector<8x64xf32>
    %252 = arith.addf %245, %251 : vector<8x64xf32>
    %c1_197 = arith.constant 1 : index
    %c0_198 = arith.constant 0 : index
    %c0_199 = arith.constant 0 : index
    %253 = vector.load %arg4[%c1_197, %c0_198, %c0_199] : memref<9x64x64xf32, #tpu.memory_space<vmem>>, vector<1x64x64xf32>
    %254 = vector.shape_cast %253 : vector<1x64x64xf32> to vector<64x64xf32>
    %cst_200 = arith.constant dense<0.000000e+00> : vector<4x64xf32>
    %255 = tpu.matmul %244, %254, %cst_200 {dimension_numbers = #tpu.dot_dimension_numbers<[1], [0], [0], [1], [0, 0, 1, 1], [], []>} : vector<4x64xf32>, vector<64x64xf32>, vector<4x64xf32> -> vector<4x64xf32>
    %c1_201 = arith.constant 1 : index
    %c0_202 = arith.constant 0 : index
    %c0_203 = arith.constant 0 : index
    %256 = vector.load %arg11[%c1_201, %c0_202, %c0_203] : memref<9x8x4xf32, #tpu.memory_space<vmem>>, vector<1x8x4xf32>
    %257 = vector.shape_cast %256 : vector<1x8x4xf32> to vector<8x4xf32>
    %cst_204 = arith.constant dense<0.000000e+00> : vector<8x64xf32>
    %258 = tpu.matmul %257, %255, %cst_204 {dimension_numbers = #tpu.dot_dimension_numbers<[1], [0], [0], [1], [0, 0, 1, 1], [], []>} : vector<8x4xf32>, vector<4x64xf32>, vector<8x64xf32> -> vector<8x64xf32>
    %259 = arith.addf %252, %258 : vector<8x64xf32>
    %c2_205 = arith.constant 2 : index
    %c0_206 = arith.constant 0 : index
    %c0_207 = arith.constant 0 : index
    %260 = vector.load %arg4[%c2_205, %c0_206, %c0_207] : memref<9x64x64xf32, #tpu.memory_space<vmem>>, vector<1x64x64xf32>
    %261 = vector.shape_cast %260 : vector<1x64x64xf32> to vector<64x64xf32>
    %cst_208 = arith.constant dense<0.000000e+00> : vector<4x64xf32>
    %262 = tpu.matmul %244, %261, %cst_208 {dimension_numbers = #tpu.dot_dimension_numbers<[1], [0], [0], [1], [0, 0, 1, 1], [], []>} : vector<4x64xf32>, vector<64x64xf32>, vector<4x64xf32> -> vector<4x64xf32>
    %c2_209 = arith.constant 2 : index
    %c0_210 = arith.constant 0 : index
    %c0_211 = arith.constant 0 : index
    %263 = vector.load %arg11[%c2_209, %c0_210, %c0_211] : memref<9x8x4xf32, #tpu.memory_space<vmem>>, vector<1x8x4xf32>
    %264 = vector.shape_cast %263 : vector<1x8x4xf32> to vector<8x4xf32>
    %cst_212 = arith.constant dense<0.000000e+00> : vector<8x64xf32>
    %265 = tpu.matmul %264, %262, %cst_212 {dimension_numbers = #tpu.dot_dimension_numbers<[1], [0], [0], [1], [0, 0, 1, 1], [], []>} : vector<8x4xf32>, vector<4x64xf32>, vector<8x64xf32> -> vector<8x64xf32>
    %266 = arith.addf %259, %265 : vector<8x64xf32>
    %c3_213 = arith.constant 3 : index
    %c0_214 = arith.constant 0 : index
    %c0_215 = arith.constant 0 : index
    %267 = vector.load %arg4[%c3_213, %c0_214, %c0_215] : memref<9x64x64xf32, #tpu.memory_space<vmem>>, vector<1x64x64xf32>
    %268 = vector.shape_cast %267 : vector<1x64x64xf32> to vector<64x64xf32>
    %cst_216 = arith.constant dense<0.000000e+00> : vector<4x64xf32>
    %269 = tpu.matmul %244, %268, %cst_216 {dimension_numbers = #tpu.dot_dimension_numbers<[1], [0], [0], [1], [0, 0, 1, 1], [], []>} : vector<4x64xf32>, vector<64x64xf32>, vector<4x64xf32> -> vector<4x64xf32>
    %c3_217 = arith.constant 3 : index
    %c0_218 = arith.constant 0 : index
    %c0_219 = arith.constant 0 : index
    %270 = vector.load %arg11[%c3_217, %c0_218, %c0_219] : memref<9x8x4xf32, #tpu.memory_space<vmem>>, vector<1x8x4xf32>
    %271 = vector.shape_cast %270 : vector<1x8x4xf32> to vector<8x4xf32>
    %cst_220 = arith.constant dense<0.000000e+00> : vector<8x64xf32>
    %272 = tpu.matmul %271, %269, %cst_220 {dimension_numbers = #tpu.dot_dimension_numbers<[1], [0], [0], [1], [0, 0, 1, 1], [], []>} : vector<8x4xf32>, vector<4x64xf32>, vector<8x64xf32> -> vector<8x64xf32>
    %273 = arith.addf %266, %272 : vector<8x64xf32>
    %c4_221 = arith.constant 4 : index
    %c0_222 = arith.constant 0 : index
    %c0_223 = arith.constant 0 : index
    %274 = vector.load %arg4[%c4_221, %c0_222, %c0_223] : memref<9x64x64xf32, #tpu.memory_space<vmem>>, vector<1x64x64xf32>
    %275 = vector.shape_cast %274 : vector<1x64x64xf32> to vector<64x64xf32>
    %cst_224 = arith.constant dense<0.000000e+00> : vector<4x64xf32>
    %276 = tpu.matmul %244, %275, %cst_224 {dimension_numbers = #tpu.dot_dimension_numbers<[1], [0], [0], [1], [0, 0, 1, 1], [], []>} : vector<4x64xf32>, vector<64x64xf32>, vector<4x64xf32> -> vector<4x64xf32>
    %c4_225 = arith.constant 4 : index
    %c0_226 = arith.constant 0 : index
    %c0_227 = arith.constant 0 : index
    %277 = vector.load %arg11[%c4_225, %c0_226, %c0_227] : memref<9x8x4xf32, #tpu.memory_space<vmem>>, vector<1x8x4xf32>
    %278 = vector.shape_cast %277 : vector<1x8x4xf32> to vector<8x4xf32>
    %cst_228 = arith.constant dense<0.000000e+00> : vector<8x64xf32>
    %279 = tpu.matmul %278, %276, %cst_228 {dimension_numbers = #tpu.dot_dimension_numbers<[1], [0], [0], [1], [0, 0, 1, 1], [], []>} : vector<8x4xf32>, vector<4x64xf32>, vector<8x64xf32> -> vector<8x64xf32>
    %280 = arith.addf %273, %279 : vector<8x64xf32>
    %c5_229 = arith.constant 5 : index
    %c0_230 = arith.constant 0 : index
    %c0_231 = arith.constant 0 : index
    %281 = vector.load %arg4[%c5_229, %c0_230, %c0_231] : memref<9x64x64xf32, #tpu.memory_space<vmem>>, vector<1x64x64xf32>
    %282 = vector.shape_cast %281 : vector<1x64x64xf32> to vector<64x64xf32>
    %cst_232 = arith.constant dense<0.000000e+00> : vector<4x64xf32>
    %283 = tpu.matmul %244, %282, %cst_232 {dimension_numbers = #tpu.dot_dimension_numbers<[1], [0], [0], [1], [0, 0, 1, 1], [], []>} : vector<4x64xf32>, vector<64x64xf32>, vector<4x64xf32> -> vector<4x64xf32>
    %c5_233 = arith.constant 5 : index
    %c0_234 = arith.constant 0 : index
    %c0_235 = arith.constant 0 : index
    %284 = vector.load %arg11[%c5_233, %c0_234, %c0_235] : memref<9x8x4xf32, #tpu.memory_space<vmem>>, vector<1x8x4xf32>
    %285 = vector.shape_cast %284 : vector<1x8x4xf32> to vector<8x4xf32>
    %cst_236 = arith.constant dense<0.000000e+00> : vector<8x64xf32>
    %286 = tpu.matmul %285, %283, %cst_236 {dimension_numbers = #tpu.dot_dimension_numbers<[1], [0], [0], [1], [0, 0, 1, 1], [], []>} : vector<8x4xf32>, vector<4x64xf32>, vector<8x64xf32> -> vector<8x64xf32>
    %287 = arith.addf %280, %286 : vector<8x64xf32>
    %c6_237 = arith.constant 6 : index
    %c0_238 = arith.constant 0 : index
    %c0_239 = arith.constant 0 : index
    %288 = vector.load %arg4[%c6_237, %c0_238, %c0_239] : memref<9x64x64xf32, #tpu.memory_space<vmem>>, vector<1x64x64xf32>
    %289 = vector.shape_cast %288 : vector<1x64x64xf32> to vector<64x64xf32>
    %cst_240 = arith.constant dense<0.000000e+00> : vector<4x64xf32>
    %290 = tpu.matmul %244, %289, %cst_240 {dimension_numbers = #tpu.dot_dimension_numbers<[1], [0], [0], [1], [0, 0, 1, 1], [], []>} : vector<4x64xf32>, vector<64x64xf32>, vector<4x64xf32> -> vector<4x64xf32>
    %c6_241 = arith.constant 6 : index
    %c0_242 = arith.constant 0 : index
    %c0_243 = arith.constant 0 : index
    %291 = vector.load %arg11[%c6_241, %c0_242, %c0_243] : memref<9x8x4xf32, #tpu.memory_space<vmem>>, vector<1x8x4xf32>
    %292 = vector.shape_cast %291 : vector<1x8x4xf32> to vector<8x4xf32>
    %cst_244 = arith.constant dense<0.000000e+00> : vector<8x64xf32>
    %293 = tpu.matmul %292, %290, %cst_244 {dimension_numbers = #tpu.dot_dimension_numbers<[1], [0], [0], [1], [0, 0, 1, 1], [], []>} : vector<8x4xf32>, vector<4x64xf32>, vector<8x64xf32> -> vector<8x64xf32>
    %294 = arith.addf %287, %293 : vector<8x64xf32>
    %c7_245 = arith.constant 7 : index
    %c0_246 = arith.constant 0 : index
    %c0_247 = arith.constant 0 : index
    %295 = vector.load %arg4[%c7_245, %c0_246, %c0_247] : memref<9x64x64xf32, #tpu.memory_space<vmem>>, vector<1x64x64xf32>
    %296 = vector.shape_cast %295 : vector<1x64x64xf32> to vector<64x64xf32>
    %cst_248 = arith.constant dense<0.000000e+00> : vector<4x64xf32>
    %297 = tpu.matmul %244, %296, %cst_248 {dimension_numbers = #tpu.dot_dimension_numbers<[1], [0], [0], [1], [0, 0, 1, 1], [], []>} : vector<4x64xf32>, vector<64x64xf32>, vector<4x64xf32> -> vector<4x64xf32>
    %c7_249 = arith.constant 7 : index
    %c0_250 = arith.constant 0 : index
    %c0_251 = arith.constant 0 : index
    %298 = vector.load %arg11[%c7_249, %c0_250, %c0_251] : memref<9x8x4xf32, #tpu.memory_space<vmem>>, vector<1x8x4xf32>
    %299 = vector.shape_cast %298 : vector<1x8x4xf32> to vector<8x4xf32>
    %cst_252 = arith.constant dense<0.000000e+00> : vector<8x64xf32>
    %300 = tpu.matmul %299, %297, %cst_252 {dimension_numbers = #tpu.dot_dimension_numbers<[1], [0], [0], [1], [0, 0, 1, 1], [], []>} : vector<8x4xf32>, vector<4x64xf32>, vector<8x64xf32> -> vector<8x64xf32>
    %301 = arith.addf %294, %300 : vector<8x64xf32>
    %c8_253 = arith.constant 8 : index
    %c0_254 = arith.constant 0 : index
    %c0_255 = arith.constant 0 : index
    %302 = vector.load %arg4[%c8_253, %c0_254, %c0_255] : memref<9x64x64xf32, #tpu.memory_space<vmem>>, vector<1x64x64xf32>
    %303 = vector.shape_cast %302 : vector<1x64x64xf32> to vector<64x64xf32>
    %cst_256 = arith.constant dense<0.000000e+00> : vector<4x64xf32>
    %304 = tpu.matmul %244, %303, %cst_256 {dimension_numbers = #tpu.dot_dimension_numbers<[1], [0], [0], [1], [0, 0, 1, 1], [], []>} : vector<4x64xf32>, vector<64x64xf32>, vector<4x64xf32> -> vector<4x64xf32>
    %c8_257 = arith.constant 8 : index
    %c0_258 = arith.constant 0 : index
    %c0_259 = arith.constant 0 : index
    %305 = vector.load %arg11[%c8_257, %c0_258, %c0_259] : memref<9x8x4xf32, #tpu.memory_space<vmem>>, vector<1x8x4xf32>
    %306 = vector.shape_cast %305 : vector<1x8x4xf32> to vector<8x4xf32>
    %cst_260 = arith.constant dense<0.000000e+00> : vector<8x64xf32>
    %307 = tpu.matmul %306, %304, %cst_260 {dimension_numbers = #tpu.dot_dimension_numbers<[1], [0], [0], [1], [0, 0, 1, 1], [], []>} : vector<8x4xf32>, vector<4x64xf32>, vector<8x64xf32> -> vector<8x64xf32>
    %308 = arith.addf %301, %307 : vector<8x64xf32>
    %309 = vector.shape_cast %308 : vector<8x64xf32> to vector<1x8x64xf32>
    %cst_261 = arith.constant dense<0.000000e+00> : vector<1xf32>
    %310 = vector.multi_reduction <add>, %309, %cst_261 [1, 2] : vector<1x8x64xf32> to vector<1xf32>
    %311 = vector.shape_cast %310 : vector<1xf32> to vector<1x1x1xf32>
    %312 = vector.extract %311[0, 0, 0] : f32 from vector<1x1x1xf32>
    %313 = vector.broadcast %312 : f32 to vector<1x1xf32>
    %cst_262 = arith.constant 5.120000e+02 : f32
    %314 = vector.broadcast %cst_262 : f32 to vector<1x1xf32>
    %315 = arith.divf %313, %314 : vector<1x1xf32>
    %316 = vector.broadcast %315 : vector<1x1xf32> to vector<8x64xf32>
    %317 = arith.subf %308, %316 : vector<8x64xf32>
    %318 = arith.mulf %317, %317 : vector<8x64xf32>
    %319 = vector.shape_cast %318 : vector<8x64xf32> to vector<1x8x64xf32>
    %cst_263 = arith.constant dense<0.000000e+00> : vector<1xf32>
    %320 = vector.multi_reduction <add>, %319, %cst_263 [1, 2] : vector<1x8x64xf32> to vector<1xf32>
    %321 = vector.shape_cast %320 : vector<1xf32> to vector<1x1x1xf32>
    %322 = vector.extract %321[0, 0, 0] : f32 from vector<1x1x1xf32>
    %323 = vector.broadcast %322 : f32 to vector<1x1xf32>
    %cst_264 = arith.constant 5.120000e+02 : f32
    %324 = vector.broadcast %cst_264 : f32 to vector<1x1xf32>
    %325 = arith.divf %323, %324 : vector<1x1xf32>
    %326 = vector.broadcast %315 : vector<1x1xf32> to vector<8x64xf32>
    %327 = arith.subf %308, %326 : vector<8x64xf32>
    %cst_265 = arith.constant 9.99999974E-6 : f32
    %328 = vector.broadcast %cst_265 : f32 to vector<1x1xf32>
    %329 = arith.addf %325, %328 : vector<1x1xf32>
    %330 = math.rsqrt %329 : vector<1x1xf32>
    %331 = vector.broadcast %330 : vector<1x1xf32> to vector<8x64xf32>
    %332 = arith.mulf %327, %331 : vector<8x64xf32>
    %c0_266 = arith.constant 0 : index
    %c0_267 = arith.constant 0 : index
    %333 = vector.load %arg12[%c0_266, %c0_267] : memref<8x1xf32, #tpu.memory_space<vmem>>, vector<8x1xf32>
    %334 = vector.broadcast %333 : vector<8x1xf32> to vector<8x64xf32>
    %335 = arith.mulf %332, %334 : vector<8x64xf32>
    %c0_268 = arith.constant 0 : index
    %c0_269 = arith.constant 0 : index
    %336 = vector.load %arg13[%c0_268, %c0_269] : memref<8x1xf32, #tpu.memory_space<vmem>>, vector<8x1xf32>
    %337 = vector.broadcast %336 : vector<8x1xf32> to vector<8x64xf32>
    %338 = arith.addf %335, %337 : vector<8x64xf32>
    %cst_270 = arith.constant 0.707106769 : f32
    %339 = vector.broadcast %cst_270 : f32 to vector<8x64xf32>
    %340 = arith.mulf %338, %339 : vector<8x64xf32>
    %cst_271 = arith.constant 0.000000e+00 : f32
    %341 = vector.broadcast %cst_271 : f32 to vector<8x64xf32>
    %342 = arith.cmpf oge, %340, %341 : vector<8x64xf32>
    %cst_272 = arith.constant 1.000000e+00 : f32
    %cst_273 = arith.constant -1.000000e+00 : f32
    %343 = vector.broadcast %cst_272 : f32 to vector<8x64xf32>
    %344 = vector.broadcast %cst_273 : f32 to vector<8x64xf32>
    %345 = arith.select %342, %343, %344 : vector<8x64xi1>, vector<8x64xf32>
    %346 = math.absf %340 : vector<8x64xf32>
    %cst_274 = arith.constant 0.327591091 : f32
    %347 = vector.broadcast %cst_274 : f32 to vector<8x64xf32>
    %348 = arith.mulf %347, %346 : vector<8x64xf32>
    %cst_275 = arith.constant 1.000000e+00 : f32
    %349 = vector.broadcast %cst_275 : f32 to vector<8x64xf32>
    %350 = arith.addf %349, %348 : vector<8x64xf32>
    %351 = tpu.reciprocal %350 {approx = true} : vector<8x64xf32> -> vector<8x64xf32>
    %cst_276 = arith.constant 1.06140542 : f32
    %352 = vector.broadcast %cst_276 : f32 to vector<8x64xf32>
    %353 = arith.mulf %352, %351 : vector<8x64xf32>
    %cst_277 = arith.constant -1.45315206 : f32
    %354 = vector.broadcast %cst_277 : f32 to vector<8x64xf32>
    %355 = arith.addf %353, %354 : vector<8x64xf32>
    %356 = arith.mulf %355, %351 : vector<8x64xf32>
    %cst_278 = arith.constant 1.42141378 : f32
    %357 = vector.broadcast %cst_278 : f32 to vector<8x64xf32>
    %358 = arith.addf %356, %357 : vector<8x64xf32>
    %359 = arith.mulf %358, %351 : vector<8x64xf32>
    %cst_279 = arith.constant -0.284496725 : f32
    %360 = vector.broadcast %cst_279 : f32 to vector<8x64xf32>
    %361 = arith.addf %359, %360 : vector<8x64xf32>
    %362 = arith.mulf %361, %351 : vector<8x64xf32>
    %cst_280 = arith.constant 0.254829586 : f32
    %363 = vector.broadcast %cst_280 : f32 to vector<8x64xf32>
    %364 = arith.addf %362, %363 : vector<8x64xf32>
    %365 = arith.mulf %364, %351 : vector<8x64xf32>
    %cst_281 = arith.constant 0.000000e+00 : f32
    %366 = vector.broadcast %cst_281 : f32 to vector<8x64xf32>
    %367 = arith.subf %366, %346 : vector<8x64xf32>
    %368 = arith.mulf %367, %346 : vector<8x64xf32>
    %369 = math.exp %368 : vector<8x64xf32>
    %370 = arith.mulf %365, %369 : vector<8x64xf32>
    %cst_282 = arith.constant 1.000000e+00 : f32
    %371 = vector.broadcast %cst_282 : f32 to vector<8x64xf32>
    %372 = arith.subf %371, %370 : vector<8x64xf32>
    %373 = arith.mulf %345, %372 : vector<8x64xf32>
    %cst_283 = arith.constant 5.000000e-01 : f32
    %374 = vector.broadcast %cst_283 : f32 to vector<8x64xf32>
    %375 = arith.mulf %374, %338 : vector<8x64xf32>
    %cst_284 = arith.constant 1.000000e+00 : f32
    %376 = vector.broadcast %cst_284 : f32 to vector<8x64xf32>
    %377 = arith.addf %376, %373 : vector<8x64xf32>
    %378 = arith.mulf %375, %377 : vector<8x64xf32>
    %cst_285 = arith.constant 0.000000e+00 : f32
    %379 = vector.broadcast %cst_285 : f32 to vector<8x64xf32>
    %c0_286 = arith.constant 0 : index
    %c0_287 = arith.constant 0 : index
    %c0_288 = arith.constant 0 : index
    %380 = vector.load %arg4[%c0_286, %c0_287, %c0_288] : memref<9x64x64xf32, #tpu.memory_space<vmem>>, vector<1x64x64xf32>
    %381 = vector.shape_cast %380 : vector<1x64x64xf32> to vector<64x64xf32>
    %cst_289 = arith.constant dense<0.000000e+00> : vector<8x64xf32>
    %382 = tpu.matmul %378, %381, %cst_289 {dimension_numbers = #tpu.dot_dimension_numbers<[1], [0], [0], [1], [0, 0, 1, 1], [], []>} : vector<8x64xf32>, vector<64x64xf32>, vector<8x64xf32> -> vector<8x64xf32>
    %c0_290 = arith.constant 0 : index
    %c0_291 = arith.constant 0 : index
    %c0_292 = arith.constant 0 : index
    %383 = vector.load %arg14[%c0_290, %c0_291, %c0_292] : memref<9x8x8xf32, #tpu.memory_space<vmem>>, vector<1x8x8xf32>
    %384 = vector.shape_cast %383 : vector<1x8x8xf32> to vector<8x8xf32>
    %cst_293 = arith.constant dense<0.000000e+00> : vector<8x64xf32>
    %385 = tpu.matmul %384, %382, %cst_293 {dimension_numbers = #tpu.dot_dimension_numbers<[1], [0], [0], [1], [0, 0, 1, 1], [], []>} : vector<8x8xf32>, vector<8x64xf32>, vector<8x64xf32> -> vector<8x64xf32>
    %386 = arith.addf %379, %385 : vector<8x64xf32>
    %c1_294 = arith.constant 1 : index
    %c0_295 = arith.constant 0 : index
    %c0_296 = arith.constant 0 : index
    %387 = vector.load %arg4[%c1_294, %c0_295, %c0_296] : memref<9x64x64xf32, #tpu.memory_space<vmem>>, vector<1x64x64xf32>
    %388 = vector.shape_cast %387 : vector<1x64x64xf32> to vector<64x64xf32>
    %cst_297 = arith.constant dense<0.000000e+00> : vector<8x64xf32>
    %389 = tpu.matmul %378, %388, %cst_297 {dimension_numbers = #tpu.dot_dimension_numbers<[1], [0], [0], [1], [0, 0, 1, 1], [], []>} : vector<8x64xf32>, vector<64x64xf32>, vector<8x64xf32> -> vector<8x64xf32>
    %c1_298 = arith.constant 1 : index
    %c0_299 = arith.constant 0 : index
    %c0_300 = arith.constant 0 : index
    %390 = vector.load %arg14[%c1_298, %c0_299, %c0_300] : memref<9x8x8xf32, #tpu.memory_space<vmem>>, vector<1x8x8xf32>
    %391 = vector.shape_cast %390 : vector<1x8x8xf32> to vector<8x8xf32>
    %cst_301 = arith.constant dense<0.000000e+00> : vector<8x64xf32>
    %392 = tpu.matmul %391, %389, %cst_301 {dimension_numbers = #tpu.dot_dimension_numbers<[1], [0], [0], [1], [0, 0, 1, 1], [], []>} : vector<8x8xf32>, vector<8x64xf32>, vector<8x64xf32> -> vector<8x64xf32>
    %393 = arith.addf %386, %392 : vector<8x64xf32>
    %c2_302 = arith.constant 2 : index
    %c0_303 = arith.constant 0 : index
    %c0_304 = arith.constant 0 : index
    %394 = vector.load %arg4[%c2_302, %c0_303, %c0_304] : memref<9x64x64xf32, #tpu.memory_space<vmem>>, vector<1x64x64xf32>
    %395 = vector.shape_cast %394 : vector<1x64x64xf32> to vector<64x64xf32>
    %cst_305 = arith.constant dense<0.000000e+00> : vector<8x64xf32>
    %396 = tpu.matmul %378, %395, %cst_305 {dimension_numbers = #tpu.dot_dimension_numbers<[1], [0], [0], [1], [0, 0, 1, 1], [], []>} : vector<8x64xf32>, vector<64x64xf32>, vector<8x64xf32> -> vector<8x64xf32>
    %c2_306 = arith.constant 2 : index
    %c0_307 = arith.constant 0 : index
    %c0_308 = arith.constant 0 : index
    %397 = vector.load %arg14[%c2_306, %c0_307, %c0_308] : memref<9x8x8xf32, #tpu.memory_space<vmem>>, vector<1x8x8xf32>
    %398 = vector.shape_cast %397 : vector<1x8x8xf32> to vector<8x8xf32>
    %cst_309 = arith.constant dense<0.000000e+00> : vector<8x64xf32>
    %399 = tpu.matmul %398, %396, %cst_309 {dimension_numbers = #tpu.dot_dimension_numbers<[1], [0], [0], [1], [0, 0, 1, 1], [], []>} : vector<8x8xf32>, vector<8x64xf32>, vector<8x64xf32> -> vector<8x64xf32>
    %400 = arith.addf %393, %399 : vector<8x64xf32>
    %c3_310 = arith.constant 3 : index
    %c0_311 = arith.constant 0 : index
    %c0_312 = arith.constant 0 : index
    %401 = vector.load %arg4[%c3_310, %c0_311, %c0_312] : memref<9x64x64xf32, #tpu.memory_space<vmem>>, vector<1x64x64xf32>
    %402 = vector.shape_cast %401 : vector<1x64x64xf32> to vector<64x64xf32>
    %cst_313 = arith.constant dense<0.000000e+00> : vector<8x64xf32>
    %403 = tpu.matmul %378, %402, %cst_313 {dimension_numbers = #tpu.dot_dimension_numbers<[1], [0], [0], [1], [0, 0, 1, 1], [], []>} : vector<8x64xf32>, vector<64x64xf32>, vector<8x64xf32> -> vector<8x64xf32>
    %c3_314 = arith.constant 3 : index
    %c0_315 = arith.constant 0 : index
    %c0_316 = arith.constant 0 : index
    %404 = vector.load %arg14[%c3_314, %c0_315, %c0_316] : memref<9x8x8xf32, #tpu.memory_space<vmem>>, vector<1x8x8xf32>
    %405 = vector.shape_cast %404 : vector<1x8x8xf32> to vector<8x8xf32>
    %cst_317 = arith.constant dense<0.000000e+00> : vector<8x64xf32>
    %406 = tpu.matmul %405, %403, %cst_317 {dimension_numbers = #tpu.dot_dimension_numbers<[1], [0], [0], [1], [0, 0, 1, 1], [], []>} : vector<8x8xf32>, vector<8x64xf32>, vector<8x64xf32> -> vector<8x64xf32>
    %407 = arith.addf %400, %406 : vector<8x64xf32>
    %c4_318 = arith.constant 4 : index
    %c0_319 = arith.constant 0 : index
    %c0_320 = arith.constant 0 : index
    %408 = vector.load %arg4[%c4_318, %c0_319, %c0_320] : memref<9x64x64xf32, #tpu.memory_space<vmem>>, vector<1x64x64xf32>
    %409 = vector.shape_cast %408 : vector<1x64x64xf32> to vector<64x64xf32>
    %cst_321 = arith.constant dense<0.000000e+00> : vector<8x64xf32>
    %410 = tpu.matmul %378, %409, %cst_321 {dimension_numbers = #tpu.dot_dimension_numbers<[1], [0], [0], [1], [0, 0, 1, 1], [], []>} : vector<8x64xf32>, vector<64x64xf32>, vector<8x64xf32> -> vector<8x64xf32>
    %c4_322 = arith.constant 4 : index
    %c0_323 = arith.constant 0 : index
    %c0_324 = arith.constant 0 : index
    %411 = vector.load %arg14[%c4_322, %c0_323, %c0_324] : memref<9x8x8xf32, #tpu.memory_space<vmem>>, vector<1x8x8xf32>
    %412 = vector.shape_cast %411 : vector<1x8x8xf32> to vector<8x8xf32>
    %cst_325 = arith.constant dense<0.000000e+00> : vector<8x64xf32>
    %413 = tpu.matmul %412, %410, %cst_325 {dimension_numbers = #tpu.dot_dimension_numbers<[1], [0], [0], [1], [0, 0, 1, 1], [], []>} : vector<8x8xf32>, vector<8x64xf32>, vector<8x64xf32> -> vector<8x64xf32>
    %414 = arith.addf %407, %413 : vector<8x64xf32>
    %c5_326 = arith.constant 5 : index
    %c0_327 = arith.constant 0 : index
    %c0_328 = arith.constant 0 : index
    %415 = vector.load %arg4[%c5_326, %c0_327, %c0_328] : memref<9x64x64xf32, #tpu.memory_space<vmem>>, vector<1x64x64xf32>
    %416 = vector.shape_cast %415 : vector<1x64x64xf32> to vector<64x64xf32>
    %cst_329 = arith.constant dense<0.000000e+00> : vector<8x64xf32>
    %417 = tpu.matmul %378, %416, %cst_329 {dimension_numbers = #tpu.dot_dimension_numbers<[1], [0], [0], [1], [0, 0, 1, 1], [], []>} : vector<8x64xf32>, vector<64x64xf32>, vector<8x64xf32> -> vector<8x64xf32>
    %c5_330 = arith.constant 5 : index
    %c0_331 = arith.constant 0 : index
    %c0_332 = arith.constant 0 : index
    %418 = vector.load %arg14[%c5_330, %c0_331, %c0_332] : memref<9x8x8xf32, #tpu.memory_space<vmem>>, vector<1x8x8xf32>
    %419 = vector.shape_cast %418 : vector<1x8x8xf32> to vector<8x8xf32>
    %cst_333 = arith.constant dense<0.000000e+00> : vector<8x64xf32>
    %420 = tpu.matmul %419, %417, %cst_333 {dimension_numbers = #tpu.dot_dimension_numbers<[1], [0], [0], [1], [0, 0, 1, 1], [], []>} : vector<8x8xf32>, vector<8x64xf32>, vector<8x64xf32> -> vector<8x64xf32>
    %421 = arith.addf %414, %420 : vector<8x64xf32>
    %c6_334 = arith.constant 6 : index
    %c0_335 = arith.constant 0 : index
    %c0_336 = arith.constant 0 : index
    %422 = vector.load %arg4[%c6_334, %c0_335, %c0_336] : memref<9x64x64xf32, #tpu.memory_space<vmem>>, vector<1x64x64xf32>
    %423 = vector.shape_cast %422 : vector<1x64x64xf32> to vector<64x64xf32>
    %cst_337 = arith.constant dense<0.000000e+00> : vector<8x64xf32>
    %424 = tpu.matmul %378, %423, %cst_337 {dimension_numbers = #tpu.dot_dimension_numbers<[1], [0], [0], [1], [0, 0, 1, 1], [], []>} : vector<8x64xf32>, vector<64x64xf32>, vector<8x64xf32> -> vector<8x64xf32>
    %c6_338 = arith.constant 6 : index
    %c0_339 = arith.constant 0 : index
    %c0_340 = arith.constant 0 : index
    %425 = vector.load %arg14[%c6_338, %c0_339, %c0_340] : memref<9x8x8xf32, #tpu.memory_space<vmem>>, vector<1x8x8xf32>
    %426 = vector.shape_cast %425 : vector<1x8x8xf32> to vector<8x8xf32>
    %cst_341 = arith.constant dense<0.000000e+00> : vector<8x64xf32>
    %427 = tpu.matmul %426, %424, %cst_341 {dimension_numbers = #tpu.dot_dimension_numbers<[1], [0], [0], [1], [0, 0, 1, 1], [], []>} : vector<8x8xf32>, vector<8x64xf32>, vector<8x64xf32> -> vector<8x64xf32>
    %428 = arith.addf %421, %427 : vector<8x64xf32>
    %c7_342 = arith.constant 7 : index
    %c0_343 = arith.constant 0 : index
    %c0_344 = arith.constant 0 : index
    %429 = vector.load %arg4[%c7_342, %c0_343, %c0_344] : memref<9x64x64xf32, #tpu.memory_space<vmem>>, vector<1x64x64xf32>
    %430 = vector.shape_cast %429 : vector<1x64x64xf32> to vector<64x64xf32>
    %cst_345 = arith.constant dense<0.000000e+00> : vector<8x64xf32>
    %431 = tpu.matmul %378, %430, %cst_345 {dimension_numbers = #tpu.dot_dimension_numbers<[1], [0], [0], [1], [0, 0, 1, 1], [], []>} : vector<8x64xf32>, vector<64x64xf32>, vector<8x64xf32> -> vector<8x64xf32>
    %c7_346 = arith.constant 7 : index
    %c0_347 = arith.constant 0 : index
    %c0_348 = arith.constant 0 : index
    %432 = vector.load %arg14[%c7_346, %c0_347, %c0_348] : memref<9x8x8xf32, #tpu.memory_space<vmem>>, vector<1x8x8xf32>
    %433 = vector.shape_cast %432 : vector<1x8x8xf32> to vector<8x8xf32>
    %cst_349 = arith.constant dense<0.000000e+00> : vector<8x64xf32>
    %434 = tpu.matmul %433, %431, %cst_349 {dimension_numbers = #tpu.dot_dimension_numbers<[1], [0], [0], [1], [0, 0, 1, 1], [], []>} : vector<8x8xf32>, vector<8x64xf32>, vector<8x64xf32> -> vector<8x64xf32>
    %435 = arith.addf %428, %434 : vector<8x64xf32>
    %c8_350 = arith.constant 8 : index
    %c0_351 = arith.constant 0 : index
    %c0_352 = arith.constant 0 : index
    %436 = vector.load %arg4[%c8_350, %c0_351, %c0_352] : memref<9x64x64xf32, #tpu.memory_space<vmem>>, vector<1x64x64xf32>
    %437 = vector.shape_cast %436 : vector<1x64x64xf32> to vector<64x64xf32>
    %cst_353 = arith.constant dense<0.000000e+00> : vector<8x64xf32>
    %438 = tpu.matmul %378, %437, %cst_353 {dimension_numbers = #tpu.dot_dimension_numbers<[1], [0], [0], [1], [0, 0, 1, 1], [], []>} : vector<8x64xf32>, vector<64x64xf32>, vector<8x64xf32> -> vector<8x64xf32>
    %c8_354 = arith.constant 8 : index
    %c0_355 = arith.constant 0 : index
    %c0_356 = arith.constant 0 : index
    %439 = vector.load %arg14[%c8_354, %c0_355, %c0_356] : memref<9x8x8xf32, #tpu.memory_space<vmem>>, vector<1x8x8xf32>
    %440 = vector.shape_cast %439 : vector<1x8x8xf32> to vector<8x8xf32>
    %cst_357 = arith.constant dense<0.000000e+00> : vector<8x64xf32>
    %441 = tpu.matmul %440, %438, %cst_357 {dimension_numbers = #tpu.dot_dimension_numbers<[1], [0], [0], [1], [0, 0, 1, 1], [], []>} : vector<8x8xf32>, vector<8x64xf32>, vector<8x64xf32> -> vector<8x64xf32>
    %442 = arith.addf %435, %441 : vector<8x64xf32>
    %443 = vector.shape_cast %442 : vector<8x64xf32> to vector<1x8x64xf32>
    %cst_358 = arith.constant dense<0.000000e+00> : vector<1xf32>
    %444 = vector.multi_reduction <add>, %443, %cst_358 [1, 2] : vector<1x8x64xf32> to vector<1xf32>
    %445 = vector.shape_cast %444 : vector<1xf32> to vector<1x1x1xf32>
    %446 = vector.extract %445[0, 0, 0] : f32 from vector<1x1x1xf32>
    %447 = vector.broadcast %446 : f32 to vector<1x1xf32>
    %cst_359 = arith.constant 5.120000e+02 : f32
    %448 = vector.broadcast %cst_359 : f32 to vector<1x1xf32>
    %449 = arith.divf %447, %448 : vector<1x1xf32>
    %450 = vector.broadcast %449 : vector<1x1xf32> to vector<8x64xf32>
    %451 = arith.subf %442, %450 : vector<8x64xf32>
    %452 = arith.mulf %451, %451 : vector<8x64xf32>
    %453 = vector.shape_cast %452 : vector<8x64xf32> to vector<1x8x64xf32>
    %cst_360 = arith.constant dense<0.000000e+00> : vector<1xf32>
    %454 = vector.multi_reduction <add>, %453, %cst_360 [1, 2] : vector<1x8x64xf32> to vector<1xf32>
    %455 = vector.shape_cast %454 : vector<1xf32> to vector<1x1x1xf32>
    %456 = vector.extract %455[0, 0, 0] : f32 from vector<1x1x1xf32>
    %457 = vector.broadcast %456 : f32 to vector<1x1xf32>
    %cst_361 = arith.constant 5.120000e+02 : f32
    %458 = vector.broadcast %cst_361 : f32 to vector<1x1xf32>
    %459 = arith.divf %457, %458 : vector<1x1xf32>
    %460 = vector.broadcast %449 : vector<1x1xf32> to vector<8x64xf32>
    %461 = arith.subf %442, %460 : vector<8x64xf32>
    %cst_362 = arith.constant 9.99999974E-6 : f32
    %462 = vector.broadcast %cst_362 : f32 to vector<1x1xf32>
    %463 = arith.addf %459, %462 : vector<1x1xf32>
    %464 = math.rsqrt %463 : vector<1x1xf32>
    %465 = vector.broadcast %464 : vector<1x1xf32> to vector<8x64xf32>
    %466 = arith.mulf %461, %465 : vector<8x64xf32>
    %c0_363 = arith.constant 0 : index
    %c0_364 = arith.constant 0 : index
    %467 = vector.load %arg15[%c0_363, %c0_364] : memref<8x1xf32, #tpu.memory_space<vmem>>, vector<8x1xf32>
    %468 = vector.broadcast %467 : vector<8x1xf32> to vector<8x64xf32>
    %469 = arith.mulf %466, %468 : vector<8x64xf32>
    %c0_365 = arith.constant 0 : index
    %c0_366 = arith.constant 0 : index
    %470 = vector.load %arg16[%c0_365, %c0_366] : memref<8x1xf32, #tpu.memory_space<vmem>>, vector<8x1xf32>
    %471 = vector.broadcast %470 : vector<8x1xf32> to vector<8x64xf32>
    %472 = arith.addf %469, %471 : vector<8x64xf32>
    %c0_367 = arith.constant 0 : index
    %c0_368 = arith.constant 0 : index
    %c0_369 = arith.constant 0 : index
    %473 = vector.load %arg2[%c0_367, %c0_368, %c0_369] : memref<1x32x1xf32, #tpu.memory_space<vmem>>, vector<1x32x1xf32>
    %474 = vector.shape_cast %473 : vector<1x32x1xf32> to vector<32x1xf32>
    %475 = arith.negf %474 : vector<32x1xf32>
    %476 = math.exp %475 : vector<32x1xf32>
    %cst_370 = arith.constant 1.000000e+00 : f32
    %477 = vector.broadcast %cst_370 : f32 to vector<32x1xf32>
    %478 = arith.addf %477, %476 : vector<32x1xf32>
    %479 = arith.divf %477, %478 : vector<32x1xf32>
    %480 = arith.mulf %474, %479 : vector<32x1xf32>
    %c0_371 = arith.constant 0 : index
    %c0_372 = arith.constant 0 : index
    %481 = vector.load %arg17[%c0_371, %c0_372] : memref<8x32xf32, #tpu.memory_space<vmem>>, vector<8x32xf32>
    %cst_373 = arith.constant dense<0.000000e+00> : vector<8x1xf32>
    %482 = tpu.matmul %481, %480, %cst_373 {dimension_numbers = #tpu.dot_dimension_numbers<[1], [0], [0], [1], [0, 0, 1, 1], [], []>} : vector<8x32xf32>, vector<32x1xf32>, vector<8x1xf32> -> vector<8x1xf32>
    %c0_374 = arith.constant 0 : index
    %c0_375 = arith.constant 0 : index
    %483 = vector.load %arg18[%c0_374, %c0_375] : memref<8x1xf32, #tpu.memory_space<vmem>>, vector<8x1xf32>
    %484 = arith.addf %482, %483 : vector<8x1xf32>
    %485 = vector.broadcast %484 : vector<8x1xf32> to vector<8x64xf32>
    %486 = arith.addf %472, %485 : vector<8x64xf32>
    %c0_376 = arith.constant 0 : index
    %c0_377 = arith.constant 0 : index
    %c0_378 = arith.constant 0 : index
    %487 = vector.load %arg19[%c0_376, %c0_377, %c0_378] : memref<1x8x64xf32, #tpu.memory_space<vmem>>, vector<1x8x64xf32>
    %488 = vector.shape_cast %487 : vector<1x8x64xf32> to vector<8x64xf32>
    %489 = vector.shape_cast %486 : vector<8x64xf32> to vector<1x8x64xf32>
    tpu.vector_store %arg19[%c0_376, %c0_377, %c0_378], %489 {strides = array<i32>} : memref<1x8x64xf32, #tpu.memory_space<vmem>>, vector<1x8x64xf32>,
    return
  }
  func.func @transform_0(%arg0: i32) -> (i32, i32, i32) {
    %c0_i32 = arith.constant 0 : i32
    %c0_i32_0 = arith.constant 0 : i32
    %c0_i32_1 = arith.constant 0 : i32
    return %arg0, %c0_i32, %c0_i32_0 : i32, i32, i32
  }
  func.func @transform_1(%arg0: i32) -> (i32, i32, i32) {
    %c0_i32 = arith.constant 0 : i32
    %c0_i32_0 = arith.constant 0 : i32
    %c0_i32_1 = arith.constant 0 : i32
    return %arg0, %c0_i32, %c0_i32_0 : i32, i32, i32
  }
  func.func @transform_2(%arg0: i32) -> (i32, i32, i32) {
    %c0_i32 = arith.constant 0 : i32
    %c0_i32_0 = arith.constant 0 : i32
    %c0_i32_1 = arith.constant 0 : i32
    %c0_i32_2 = arith.constant 0 : i32
    return %c0_i32, %c0_i32_0, %c0_i32_1 : i32, i32, i32
  }
  func.func @transform_3(%arg0: i32) -> (i32, i32, i32) {
    %c0_i32 = arith.constant 0 : i32
    %c0_i32_0 = arith.constant 0 : i32
    %c0_i32_1 = arith.constant 0 : i32
    %c0_i32_2 = arith.constant 0 : i32
    return %c0_i32, %c0_i32_0, %c0_i32_1 : i32, i32, i32
  }
  func.func @transform_4(%arg0: i32) -> (i32, i32, i32) {
    %c0_i32 = arith.constant 0 : i32
    %c0_i32_0 = arith.constant 0 : i32
    %c0_i32_1 = arith.constant 0 : i32
    %c0_i32_2 = arith.constant 0 : i32
    return %c0_i32, %c0_i32_0, %c0_i32_1 : i32, i32, i32
  }
  func.func @transform_5(%arg0: i32) -> (i32, i32) {
    %c0_i32 = arith.constant 0 : i32
    %c0_i32_0 = arith.constant 0 : i32
    %c0_i32_1 = arith.constant 0 : i32
    return %c0_i32, %c0_i32_0 : i32, i32
  }
  func.func @transform_6(%arg0: i32) -> (i32, i32) {
    %c0_i32 = arith.constant 0 : i32
    %c0_i32_0 = arith.constant 0 : i32
    %c0_i32_1 = arith.constant 0 : i32
    return %c0_i32, %c0_i32_0 : i32, i32
  }
  func.func @transform_7(%arg0: i32) -> (i32, i32, i32) {
    %c0_i32 = arith.constant 0 : i32
    %c0_i32_0 = arith.constant 0 : i32
    %c0_i32_1 = arith.constant 0 : i32
    %c0_i32_2 = arith.constant 0 : i32
    return %c0_i32, %c0_i32_0, %c0_i32_1 : i32, i32, i32
  }
  func.func @transform_8(%arg0: i32) -> (i32, i32) {
    %c0_i32 = arith.constant 0 : i32
    %c0_i32_0 = arith.constant 0 : i32
    %c0_i32_1 = arith.constant 0 : i32
    return %c0_i32, %c0_i32_0 : i32, i32
  }
  func.func @transform_9(%arg0: i32) -> (i32, i32) {
    %c0_i32 = arith.constant 0 : i32
    %c0_i32_0 = arith.constant 0 : i32
    %c0_i32_1 = arith.constant 0 : i32
    return %c0_i32, %c0_i32_0 : i32, i32
  }
  func.func @transform_10(%arg0: i32) -> (i32, i32, i32) {
    %c0_i32 = arith.constant 0 : i32
    %c0_i32_0 = arith.constant 0 : i32
    %c0_i32_1 = arith.constant 0 : i32
    %c0_i32_2 = arith.constant 0 : i32
    return %c0_i32, %c0_i32_0, %c0_i32_1 : i32, i32, i32
  }
  func.func @transform_11(%arg0: i32) -> (i32, i32) {
    %c0_i32 = arith.constant 0 : i32
    %c0_i32_0 = arith.constant 0 : i32
    %c0_i32_1 = arith.constant 0 : i32
    return %c0_i32, %c0_i32_0 : i32, i32
  }
  func.func @transform_12(%arg0: i32) -> (i32, i32) {
    %c0_i32 = arith.constant 0 : i32
    %c0_i32_0 = arith.constant 0 : i32
    %c0_i32_1 = arith.constant 0 : i32
    return %c0_i32, %c0_i32_0 : i32, i32
  }
  func.func @transform_13(%arg0: i32) -> (i32, i32, i32) {
    %c0_i32 = arith.constant 0 : i32
    %c0_i32_0 = arith.constant 0 : i32
    %c0_i32_1 = arith.constant 0 : i32
    %c0_i32_2 = arith.constant 0 : i32
    return %c0_i32, %c0_i32_0, %c0_i32_1 : i32, i32, i32
  }
  func.func @transform_14(%arg0: i32) -> (i32, i32) {
    %c0_i32 = arith.constant 0 : i32
    %c0_i32_0 = arith.constant 0 : i32
    %c0_i32_1 = arith.constant 0 : i32
    return %c0_i32, %c0_i32_0 : i32, i32
  }
  func.func @transform_15(%arg0: i32) -> (i32, i32) {
    %c0_i32 = arith.constant 0 : i32
    %c0_i32_0 = arith.constant 0 : i32
    %c0_i32_1 = arith.constant 0 : i32
    return %c0_i32, %c0_i32_0 : i32, i32
  }
  func.func @transform_16(%arg0: i32) -> (i32, i32) {
    %c0_i32 = arith.constant 0 : i32
    %c0_i32_0 = arith.constant 0 : i32
    %c0_i32_1 = arith.constant 0 : i32
    return %c0_i32, %c0_i32_0 : i32, i32
  }
  func.func @transform_17(%arg0: i32) -> (i32, i32) {
    %c0_i32 = arith.constant 0 : i32
    %c0_i32_0 = arith.constant 0 : i32
    %c0_i32_1 = arith.constant 0 : i32
    return %c0_i32, %c0_i32_0 : i32, i32
  }
  func.func @transform_18(%arg0: i32) -> (i32, i32, i32) {
    %c0_i32 = arith.constant 0 : i32
    %c0_i32_0 = arith.constant 0 : i32
    %c0_i32_1 = arith.constant 0 : i32
    return %arg0, %c0_i32, %c0_i32_0 : i32, i32, i32
  }
}

</mosaic_0001>

<bundles_post_ra>
// kernel: downsample_forward.1
= control target key start
LH: loop header
LB: loop body
LE: loop exit
PB: predicated region body
PF: predicated region fallthrough
CT: control target
= control target key end

     0   :  { %s9368_s27 = smov 0   ;;  %s10859_s0 = inlined_call_operand.vmem [shape: f32[2,4,256], index: 0, kind: input, shape index: {}]   ;;  %s10860_s1 = inlined_call_operand.vmem [shape: f32[2,32,1], index: 1, kind: input, shape index: {}]   ;;  %s10861_s2 = inlined_call_operand.vmem [shape: f32[4,256,64], index: 2, kind: input, shape index: {}]   ;;  %s10862_s3 = inlined_call_operand.vmem [shape: f32[9,64,64], index: 3, kind: input, shape index: {}]   ;;  %s10863_s4 = inlined_call_operand.vmem [shape: f32[9,4,4], index: 4, kind: input, shape index: {}]   ;;  %s10864_s5 = inlined_call_operand.vmem [shape: f32[4,1], index: 5, kind: input, shape index: {}]   ;;  %s10865_s6 = inlined_call_operand.vmem [shape: f32[4,1], index: 6, kind: input, shape index: {}]   ;;  %s10866_s7 = inlined_call_operand.vmem [shape: f32[9,4,4], index: 7, kind: input, shape index: {}]   ;;  %s10867_s8 = inlined_call_operand.vmem [shape: f32[4,1], index: 8, kind: input, shape index: {}]   ;;  %s10868_s9 = inlined_call_operand.vmem [shape: f32[4,1], index: 9, kind: input, shape index: {}]   ;;  %s10869_s10 = inlined_call_operand.vmem [shape: f32[9,8,4], index: 10, kind: input, shape index: {}]   ;;  %s10870_s11 = inlined_call_operand.vmem [shape: f32[8,1], index: 11, kind: input, shape index: {}]   ;;  %s10871_s12 = inlined_call_operand.vmem [shape: f32[8,1], index: 12, kind: input, shape index: {}]   ;;  %s10872_s13 = inlined_call_operand.vmem [shape: f32[9,8,8], index: 13, kind: input, shape index: {}]   ;;  %s10873_s14 = inlined_call_operand.vmem [shape: f32[8,1], index: 14, kind: input, shape index: {}]   ;;  %s10874_s15 = inlined_call_operand.vmem [shape: f32[8,1], index: 15, kind: input, shape index: {}]   ;;  %s10875_s16 = inlined_call_operand.vmem [shape: f32[8,32], index: 16, kind: input, shape index: {}]   ;;  %s10876_s17 = inlined_call_operand.vmem [shape: f32[8,1], index: 17, kind: input, shape index: {}]   ;;  %s10877_s18 = inlined_call_operand.vmem [shape: f32[2,8,64], index: 18, kind: output, shape index: {}]  }
   0x1   :  { %10881 = sst [smem:[#allocation3_spill]] %s10859_s0 }
   0x2   :  { %10882 = sst [smem:[#allocation4_spill]] %s10860_s1 }
   0x3   :  { %10883 = sst [smem:[#allocation5_spill]] %s10861_s2 }
   0x4   :  { %10884 = sst [smem:[#allocation6_spill]] %s10877_s18 }
   0x5 LB: > { %10885 = sst [smem:[#allocation2_spill]] %s9266_s27  ;;  %s10879_s28 = sadd.s32 4294967295, %s9266_s27   ;;  %s9266_s27 = sphi %s9368_s27, %s28_s27  }
   0x6   : > { %p6844_p0 = scmp.ge.s32.totalorder %s9266_s27, 1  ;;  %p522_p1 = scmp.lt.s32.totalorder %s9266_s27, 3 }
   0x8   : > { %p523_p2 = pnand %p6844_p0, %p522_p1 }
   0x9   : > { %s10886_s0 = sld [smem:[#allocation5_spill]] (!%p523_p2)  ;;  %p9450_p3 = scmp.lt.s32.totalorder (!%p523_p2), %s10879_s28, 1  ;;  %vm9269_vm0 = vmmov (!%p523_p2), 0   ;;  %vm1020_vm1 = vcmask (!%p523_p2), 523264   ;;  %vm1180_vm2 = vcmask (!%p523_p2), 1043456   ;;  %vm1176_vm3 = vcmask (!%p523_p2), 31744  }
   0xa   : > { %526 = sbr.rel (%p523_p2) target bundleno = 6779 (0x1a7b), region = 92  ;;  %s10888_s19 = sadd.s32 (!%p523_p2), 4294967295, %s9266_s27   ;;  %vm2436_vm4 = vcmask (!%p523_p2), 519168   ;;  %vm5448_vm7 = vcmask (!%p523_p2), 64512   ;;  %vm6694_vm8 = vcmask (!%p523_p2), 261120  }
   0xb   : > { %s10889_s24 = sld [smem:[#allocation3_spill]] (!%p523_p2)  ;;  %s10890_s23 = sld [smem:[#allocation4_spill]] (!%p523_p2) }
   0xf   : > { %v611_v0 = vld [vmem:[%s10886_s0 + $0x80] sm:$0xff] (!%p523_p2)  ;;  %v612_v1 = vld [vmem:[%s10886_s0 + $0x88] sm:$0xff] (!%p523_p2)  ;;  %v613_v11 = vld [vmem:[%s10886_s0 + $0x90] sm:$0xff] (!%p523_p2) }
  0x10   : > { %v6866_v2 = vld [vmem:[%s10886_s0 + $0x180] sm:$0xff] (!%p523_p2)  ;;  %v8566_v3 = vpack.c.bf16 (!%p523_p2), %v612_v1, %v611_v0  ;;  %v6867_v4 = vld [vmem:[%s10886_s0 + $0x188] sm:$0xff] (!%p523_p2)  ;;  %v614_v13 = vld [vmem:[%s10886_s0 + $0x98] sm:$0xff] (!%p523_p2) }
  0x11   : > { %v595_v5 = vld [vmem:[%s10886_s0] sm:$0xff]  ;;  %v596_v6 = vld [vmem:[%s10886_s0 + $0x8] sm:$0xff]  ;;  %v8598_v7 = vpack.c.bf16 %v6867_v4, %v6866_v2  ;;  %v6868_v14 = vld [vmem:[%s10886_s0 + $0x190] sm:$0xff]  ;;  %v8570_v16 = vpack.c.bf16 %v614_v13, %v613_v11  ;;  %s10894_s19 = smov (!%p9450_p3, %s10888_s19), 1 }
  0x12   : > { %v8568_v8 = vpack.c.bf16 %v596_v6, %v595_v5  ;;  %v6850_v9 = vld [vmem:[%s10886_s0 + $0x100] sm:$0xff]  ;;  %v6851_v10 = vld [vmem:[%s10886_s0 + $0x108] sm:$0xff]  ;;  %8567 = vmatprep.subr.bf16.mxu0 %v8566_v3  ;;  %v6869_v15 = vld [vmem:[%s10886_s0 + $0x198] sm:$0xff]  ;;  %s7148_s28 = sshll.u32 %s10894_s19, 3 }
  0x13   : > { %v8600_v12 = vpack.c.bf16 %v6851_v10, %v6850_v9  ;;  %8599 = vmatprep.subr.bf16.mxu1 %v8598_v7  ;;  %v8602_v17 = vpack.c.bf16 %v6869_v15, %v6868_v14  ;;  %v597_v18 = vld [vmem:[%s10886_s0 + $0x10] sm:$0xff]  ;;  %v598_v19 = vld [vmem:[%s10886_s0 + $0x18] sm:$0xff]  ;;  %v615_v23 = vld [vmem:[%s10886_s0 + $0xa0] sm:$0xff]  ;;  %s584_s25 = scalar_lea.vmem %s10889_s24, %s7148_s28 }
  0x14   : > { %8569 = vmatpush3.bf16.msra.mxu0 %v8568_v8  ;;  %v6852_v20 = vld [vmem:[%s10886_s0 + $0x110] sm:$0xff]  ;;  %v8572_v21 = vpack.c.bf16 %v598_v19, %v597_v18  ;;  %v6853_v22 = vld [vmem:[%s10886_s0 + $0x118] sm:$0xff]  ;;  %v616_v24 = vld [vmem:[%s10886_s0 + $0xa8] sm:$0xff] }
  0x15   : > { %8601 = vmatpush3.bf16.msra.mxu1 %v8600_v12  ;;  %8571 = vmatprep.subr.bf16.mxu0 %v8570_v16  ;;  %v8604_v25 = vpack.c.bf16 %v6853_v22, %v6852_v20  ;;  %v8574_v26 = vpack.c.bf16 %v616_v24, %v615_v23  ;;  %v6870_v27 = vld [vmem:[%s10886_s0 + $0x1a0] sm:$0xff]  ;;  %v6871_v28 = vld [vmem:[%s10886_s0 + $0x1a8] sm:$0xff]  ;;  %v617_v35 = vld [vmem:[%s10886_s0 + $0xb0] sm:$0xff] }
  0x16   : > { %8603 = vmatprep.subr.bf16.mxu1 %v8602_v17  ;;  %v599_v29 = vld [vmem:[%s10886_s0 + $0x20] sm:$0xff]  ;;  %v8606_v30 = vpack.c.bf16 %v6871_v28, %v6870_v27  ;;  %v600_v31 = vld [vmem:[%s10886_s0 + $0x28] sm:$0xff]  ;;  %v618_v36 = vld [vmem:[%s10886_s0 + $0xb8] sm:$0xff] }
  0x17   : > { %v6854_v32 = vld [vmem:[%s10886_s0 + $0x120] sm:$0xff]  ;;  %v6855_v33 = vld [vmem:[%s10886_s0 + $0x128] sm:$0xff]  ;;  %v8576_v34 = vpack.c.bf16 %v600_v31, %v599_v29  ;;  %v6872_v37 = vld [vmem:[%s10886_s0 + $0x1b0] sm:$0xff]  ;;  %v8578_v39 = vpack.c.bf16 %v618_v36, %v617_v35 }
  0x18   : > { %8573 = vmatpush3.bf16.msra.mxu0 %v8572_v21  ;;  %v8608_v38 = vpack.c.bf16 %v6855_v33, %v6854_v32  ;;  %v6873_v40 = vld [vmem:[%s10886_s0 + $0x1b8] sm:$0xff]  ;;  %v601_v41 = vld [vmem:[%s10886_s0 + $0x30] sm:$0xff]  ;;  %v619_v46 = vld [vmem:[%s10886_s0 + $0xc0] sm:$0xff] }
  0x19   : > { %8605 = vmatpush3.bf16.msra.mxu1 %v8604_v25  ;;  %8575 = vmatprep.subr.bf16.mxu0 %v8574_v26  ;;  %v602_v42 = vld [vmem:[%s10886_s0 + $0x38] sm:$0xff]  ;;  %v8610_v43 = vpack.c.bf16 %v6873_v40, %v6872_v37  ;;  %v6856_v44 = vld [vmem:[%s10886_s0 + $0x130] sm:$0xff]  ;;  %v620_v47 = vld [vmem:[%s10886_s0 + $0xc8] sm:$0xff] }
  0x1a   : > { %8607 = vmatprep.subr.bf16.mxu1 %v8606_v30  ;;  %v6857_v45 = vld [vmem:[%s10886_s0 + $0x138] sm:$0xff]  ;;  %v6874_v48 = vld [vmem:[%s10886_s0 + $0x1c0] sm:$0xff]  ;;  %v6875_v49 = vld [vmem:[%s10886_s0 + $0x1c8] sm:$0xff]  ;;  %v8580_v50 = vpack.c.bf16 %v602_v42, %v601_v41  ;;  %v8582_v52 = vpack.c.bf16 %v620_v47, %v619_v46 }
  0x1b   : > { %v8612_v51 = vpack.c.bf16 %v6857_v45, %v6856_v44  ;;  %v603_v53 = vld [vmem:[%s10886_s0 + $0x40] sm:$0xff]  ;;  %v604_v54 = vld [vmem:[%s10886_s0 + $0x48] sm:$0xff]  ;;  %v8614_v56 = vpack.c.bf16 %v6875_v49, %v6874_v48  ;;  %v621_v58 = vld [vmem:[%s10886_s0 + $0xd0] sm:$0xff] }
  0x1c   : > { %8577 = vmatpush3.bf16.msra.mxu0 %v8576_v34  ;;  %v6858_v55 = vld [vmem:[%s10886_s0 + $0x140] sm:$0xff]  ;;  %v6859_v57 = vld [vmem:[%s10886_s0 + $0x148] sm:$0xff]  ;;  %v622_v59 = vld [vmem:[%s10886_s0 + $0xd8] sm:$0xff]  ;;  %v8584_v62 = vpack.c.bf16 %v604_v54, %v603_v53 }
  0x1d   : > { %8609 = vmatpush3.bf16.msra.mxu1 %v8608_v38  ;;  %8579 = vmatprep.subr.bf16.mxu0 %v8578_v39  ;;  %v6876_v60 = vld [vmem:[%s10886_s0 + $0x1d0] sm:$0xff]  ;;  %v6877_v61 = vld [vmem:[%s10886_s0 + $0x1d8] sm:$0xff]  ;;  %v8616_v63 = vpack.c.bf16 %v6859_v57, %v6858_v55  ;;  %v8586_v0 = vpack.c.bf16 %v622_v59, %v621_v58  ;;  %v623_v6 = vld [vmem:[%s10886_s0 + $0xe0] sm:$0xff] }
  0x1e   : > { %8611 = vmatprep.subr.bf16.mxu1 %v8610_v43  ;;  %v605_v1 = vld [vmem:[%s10886_s0 + $0x50] sm:$0xff]  ;;  %v606_v2 = vld [vmem:[%s10886_s0 + $0x58] sm:$0xff]  ;;  %v8618_v4 = vpack.c.bf16 %v6877_v61, %v6876_v60  ;;  %v624_v7 = vld [vmem:[%s10886_s0 + $0xe8] sm:$0xff] }
  0x1f   : > { %v6860_v3 = vld [vmem:[%s10886_s0 + $0x150] sm:$0xff]  ;;  %v6861_v5 = vld [vmem:[%s10886_s0 + $0x158] sm:$0xff]  ;;  %v6878_v8 = vld [vmem:[%s10886_s0 + $0x1e0] sm:$0xff]  ;;  %v8588_v10 = vpack.c.bf16 %v606_v2, %v605_v1  ;;  %v8590_v13 = vpack.c.bf16 %v624_v7, %v623_v6 }
  0x20   : > { %8581 = vmatpush3.bf16.msra.mxu0 %v8580_v50  ;;  %v6879_v9 = vld [vmem:[%s10886_s0 + $0x1e8] sm:$0xff]  ;;  %v607_v11 = vld [vmem:[%s10886_s0 + $0x60] sm:$0xff]  ;;  %v8620_v12 = vpack.c.bf16 %v6861_v5, %v6860_v3  ;;  %v625_v19 = vld [vmem:[%s10886_s0 + $0xf0] sm:$0xff] }
  0x21   : > { %8613 = vmatpush3.bf16.msra.mxu1 %v8612_v51  ;;  %8583 = vmatprep.subr.bf16.mxu0 %v8582_v52  ;;  %v608_v14 = vld [vmem:[%s10886_s0 + $0x68] sm:$0xff]  ;;  %v6862_v15 = vld [vmem:[%s10886_s0 + $0x160] sm:$0xff]  ;;  %v8622_v17 = vpack.c.bf16 %v6879_v9, %v6878_v8  ;;  %v626_v20 = vld [vmem:[%s10886_s0 + $0xf8] sm:$0xff] }
  0x22   : > { %8615 = vmatprep.subr.bf16.mxu1 %v8614_v56  ;;  %v9559_v16 = vld [vmem:[%s584_s25] sm:$0xff]  ;;  %v6863_v18 = vld [vmem:[%s10886_s0 + $0x168] sm:$0xff]  ;;  %v6880_v22 = vld [vmem:[%s10886_s0 + $0x1f0] sm:$0xff]  ;;  %v8592_v24 = vpack.c.bf16 %v608_v14, %v607_v11  ;;  %v8594_v26 = vpack.c.bf16 %v626_v20, %v625_v19 }
  0x23   : > { %v9572_v21 = vcombine.high %v9559_v16, %v9559_v16  ;;  %v6881_v23 = vld [vmem:[%s10886_s0 + $0x1f8] sm:$0xff]  ;;  %v8624_v25 = vpack.c.bf16 %v6863_v18, %v6862_v15  ;;  %v609_v27 = vld [vmem:[%s10886_s0 + $0x70] sm:$0xff]  ;;  %v6898_v32 = vld [vmem:[%s10886_s0 + $0x280] sm:$0xff] }
  0x24   : > { %8585 = vmatpush3.bf16.msra.mxu0 %v8584_v62  ;;  %v610_v28 = vld [vmem:[%s10886_s0 + $0x78] sm:$0xff]  ;;  %v6864_v29 = vld [vmem:[%s10886_s0 + $0x170] sm:$0xff]  ;;  %v8626_v30 = vpack.c.bf16 %v6881_v23, %v6880_v22  ;;  %v6899_v33 = vld [vmem:[%s10886_s0 + $0x288] sm:$0xff] }
  0x25   : > { %8617 = vmatpush3.bf16.msra.mxu1 %v8616_v63  ;;  %8587 = vmatprep.subr.bf16.mxu0 %v8586_v0  ;;  %v6865_v31 = vld [vmem:[%s10886_s0 + $0x178] sm:$0xff]  ;;  %v6930_v34 = vld [vmem:[%s10886_s0 + $0x380] sm:$0xff]  ;;  %v6931_v35 = vld [vmem:[%s10886_s0 + $0x388] sm:$0xff]  ;;  %v8596_v36 = vpack.c.bf16 %v610_v28, %v609_v27  ;;  %v8630_v38 = vpack.c.bf16 %v6899_v33, %v6898_v32 }
  0x26   : > { %8619 = vmatprep.subr.bf16.mxu1 %v8618_v4  ;;  %694 = vmatprep.mubr.f32.mxu0 %v9572_v21  ;;  %v8628_v37 = vpack.c.bf16 %v6865_v31, %v6864_v29  ;;  %v6882_v39 = vld [vmem:[%s10886_s0 + $0x200] sm:$0xff]  ;;  %v6883_v40 = vld [vmem:[%s10886_s0 + $0x208] sm:$0xff]  ;;  %v8662_v42 = vpack.c.bf16 %v6931_v35, %v6930_v34  ;;  %v6900_v44 = vld [vmem:[%s10886_s0 + $0x290] sm:$0xff] }
  0x27   : > { %797 = vmatprep.mubr.f32.mxu1 %v9572_v21  ;;  %v6914_v41 = vld [vmem:[%s10886_s0 + $0x300] sm:$0xff]  ;;  %v6915_v43 = vld [vmem:[%s10886_s0 + $0x308] sm:$0xff]  ;;  %v6901_v45 = vld [vmem:[%s10886_s0 + $0x298] sm:$0xff]  ;;  %v8632_v48 = vpack.c.bf16 %v6883_v40, %v6882_v39 }
  0x28   : > { %8589 = vmatpush3.bf16.msra.mxu0 %v8588_v10  ;;  %v6932_v46 = vld [vmem:[%s10886_s0 + $0x390] sm:$0xff]  ;;  %v6933_v47 = vld [vmem:[%s10886_s0 + $0x398] sm:$0xff]  ;;  %v8664_v49 = vpack.c.bf16 %v6915_v43, %v6914_v41  ;;  %v8634_v50 = vpack.c.bf16 %v6901_v45, %v6900_v44  ;;  %v6902_v56 = vld [vmem:[%s10886_s0 + $0x2a0] sm:$0xff] }
  0x29   : > { %8621 = vmatpush3.bf16.msra.mxu1 %v8620_v12  ;;  %8591 = vmatprep.subr.bf16.mxu0 %v8590_v13  ;;  %v6884_v51 = vld [vmem:[%s10886_s0 + $0x210] sm:$0xff]  ;;  %v6885_v52 = vld [vmem:[%s10886_s0 + $0x218] sm:$0xff]  ;;  %v8666_v54 = vpack.c.bf16 %v6933_v47, %v6932_v46  ;;  %v6903_v57 = vld [vmem:[%s10886_s0 + $0x2a8] sm:$0xff] }
  0x2a   : > { %8623 = vmatprep.subr.bf16.mxu1 %v8622_v17  ;;  %v6916_v53 = vld [vmem:[%s10886_s0 + $0x310] sm:$0xff]  ;;  %v6917_v55 = vld [vmem:[%s10886_s0 + $0x318] sm:$0xff]  ;;  %v6934_v58 = vld [vmem:[%s10886_s0 + $0x3a0] sm:$0xff]  ;;  %v8636_v60 = vpack.c.bf16 %v6885_v52, %v6884_v51  ;;  %v8638_v62 = vpack.c.bf16 %v6903_v57, %v6902_v56 }
  0x2b   : > { %v6935_v59 = vld [vmem:[%s10886_s0 + $0x3a8] sm:$0xff]  ;;  %v8668_v61 = vpack.c.bf16 %v6917_v55, %v6916_v53  ;;  %v6886_v63 = vld [vmem:[%s10886_s0 + $0x220] sm:$0xff]  ;;  %v6904_v4 = vld [vmem:[%s10886_s0 + $0x2b0] sm:$0xff] }
  0x2c   : > { %8593 = vmatpush3.bf16.msra.mxu0 %v8592_v24  ;;  %v6887_v0 = vld [vmem:[%s10886_s0 + $0x228] sm:$0xff]  ;;  %v6918_v1 = vld [vmem:[%s10886_s0 + $0x320] sm:$0xff]  ;;  %v8670_v2 = vpack.c.bf16 %v6935_v59, %v6934_v58  ;;  %v6905_v5 = vld [vmem:[%s10886_s0 + $0x2b8] sm:$0xff] }
  0x2d   : > { %8625 = vmatpush3.bf16.msra.mxu1 %v8624_v25  ;;  %8595 = vmatprep.subr.bf16.mxu0 %v8594_v26  ;;  %v6919_v3 = vld [vmem:[%s10886_s0 + $0x328] sm:$0xff]  ;;  %v6936_v6 = vld [vmem:[%s10886_s0 + $0x3b0] sm:$0xff]  ;;  %v6937_v7 = vld [vmem:[%s10886_s0 + $0x3b8] sm:$0xff]  ;;  %v8640_v8 = vpack.c.bf16 %v6887_v0, %v6886_v63  ;;  %v8642_v10 = vpack.c.bf16 %v6905_v5, %v6904_v4 }
  0x2e   : > { %8627 = vmatprep.subr.bf16.mxu1 %v8626_v30  ;;  %v8672_v9 = vpack.c.bf16 %v6919_v3, %v6918_v1  ;;  %v6888_v11 = vld [vmem:[%s10886_s0 + $0x230] sm:$0xff]  ;;  %v6889_v12 = vld [vmem:[%s10886_s0 + $0x238] sm:$0xff]  ;;  %v8674_v14 = vpack.c.bf16 %v6937_v7, %v6936_v6  ;;  %v6906_v17 = vld [vmem:[%s10886_s0 + $0x2c0] sm:$0xff]  ;;  %v9268_v6 = vmov 0.0|0.0  }
  0x2f   : > { %v6920_v13 = vld [vmem:[%s10886_s0 + $0x330] sm:$0xff]  ;;  %v6921_v15 = vld [vmem:[%s10886_s0 + $0x338] sm:$0xff]  ;;  %v6907_v18 = vld [vmem:[%s10886_s0 + $0x2c8] sm:$0xff] }
  0x30   : > { %8597 = vmatpush3.bf16.msra.mxu0 %v8596_v36  ;;  %v6938_v19 = vld [vmem:[%s10886_s0 + $0x3c0] sm:$0xff]  ;;  %v6939_v20 = vld [vmem:[%s10886_s0 + $0x3c8] sm:$0xff]  ;;  %v8676_v22 = vpack.c.bf16 %v6921_v15, %v6920_v13  ;;  %v8646_v23 = vpack.c.bf16 %v6907_v18, %v6906_v17  ;;  %v6908_v29 = vld [vmem:[%s10886_s0 + $0x2d0] sm:$0xff] }
  0x31   : > { %8629 = vmatpush3.bf16.msra.mxu1 %v8628_v37  ;;  %8631 = vmatprep.subr.bf16.mxu0 %v8630_v38  ;;  %v6890_v24 = vld [vmem:[%s10886_s0 + $0x240] sm:$0xff]  ;;  %v6891_v25 = vld [vmem:[%s10886_s0 + $0x248] sm:$0xff]  ;;  %v8678_v27 = vpack.c.bf16 %v6939_v20, %v6938_v19  ;;  %v6909_v30 = vld [vmem:[%s10886_s0 + $0x2d8] sm:$0xff] }
  0x32   : > { %8663 = vmatprep.subr.bf16.mxu1 %v8662_v42  ;;  %v6922_v26 = vld [vmem:[%s10886_s0 + $0x340] sm:$0xff]  ;;  %v6923_v28 = vld [vmem:[%s10886_s0 + $0x348] sm:$0xff]  ;;  %v6940_v31 = vld [vmem:[%s10886_s0 + $0x3d0] sm:$0xff]  ;;  %v8648_v33 = vpack.c.bf16 %v6891_v25, %v6890_v24  ;;  %v8650_v35 = vpack.c.bf16 %v6909_v30, %v6908_v29 }
  0x33   : > { %695 = vmatmul.mubr.f32.vlgmr.msra.gmra.mrb[0].mxu0 %v9559_v16  ;;  %v6941_v32 = vld [vmem:[%s10886_s0 + $0x3d8] sm:$0xff]  ;;  %v8680_v34 = vpack.c.bf16 %v6923_v28, %v6922_v26  ;;  %v6892_v36 = vld [vmem:[%s10886_s0 + $0x250] sm:$0xff]  ;;  %v6910_v41 = vld [vmem:[%s10886_s0 + $0x2e0] sm:$0xff]  ;;  %v9270_v28 = vmov 0.0  }
  0x34   : > { %798 = vmatmul.mubr.f32.vlgmr.msra.gmra.mrb[0].mxu1 %v9559_v16  ;;  %8633 = vmatpush3.bf16.msra.mxu0 %v8632_v48  ;;  %v6893_v37 = vld [vmem:[%s10886_s0 + $0x258] sm:$0xff]  ;;  %v6924_v38 = vld [vmem:[%s10886_s0 + $0x350] sm:$0xff]  ;;  %v8682_v39 = vpack.c.bf16 %v6941_v32, %v6940_v31  ;;  %v6911_v42 = vld [vmem:[%s10886_s0 + $0x2e8] sm:$0xff] }
  0x35   : > { %8665 = vmatpush3.bf16.msra.mxu1 %v8664_v49  ;;  %8635 = vmatprep.subr.bf16.mxu0 %v8634_v50  ;;  %v6925_v40 = vld [vmem:[%s10886_s0 + $0x358] sm:$0xff]  ;;  %v6942_v43 = vld [vmem:[%s10886_s0 + $0x3e0] sm:$0xff]  ;;  %v6943_v44 = vld [vmem:[%s10886_s0 + $0x3e8] sm:$0xff]  ;;  %v8652_v45 = vpack.c.bf16 %v6893_v37, %v6892_v36  ;;  %v8654_v47 = vpack.c.bf16 %v6911_v42, %v6910_v41 }
  0x36   : > { %8667 = vmatprep.subr.bf16.mxu1 %v8666_v54  ;;  %901 = vmatprep.mubr.f32.mxu0 %v9572_v21  ;;  %v8684_v46 = vpack.c.bf16 %v6925_v40, %v6924_v38  ;;  %v6894_v48 = vld [vmem:[%s10886_s0 + $0x260] sm:$0xff]  ;;  %v6895_v49 = vld [vmem:[%s10886_s0 + $0x268] sm:$0xff]  ;;  %v8686_v51 = vpack.c.bf16 %v6943_v44, %v6942_v43  ;;  %v6912_v53 = vld [vmem:[%s10886_s0 + $0x2f0] sm:$0xff] }
  0x37   : > { %1005 = vmatprep.mubr.f32.mxu1 %v9572_v21  ;;  %v8644_v21 = vpack.c.bf16 %v6889_v12, %v6888_v11  ;;  %v6926_v50 = vld [vmem:[%s10886_s0 + $0x360] sm:$0xff]  ;;  %v6927_v52 = vld [vmem:[%s10886_s0 + $0x368] sm:$0xff]  ;;  %v6913_v54 = vld [vmem:[%s10886_s0 + $0x2f8] sm:$0xff]  ;;  %v8656_v57 = vpack.c.bf16 %v6895_v49, %v6894_v48 }
  0x38   : > { %8637 = vmatpush3.bf16.msra.mxu0 %v8636_v60  ;;  %v6944_v55 = vld [vmem:[%s10886_s0 + $0x3f0] sm:$0xff]  ;;  %v6945_v56 = vld [vmem:[%s10886_s0 + $0x3f8] sm:$0xff]  ;;  %v8688_v58 = vpack.c.bf16 %v6927_v52, %v6926_v50  ;;  %v8658_v59 = vpack.c.bf16 %v6913_v54, %v6912_v53  ;;  %v6947_v3 = vld [vmem:[%s10862_s3 + $0x40] sm:$0xff] }
  0x39   : > { %8669 = vmatpush3.bf16.msra.mxu1 %v8668_v61  ;;  %8639 = vmatprep.subr.bf16.mxu0 %v8638_v62  ;;  %v6896_v60 = vld [vmem:[%s10886_s0 + $0x270] sm:$0xff]  ;;  %v6897_v61 = vld [vmem:[%s10886_s0 + $0x278] sm:$0xff]  ;;  %v8690_v62 = vpack.c.bf16 %v6945_v56, %v6944_v55  ;;  %v6948_v4 = vld [vmem:[%s10862_s3 + $0x48] sm:$0xff] }
  0x3a   : > { %8671 = vmatprep.subr.bf16.mxu1 %v8670_v2  ;;  %v6928_v63 = vld [vmem:[%s10886_s0 + $0x370] sm:$0xff]  ;;  %v6929_v0 = vld [vmem:[%s10886_s0 + $0x378] sm:$0xff]  ;;  %v8660_v1 = vpack.c.bf16 %v6897_v61, %v6896_v60  ;;  %v1012_v5 = vld [vmem:[%s10862_s3] sm:$0xff]  ;;  %v9803_v7 = vpack.c.bf16 %v6948_v4, %v6947_v3 }
  0x3b   : > { %v8692_v2 = vpack.c.bf16 %v6929_v0, %v6928_v63  ;;  %v1014_v11 = vld [vmem:[%s10862_s3 + $0x10] sm:$0xff]  ;;  %v1015_v12 = vld [vmem:[%s10862_s3 + $0x18] sm:$0xff]  ;;  %v6951_v15 = vld [vmem:[%s10862_s3 + $0x60] sm:$0xff] }
  0x3c   : > { %8641 = vmatpush3.bf16.msra.mxu0 %v8640_v8  ;;  %v6949_v8 = vld [vmem:[%s10862_s3 + $0x50] sm:$0xff]  ;;  %v6952_v17 = vld [vmem:[%s10862_s3 + $0x68] sm:$0xff]  ;;  %v1016_v19 = vld [vmem:[%s10862_s3 + $0x20] sm:$0xff] }
  0x3d   : > { %8673 = vmatpush3.bf16.msra.mxu1 %v8672_v9  ;;  %8643 = vmatprep.subr.bf16.mxu0 %v8642_v10  ;;  %v6950_v9 = vld [vmem:[%s10862_s3 + $0x58] sm:$0xff]  ;;  %v9840_v18 = vpack.c.bf16 %v6952_v17, %v6951_v15  ;;  %v1017_v20 = vld [vmem:[%s10862_s3 + $0x28] sm:$0xff]  ;;  %v1018_v25 = vld [vmem:[%s10862_s3 + $0x30] sm:$0xff] }
  0x3e   : > { %8675 = vmatprep.subr.bf16.mxu1 %v8674_v14  ;;  %v9823_v13 = vpack.c.bf16 %v6950_v9, %v6949_v8  ;;  %v9827_v14 = vpack.c.bf16 %v1015_v12, %v1014_v11  ;;  %v1019_v26 = vld [vmem:[%s10862_s3 + $0x38] sm:$0xff]  ;;  %v6961_v41 = vld [vmem:[%s10862_s3 + $0x80] sm:$0xff]  ;;  %v6962_v42 = vld [vmem:[%s10862_s3 + $0x88] sm:$0xff] }
  0x3f   : > { %v6964_v48 = vld [vmem:[%s10862_s3 + $0x98] sm:$0xff]  ;;  %v6965_v50 = vld [vmem:[%s10862_s3 + $0xa0] sm:$0xff]  ;;  %v6967_v53 = vld [vmem:[%s10862_s3 + $0xb0] sm:$0xff] }
  0x40   : > { %8645 = vmatpush3.bf16.msra.mxu0 %v8644_v21  ;;  %v9848_v21 = vpack.c.bf16 %v1017_v20, %v1016_v19  ;;  %v6968_v54 = vld [vmem:[%s10862_s3 + $0xb8] sm:$0xff]  ;;  %v6985_v56 = vld [vmem:[%s10862_s3 + $0x100] sm:$0xff]  ;;  %v6990_v63 = vld [vmem:[%s10862_s3 + $0x128] sm:$0xff] }
  0x41   : > { %8677 = vmatpush3.bf16.msra.mxu1 %v8676_v22  ;;  %8647 = vmatprep.subr.bf16.mxu0 %v8646_v23  ;;  %v6953_v22 = vld [vmem:[%s10862_s3 + $0x70] sm:$0xff]  ;;  %v6954_v23 = vld [vmem:[%s10862_s3 + $0x78] sm:$0xff]  ;;  %v9923_v55 = vpack.c.bf16 %v6968_v54, %v6967_v53  ;;  %v6997_v4 = vld [vmem:[%s10862_s3 + $0x140] sm:$0xff] }
  0x42   : > { %8679 = vmatprep.subr.bf16.mxu1 %v8678_v27  ;;  %v9860_v24 = vpack.c.bf16 %v6954_v23, %v6953_v22  ;;  %v9868_v27 = vpack.c.bf16 %v1019_v26, %v1018_v25  ;;  %v6988_v60 = vld [vmem:[%s10862_s3 + $0x118] sm:$0xff]  ;;  %v6999_v8 = vld [vmem:[%s10862_s3 + $0x150] sm:$0xff]  ;;  %v7001_v12 = vld [vmem:[%s10862_s3 + $0x160] sm:$0xff] }
  0x43   : > { %v7000_v9 = vld [vmem:[%s10862_s3 + $0x158] sm:$0xff]  ;;  %v7002_v15 = vld [vmem:[%s10862_s3 + $0x168] sm:$0xff]  ;;  %v7003_v19 = vld [vmem:[%s10862_s3 + $0x170] sm:$0xff] }
  0x44   : > { %8649 = vmatpush3.bf16.msra.mxu0 %v8648_v33  ;;  %v9989_v11 = vpack.c.bf16 %v7000_v9, %v6999_v8  ;;  %v10001_v17 = vpack.c.bf16 %v7002_v15, %v7001_v12  ;;  %v7004_v20 = vld [vmem:[%s10862_s3 + $0x178] sm:$0xff]  ;;  %v7021_v23 = vld [vmem:[%s10862_s3 + $0x1c0] sm:$0xff]  ;;  %v7022_v25 = vld [vmem:[%s10862_s3 + $0x1c8] sm:$0xff] }
  0x45   : > { %8681 = vmatpush3.bf16.msra.mxu1 %v8680_v34  ;;  %8651 = vmatprep.subr.bf16.mxu0 %v8650_v35  ;;  %v10011_v22 = vpack.c.bf16 %v7004_v20, %v7003_v19  ;;  %v10021_v26 = vpack.c.bf16 %v7022_v25, %v7021_v23  ;;  %v6975_v53 = vld [vmem:[%s10862_s3 + $0xd0] sm:$0xff]  ;;  %v6976_v54 = vld [vmem:[%s10862_s3 + $0xd8] sm:$0xff]  ;;  %v6982_v19 = vld [vmem:[%s10863_s4 + $0xc] sm:$0xf] }
  0x46   : > { %8683 = vmatprep.subr.bf16.mxu1 %v8682_v39  ;;  %v6994_v25 = vld [vmem:[%s10863_s4 + $0x10] sm:$0xf] }
  0x48   : > { %8653 = vmatpush3.bf16.msra.mxu0 %v8652_v45  ;;  %v9884_v45 = vpack.c.bf16 %v6962_v42, %v6961_v41 }
  0x49   : > { %8685 = vmatpush3.bf16.msra.mxu1 %v8684_v46  ;;  %8655 = vmatprep.subr.bf16.mxu0 %v8654_v47  ;;  %v6963_v47 = vld [vmem:[%s10862_s3 + $0x90] sm:$0xff] }
  0x4a   : > { %8687 = vmatprep.subr.bf16.mxu1 %v8686_v51  ;;  %v9899_v49 = vpack.c.bf16 %v6964_v48, %v6963_v47  ;;  %v6966_v51 = vld [vmem:[%s10862_s3 + $0xa8] sm:$0xff] }
  0x4b   : > { %v9913_v52 = vpack.c.bf16 %v6966_v51, %v6965_v50  ;;  %v6974_v47 = vld [vmem:[%s10862_s3 + $0xc8] sm:$0xff] }
  0x4c   : > { %8657 = vmatpush3.bf16.msra.mxu0 %v8656_v57  ;;  %v6986_v57 = vld [vmem:[%s10862_s3 + $0x108] sm:$0xff] }
  0x4d   : > { %8689 = vmatpush3.bf16.msra.mxu1 %v8688_v58  ;;  %8659 = vmatprep.subr.bf16.mxu0 %v8658_v59  ;;  %v9933_v58 = vpack.c.bf16 %v6986_v57, %v6985_v56  ;;  %v6987_v59 = vld [vmem:[%s10862_s3 + $0x110] sm:$0xff]  ;;  %v6970_v48 = vld [vmem:[%s10863_s4 + $0x8] sm:$0xf]  ;;  %v10109_v57 = vpack.c.bf16 %v6976_v54, %v6975_v53  ;;  %v7033_v53 = vld [vmem:[%s10862_s3 + $0x200] sm:$0xff] }
  0x4e   : > { %8691 = vmatprep.subr.bf16.mxu1 %v8690_v62  ;;  %v9945_v61 = vpack.c.bf16 %v6988_v60, %v6987_v59  ;;  %v6989_v62 = vld [vmem:[%s10862_s3 + $0x120] sm:$0xff]  ;;  %v6978_v60 = vld [vmem:[%s10862_s3 + $0xe8] sm:$0xff] }
  0x4f   : > { %v9957_v0 = vpack.c.bf16 %v6990_v63, %v6989_v62  ;;  %v6977_v59 = vld [vmem:[%s10862_s3 + $0xe0] sm:$0xff]  ;;  %v6979_v63 = vld [vmem:[%s10862_s3 + $0xf0] sm:$0xff]  ;;  %v7034_v54 = vld [vmem:[%s10862_s3 + $0x208] sm:$0xff] }
  0x50   : > { %8661 = vmatpush3.bf16.msra.mxu0 %v8660_v1  ;;  %v6991_v1 = vld [vmem:[%s10862_s3 + $0x130] sm:$0xff]  ;;  %v10121_v62 = vpack.c.bf16 %v6978_v60, %v6977_v59  ;;  %v10227_v59 = vpack.c.bf16 %v7034_v54, %v7033_v53 }
  0x51   : > { %8693 = vmatpush3.bf16.msra.mxu1 %v8692_v2  ;;  %8694 = vmatprep.subr.bf16.mxu0 %v9268_v6  ;;  %v6992_v2 = vld [vmem:[%s10862_s3 + $0x138] sm:$0xff]  ;;  %v7035_v60 = vld [vmem:[%s10862_s3 + $0x210] sm:$0xff] }
  0x52   : > { %8706 = vmatprep.subr.bf16.mxu1 %v9268_v6  ;;  %v9967_v3 = vpack.c.bf16 %v6992_v2, %v6991_v1  ;;  %v6980_v1 = vld [vmem:[%s10862_s3 + $0xf8] sm:$0xff] }
  0x53   : > { %902 = vmatmul.mubr.f32.vlgmr.msra.gmra.mrb[2].mxu0 %v9559_v16  ;;  %v10131_v2 = vpack.c.bf16 %v6980_v1, %v6979_v63  ;;  %v7036_v63 = vld [vmem:[%s10862_s3 + $0x218] sm:$0xff] }
  0x54   : > { %1006 = vmatmul.mubr.f32.vlgmr.msra.gmra.mrb[2].mxu1 %v9559_v16  ;;  %v1013_v16 = vld [vmem:[%s10862_s3 + $0x8] sm:$0xff]  ;;  %7707 = vmatprep.mubr.msk.f32.mxu0 %vm9269_vm0, %v9270_v28  ;;  %v10237_v1 = vpack.c.bf16 %v7036_v63, %v7035_v60 }
  0x55   : > { %v9814_v10 = vpack.c.bf16 %v1013_v16, %v1012_v5  ;;  %8708 = vmatpush3.bf16.msra.mxu1 %v9803_v7  ;;  %7726 = vmatprep.mubr.msk.f32.mxu1 %vm9269_vm0, %v9270_v28  ;;  %v6998_v5 = vld [vmem:[%s10862_s3 + $0x148] sm:$0xff] }
  0x56   : > { %8709 = vmatprep.subr.bf16.mxu1 %v9268_v6  ;;  %v9977_v16 = vpack.c.bf16 %v6998_v5, %v6997_v4 }
  0x57   : > { %8696 = vmatpush3.bf16.msra.mxu0 %v9814_v10 }
  0x58   : > { %8697 = vmatprep.subr.bf16.mxu0 %v9268_v6 }
  0x59   : > { %8711 = vmatpush3.bf16.msra.mxu1 %v9823_v13 }
  0x5a   : > { %8712 = vmatprep.subr.bf16.mxu1 %v9268_v6 }
  0x5b   : > { %8699 = vmatpush3.bf16.msra.mxu0 %v9827_v14 }
  0x5c   : > { %8700 = vmatprep.subr.bf16.mxu0 %v9268_v6 }
  0x5d   : > { %8714 = vmatpush3.bf16.msra.mxu1 %v9840_v18 }
  0x5e   : > { %8715 = vmatprep.subr.bf16.mxu1 %v9268_v6 }
  0x5f   : > { %8702 = vmatpush3.bf16.msra.mxu0 %v9848_v21 }
  0x60   : > { %8703 = vmatprep.subr.bf16.mxu0 %v9268_v6 }
  0x61   : > { %8717 = vmatpush3.bf16.msra.mxu1 %v9860_v24 }
  0x62   : > { %8718 = vmatprep.subr.bf16.mxu1 %v9268_v6 }
  0x63   : > { %8705 = vmatpush3.bf16.msra.mxu0 %v9868_v27 }
  0x64   : > { %7729 = vmatprep.subr.mxu0 %v9270_v28 }
 0x106   : > { %v7182_v29 = vpop.f32.mrb[0].mxu0 }
 0x107   : > { %v7217_v30 = vpop.f32.mrb[0].mxu1  ;;  %v7183_v31 = vpop.f32.mrb[1].mxu0 }
 0x108   : > { %v7184_v32 = vadd.f32 %v7183_v31, %v7182_v29  ;;  %v7218_v33 = vpop.f32.mrb[1].mxu1  ;;  %v7023_v29 = vld [vmem:[%s10862_s3 + $0x1d0] sm:$0xff] }
 0x109   : > { %v7219_v34 = vadd.f32 %v7218_v33, %v7217_v30  ;;  %v7024_v30 = vld [vmem:[%s10862_s3 + $0x1d8] sm:$0xff]  ;;  %v7026_v33 = vld [vmem:[%s10862_s3 + $0x1e8] sm:$0xff] }
 0x10a   : > { %v10033_v31 = vpack.c.bf16 %v7024_v30, %v7023_v29  ;;  %v7009_v29 = vld [vmem:[%s10862_s3 + $0x180] sm:$0xff]  ;;  %v7010_v30 = vld [vmem:[%s10862_s3 + $0x188] sm:$0xff] }
 0x10b   : > { %v803_v35 = vmax.f32 %v7184_v32, %v7219_v34  ;;  %v7025_v32 = vld [vmem:[%s10862_s3 + $0x1e0] sm:$0xff] }
 0x10c   : > { %v10045_v34 = vpack.c.bf16 %v7026_v33, %v7025_v32  ;;  %v7006_v32 = vld [vmem:[%s10863_s4 + $0x14] sm:$0xf]  ;;  %v10167_v33 = vpack.c.bf16 %v7010_v30, %v7009_v29  ;;  %v2467_v30 = vld [vmem:[%s10864_s5] sm:$0xf] }
 0x126   : > { %v7252_v36 = vpop.f32.mrb[2].mxu0 }
 0x127   : > { %v7253_v37 = vpop.f32.mrb[3].mxu0  ;;  %v7287_v38 = vpop.f32.mrb[2].mxu1 }
 0x128   : > { %v7254_v39 = vadd.f32 %v7253_v37, %v7252_v36  ;;  %v7288_v40 = vpop.f32.mrb[3].mxu1  ;;  %v7028_v36 = vld [vmem:[%s10862_s3 + $0x1f8] sm:$0xff] }
 0x129   : > { %v7289_v43 = vadd.f32 %v7288_v40, %v7287_v38  ;;  %v6956_v38 = vld [vmem:[%s10863_s4 + $0x4] sm:$0xf] }
 0x12a   : > { %v907_v44 = vmax.f32 %v803_v35, %v7254_v39  ;;  %v7027_v35 = vld [vmem:[%s10862_s3 + $0x1f0] sm:$0xff] }
 0x12b   : > { %v10055_v37 = vpack.c.bf16 %v7028_v36, %v7027_v35  ;;  %v7011_v35 = vld [vmem:[%s10862_s3 + $0x190] sm:$0xff]  ;;  %v7012_v36 = vld [vmem:[%s10862_s3 + $0x198] sm:$0xff] }
 0x12c   : > { %v9886_v46 = vmax.f32 %v907_v44, %v7289_v43  ;;  %v1094_v43 = vld [vmem:[%s10863_s4] sm:$0xf] }
 0x12d   : > { %v6973_v44 = vld [vmem:[%s10862_s3 + $0xc0] sm:$0xff] }
 0x12e   : > { %7708 = vmatmul.mubr.msk.f32.vlgmr.msra.gmra.mrb[4].mxu0 %vm1020_vm1, %v9886_v46  ;;  %7727 = vmatmul.mubr.msk.f32.vlgmr.msra.gmra.mrb[4].mxu1 %vm1020_vm1, %v9886_v46  ;;  %v10097_v50 = vpack.c.bf16 %v6974_v47, %v6973_v44  ;;  %v7018_v47 = vld [vmem:[%s10863_s4 + $0x18] sm:$0xf] }
 0x12f   : > { %8720 = vmatpush3.bf16.msra.mxu1 %v9884_v45  ;;  %7755 = vmatprep.mubr.msk.f32.mxu1 %vm9269_vm0, %v9270_v28 }
 0x130   : > { %8721 = vmatprep.subr.bf16.mxu1 %v9268_v6  ;;  %7731 = vmatprep.mubr.msk.f32.mxu0 %vm9269_vm0, %v9270_v28 }
 0x133   : > { %8723 = vmatpush3.bf16.msra.mxu1 %v9899_v49 }
 0x134   : > { %8724 = vmatprep.subr.bf16.mxu1 %v9268_v6 }
 0x137   : > { %8726 = vmatpush3.bf16.msra.mxu1 %v9913_v52 }
 0x138   : > { %8727 = vmatprep.subr.bf16.mxu1 %v9268_v6 }
 0x13b   : > { %8729 = vmatpush3.bf16.msra.mxu1 %v9923_v55 }
 0x13c   : > { %8742 = vmatprep.subr.bf16.mxu1 %v9268_v6 }
 0x13e   : > { %7756 = vmatmul.mubr.msk.f32.vlgmr.msra.gmra.mrb[6].mxu1 %vm1020_vm1, %v9886_v46 }
 0x13f   : > { %8744 = vmatpush3.bf16.msra.mxu1 %v9933_v58  ;;  %7803 = vmatprep.mubr.msk.f32.mxu1 %vm9269_vm0, %v9270_v28 }
 0x140   : > { %8745 = vmatprep.subr.bf16.mxu1 %v9268_v6 }
 0x143   : > { %8747 = vmatpush3.bf16.msra.mxu1 %v9945_v61 }
 0x144   : > { %8748 = vmatprep.subr.bf16.mxu1 %v9268_v6 }
 0x147   : > { %8750 = vmatpush3.bf16.msra.mxu1 %v9957_v0 }
 0x148   : > { %8751 = vmatprep.subr.bf16.mxu1 %v9268_v6 }
 0x14b   : > { %8753 = vmatpush3.bf16.msra.mxu1 %v9967_v3 }
 0x14c   : > { %8754 = vmatprep.subr.bf16.mxu1 %v9268_v6 }
 0x14e   : > { %7804 = vmatmul.mubr.msk.f32.vlgmr.msra.gmra.mrb[8].mxu1 %vm1020_vm1, %v9886_v46 }
 0x14f   : > { %8756 = vmatpush3.bf16.msra.mxu1 %v9977_v16  ;;  %7827 = vmatprep.mubr.msk.f32.mxu1 %vm9269_vm0, %v9270_v28 }
 0x150   : > { %8757 = vmatprep.subr.bf16.mxu1 %v9268_v6 }
 0x153   : > { %8759 = vmatpush3.bf16.msra.mxu1 %v9989_v11 }
 0x154   : > { %8760 = vmatprep.subr.bf16.mxu1 %v9268_v6 }
 0x157   : > { %8762 = vmatpush3.bf16.msra.mxu1 %v10001_v17 }
 0x158   : > { %8763 = vmatprep.subr.bf16.mxu1 %v9268_v6 }
 0x15b   : > { %8765 = vmatpush3.bf16.msra.mxu1 %v10011_v22 }
 0x15c   : > { %8778 = vmatprep.subr.bf16.mxu1 %v9268_v6 }
 0x15e   : > { %7828 = vmatmul.mubr.msk.f32.vlgmr.msra.gmra.mrb[10].mxu1 %vm1020_vm1, %v9886_v46 }
 0x15f   : > { %8780 = vmatpush3.bf16.msra.mxu1 %v10021_v26  ;;  %7875 = vmatprep.mubr.msk.f32.mxu1 %vm9269_vm0, %v9270_v28 }
 0x160   : > { %8781 = vmatprep.subr.bf16.mxu1 %v9268_v6 }
 0x163   : > { %8783 = vmatpush3.bf16.msra.mxu1 %v10033_v31 }
 0x164   : > { %8784 = vmatprep.subr.bf16.mxu1 %v9268_v6 }
 0x167   : > { %8786 = vmatpush3.bf16.msra.mxu1 %v10045_v34 }
 0x168   : > { %8787 = vmatprep.subr.bf16.mxu1 %v9268_v6 }
 0x16b   : > { %8789 = vmatpush3.bf16.msra.mxu1 %v10055_v37 }
 0x16c   : > { %8802 = vmatprep.subr.bf16.mxu1 %v9268_v6 }
 0x16e   : > { %7876 = vmatmul.mubr.msk.f32.vlgmr.msra.gmra.mrb[12].mxu1 %vm1020_vm1, %v9886_v46 }
 0x16f   : > { %8804 = vmatpush3.bf16.msra.mxu1 %v9814_v10  ;;  %7923 = vmatprep.mubr.msk.f32.mxu1 %vm9269_vm0, %v9270_v28 }
 0x170   : > { %8805 = vmatprep.subr.bf16.mxu1 %v9268_v6 }
 0x173   : > { %8807 = vmatpush3.bf16.msra.mxu1 %v9827_v14 }
 0x174   : > { %8808 = vmatprep.subr.bf16.mxu1 %v9268_v6 }
 0x177   : > { %8810 = vmatpush3.bf16.msra.mxu1 %v9848_v21 }
 0x178   : > { %8811 = vmatprep.subr.bf16.mxu1 %v9268_v6 }
 0x17b   : > { %8813 = vmatpush3.bf16.msra.mxu1 %v9868_v27 }
 0x17c   : > { %8814 = vmatprep.subr.bf16.mxu1 %v9268_v6 }
 0x201   : > { %v1090_v39 = vpop.f32.mrb[4].mxu0  ;;  %v1170_v40 = vpop.f32.mrb[4].mxu1 }
 0x202   : > { %v7709_v41 = vpop.f32.mrb[5].mxu0  ;;  %v7728_v42 = vpop.f32.mrb[5].mxu1  ;;  %7730 = vmatpush3.msk.msra.mxu0 %vm1180_vm2, %v1170_v40  ;;  %v7014_v40 = vld [vmem:[%s10862_s3 + $0x1a8] sm:$0xff] }
 0x203   : > { %7732 = vmatmul.mubr.msk.f32.vlgmr.msra.gmra.mrb[6].mxu0 %vm1176_vm3, %v6956_v38  ;;  %7734 = vmatprep.subr.mxu0 %v9270_v28  ;;  %v10177_v38 = vpack.c.bf16 %v7012_v36, %v7011_v35  ;;  %v7015_v42 = vld [vmem:[%s10862_s3 + $0x1b0] sm:$0xff]  ;;  %v2474_v35 = vld [vmem:[%s10865_s6] sm:$0xf] }
 0x204   : > { %7735 = vmatpush3.msk.msra.mxu0 %vm1180_vm2, %v1090_v39  ;;  %7736 = vmatprep.mubr.msk.f32.mxu0 %vm9269_vm0, %v9270_v28  ;;  %v7013_v39 = vld [vmem:[%s10862_s3 + $0x1a0] sm:$0xff] }
 0x205   : > { %7758 = vmatprep.subr.mxu0 %v9270_v28  ;;  %v10189_v41 = vpack.c.bf16 %v7014_v40, %v7013_v39 }
 0x20b   : > { %7737 = vmatmul.mubr.msk.f32.vlgmr.msra.gmra.mrb[6].mxu0 %vm1176_vm3, %v1094_v43  ;;  %v7016_v43 = vld [vmem:[%s10862_s3 + $0x1b8] sm:$0xff] }
 0x20c   : > { %7760 = vmatprep.mubr.msk.f32.mxu0 %vm9269_vm0, %v9270_v28  ;;  %v10199_v44 = vpack.c.bf16 %v7016_v43, %v7015_v42 }
 0x211   : > { %v1405_v51 = vpop.f32.mrb[6].mxu1 }
 0x212   : > { %v7757_v56 = vpop.f32.mrb[7].mxu1  ;;  %7759 = vmatpush3.msk.msra.mxu0 %vm1180_vm2, %v1405_v51 }
 0x213   : > { %8730 = vmatprep.subr.bf16.mxu0 %v9268_v6  ;;  %7761 = vmatmul.mubr.msk.f32.vlgmr.msra.gmra.mrb[6].mxu0 %vm1176_vm3, %v6970_v48  ;;  %v7030_v56 = vld [vmem:[%s10863_s4 + $0x1c] sm:$0xf] }
 0x214   : > { %8732 = vmatpush3.bf16.msra.mxu0 %v10097_v50  ;;  %7779 = vmatprep.mubr.msk.f32.mxu0 %vm9269_vm0, %v9270_v28 }
 0x215   : > { %8733 = vmatprep.subr.bf16.mxu0 %v9268_v6 }
 0x218   : > { %8735 = vmatpush3.bf16.msra.mxu0 %v10109_v57 }
 0x219   : > { %8736 = vmatprep.subr.bf16.mxu0 %v9268_v6 }
 0x21c   : > { %8738 = vmatpush3.bf16.msra.mxu0 %v10121_v62 }
 0x21d   : > { %8739 = vmatprep.subr.bf16.mxu0 %v9268_v6 }
 0x220   : > { %8741 = vmatpush3.bf16.msra.mxu0 %v10131_v2 }
 0x221   : > { %v1721_v4 = vpop.f32.mrb[8].mxu1  ;;  %7782 = vmatprep.subr.mxu0 %v9270_v28 }
 0x222   : > { %v7805_v5 = vpop.f32.mrb[9].mxu1 }
 0x223   : > { %7780 = vmatmul.mubr.msk.f32.vlgmr.msra.gmra.mrb[8].mxu0 %vm1020_vm1, %v9886_v46  ;;  %v7038_v5 = vld [vmem:[%s10862_s3 + $0x228] sm:$0xff] }
 0x224   : > { %7784 = vmatprep.mubr.msk.f32.mxu0 %vm9269_vm0, %v9270_v28 }
 0x231   : > { %v1879_v8 = vpop.f32.mrb[10].mxu1 }
 0x232   : > { %v7829_v9 = vpop.f32.mrb[11].mxu1 }
 0x233   : > { %v7039_v9 = vld [vmem:[%s10862_s3 + $0x230] sm:$0xff] }
 0x241   : > { %v2195_v12 = vpop.f32.mrb[12].mxu1 }
 0x242   : > { %v7877_v15 = vpop.f32.mrb[13].mxu1 }
 0x2f6   : > { %v1563_v20 = vpop.f32.mrb[8].mxu0 }
 0x2f7   : > { %v7781_v23 = vpop.f32.mrb[9].mxu0  ;;  %7783 = vmatpush3.msk.msra.mxu0 %vm1180_vm2, %v1563_v20 }
 0x2f8   : > { %7785 = vmatmul.mubr.msk.f32.vlgmr.msra.gmra.mrb[6].mxu0 %vm1176_vm3, %v6982_v19  ;;  %7806 = vmatprep.subr.mxu0 %v9270_v28  ;;  %v7042_v19 = vld [vmem:[%s10863_s4 + $0x20] sm:$0xf] }
 0x2f9   : > { %7807 = vmatpush3.msk.msra.mxu0 %vm1180_vm2, %v1721_v4  ;;  %7808 = vmatprep.mubr.msk.f32.mxu0 %vm9269_vm0, %v9270_v28  ;;  %v7037_v4 = vld [vmem:[%s10862_s3 + $0x220] sm:$0xff] }
 0x2fa   : > { %7830 = vmatprep.subr.mxu0 %v9270_v28 }
 0x300   : > { %7809 = vmatmul.mubr.msk.f32.vlgmr.msra.gmra.mrb[6].mxu0 %vm1176_vm3, %v6994_v25 }
 0x301   : > { %7831 = vmatpush3.msk.msra.mxu0 %vm1180_vm2, %v1879_v8  ;;  %7832 = vmatprep.mubr.msk.f32.mxu0 %vm9269_vm0, %v9270_v28  ;;  %v10249_v8 = vpack.c.bf16 %v7038_v5, %v7037_v4 }
 0x302   : > { %8766 = vmatprep.subr.bf16.mxu0 %v9268_v6 }
 0x308   : > { %7833 = vmatmul.mubr.msk.f32.vlgmr.msra.gmra.mrb[6].mxu0 %vm1176_vm3, %v7006_v32  ;;  %v9271_v32 = vmov 0  }
 0x309   : > { %8768 = vmatpush3.bf16.msra.mxu0 %v10167_v33  ;;  %7851 = vmatprep.mubr.msk.f32.mxu0 %vm9269_vm0, %v9270_v28 }
 0x30a   : > { %8769 = vmatprep.subr.bf16.mxu0 %v9268_v6  ;;  %9225 = vset.pattern.permute.xlu1 %v9271_v32 }
 0x30b   : > { %9226 = vset.pattern.permute.xlu0 %v9271_v32  ;;  %2470 = vperm.xlu1 %9225, %v2467_v30  }
 0x30d   : > { %8771 = vmatpush3.bf16.msra.mxu0 %v10177_v38 }
 0x30e   : > { %8772 = vmatprep.subr.bf16.mxu0 %v9268_v6 }
 0x30f   : > { %2477 = vperm.xlu1 %9225, %v2474_v35  }
 0x311   : > { %8774 = vmatpush3.bf16.msra.mxu0 %v10189_v41 }
 0x312   : > { %8775 = vmatprep.subr.bf16.mxu0 %v9268_v6 }
 0x315   : > { %8777 = vmatpush3.bf16.msra.mxu0 %v10199_v44 }
 0x316   : > { %7854 = vmatprep.subr.mxu0 %v9270_v28 }
 0x318   : > { %7852 = vmatmul.mubr.msk.f32.vlgmr.msra.gmra.mrb[10].mxu0 %vm1020_vm1, %v9886_v46 }
 0x319   : > { %7856 = vmatprep.mubr.msk.f32.mxu0 %vm9269_vm0, %v9270_v28 }
 0x38a   : > { %v2471_v30 = vpop.permute.xlu1 %2470 }
 0x3eb   : > { %v2037_v48 = vpop.f32.mrb[10].mxu0 }
 0x3ec   : > { %v7853_v51 = vpop.f32.mrb[11].mxu0  ;;  %7855 = vmatpush3.msk.msra.mxu0 %vm1180_vm2, %v2037_v48 }
 0x3ed   : > { %7857 = vmatmul.mubr.msk.f32.vlgmr.msra.gmra.mrb[6].mxu0 %vm1176_vm3, %v7018_v47  ;;  %7878 = vmatprep.subr.mxu0 %v9270_v28 }
 0x3ee   : > { %7879 = vmatpush3.msk.msra.mxu0 %vm1180_vm2, %v2195_v12  ;;  %7880 = vmatprep.mubr.msk.f32.mxu0 %vm9269_vm0, %v9270_v28  ;;  %v7040_v12 = vld [vmem:[%s10862_s3 + $0x238] sm:$0xff] }
 0x3ef   : > { %8790 = vmatprep.subr.bf16.mxu0 %v9268_v6  ;;  %v10259_v15 = vpack.c.bf16 %v7040_v12, %v7039_v9 }
 0x3f5   : > { %7881 = vmatmul.mubr.msk.f32.vlgmr.msra.gmra.mrb[6].mxu0 %vm1176_vm3, %v7030_v56 }
 0x3f6   : > { %8792 = vmatpush3.bf16.msra.mxu0 %v10227_v59  ;;  %7899 = vmatprep.mubr.msk.f32.mxu0 %vm9269_vm0, %v9270_v28 }
 0x3f7   : > { %8793 = vmatprep.subr.bf16.mxu0 %v9268_v6 }
 0x3fa   : > { %8795 = vmatpush3.bf16.msra.mxu0 %v10237_v1 }
 0x3fb   : > { %8796 = vmatprep.subr.bf16.mxu0 %v9268_v6 }
 0x3fe   : > { %8798 = vmatpush3.bf16.msra.mxu0 %v10249_v8 }
 0x3ff   : > { %8799 = vmatprep.subr.bf16.mxu0 %v9268_v6 }
 0x402   : > { %8801 = vmatpush3.bf16.msra.mxu0 %v10259_v15 }
 0x403   : > { %7902 = vmatprep.subr.mxu0 %v9270_v28 }
 0x405   : > { %7900 = vmatmul.mubr.msk.f32.vlgmr.msra.gmra.mrb[12].mxu0 %vm1020_vm1, %v9886_v46 }
 0x406   : > { %7904 = vmatprep.mubr.msk.f32.mxu0 %vm9269_vm0, %v9270_v28 }
 0x4d8   : > { %v2353_v20 = vpop.f32.mrb[12].mxu0 }
 0x4d9   : > { %v7901_v23 = vpop.f32.mrb[13].mxu0  ;;  %7903 = vmatpush3.msk.msra.mxu0 %vm1180_vm2, %v2353_v20 }
 0x4da   : > { %7905 = vmatmul.mubr.msk.f32.vlgmr.msra.gmra.mrb[6].mxu0 %vm1176_vm3, %v7042_v19  ;;  %7945 = vmatprep.subr.mxu0 %v9270_v28 }
 0x4db   : > { %7947 = vmatprep.mubr.msk.f32.mxu0 %vm9269_vm0, %v9270_v28 }
 0x5ad   : > { %v2431_v46 = vpop.f32.mrb[6].mxu0 }
 0x5ae   : > { %v7906_v25 = vpop.f32.mrb[7].mxu0  ;;  %v2437_v29 = vsel %vm2436_vm4, %v2431_v46, 0.0 }
 0x5af   : > { %2438 = vadd.xlane.f32.xlu0 %v2437_v29 }
 0x63c   : > { %v2439_v36 = vpop.xlane.xlu0 %2438 }
 0x63d   : > { %v2440_v39 = vrot.slane %v2439_v36, 4 }
 0x63f   : > { %v2441_v40 = vadd.f32 %v2440_v39, %v2439_v36  ;;  %v2478_v36 = vpop.permute.xlu1 %2477 }
 0x641   : > { %v2442_v42 = vrot.slane %v2441_v40, 2 }
 0x643   : > { %v2443_v43 = vadd.f32 %v2442_v42, %v2441_v40 }
 0x645   : > { %v2444_v47 = vrot.slane %v2443_v43, 1 }
 0x647   : > { %v2445_v48 = vadd.f32 %v2444_v47, %v2443_v43 }
 0x649   : > { %9196 = vpush %v2445_v48 }
 0x67a   : > { %s9197_s18 = spop %9196 }
 0x67b   : > { %v2447_v51 = vstv %s9197_s18 }
 0x67c   : > { %v2449_v53 = vmul.f32 0.00390625, %v2447_v51 }
 0x67e   : > { %v2450_v54 = vsub.f32 %v2431_v46, %v2449_v53 }
 0x680   : > { %v2451_v56 = vmul.f32 %v2450_v54, %v2450_v54 }
 0x682   : > { %v2452_v60 = vsel %vm2436_vm4, %v2451_v56, 0.0 }
 0x683   : > { %2453 = vadd.xlane.f32.xlu0 %v2452_v60 }
 0x710   : > { %v2454_v63 = vpop.xlane.xlu0 %2453 }
 0x711   : > { %v2455_v4 = vrot.slane %v2454_v63, 4 }
 0x713   : > { %v2456_v5 = vadd.f32 %v2455_v4, %v2454_v63 }
 0x715   : > { %v2457_v9 = vrot.slane %v2456_v5, 2 }
 0x717   : > { %v2458_v12 = vadd.f32 %v2457_v9, %v2456_v5 }
 0x719   : > { %v2459_v19 = vrot.slane %v2458_v12, 1 }
 0x71b   : > { %v2460_v20 = vadd.f32 %v2459_v19, %v2458_v12 }
 0x71d   : > { %9198 = vpush %v2460_v20 }
 0x74e   : > { %s9199_s29 = spop %9198 }
 0x74f   : > { %v2462_v23 = vstv %s9199_s29 }
 0x750   : > { %v2463_v25 = vmul.f32 0.00390625, %v2462_v23 }
 0x752   : > { %v2464_v29 = vadd.f32 1e-05, %v2463_v25 }
 0x754   : > { %9228 = vrsqrt.f32 %v2464_v29 }
 0x75e   : > { %v9229_v32 = vpop.eup %9228 }
 0x75f   : > { %v2466_v46 = vmul.f32 %v9229_v32, %v2450_v54 }
 0x761   : > { %v2473_v35 = vmul.f32 %v2471_v30, %v2466_v46  ;;  %v9272_v30 = vmov -1.0  }
 0x763   : > { %v2480_v39 = vadd.f32 %v2478_v36, %v2473_v35 }
 0x765   : > { %v2481_v40 = vmul.f32 0.70710677, %v2480_v39  ;;  %v2504_v35 = vmul.f32 0.5, %v2480_v39 }
 0x767   : > { %v2484_v42 = vand.u32 2147483647, %v2481_v40  ;;  %vm2482_vm5 = vcmp.ge.f32.partialorder %v2481_v40, 0.0 }
 0x768   : > { %v2483_v32 = vsel %vm2482_vm5, 1.0, %v9272_v30 }
 0x769   : > { %v2485_v43 = vmul.f32 0.3275911, %v2484_v42  ;;  %v2497_v48 = vsub.f32 0.0, %v2484_v42 }
 0x76b   : > { %v2486_v47 = vadd.f32 1.0, %v2485_v43  ;;  %v2498_v53 = vmul.f32 %v2497_v48, %v2484_v42  ;;  %v7047_v43 = vld [vmem:[%s10866_s7 + $0x4] sm:$0xf] }
 0x76d   : > { %9230 = vrcp.f32 %v2486_v47  ;;  %v2499_v63 = vmul.f32 1.442695, %v2498_v53 }
 0x76f   : > { %9232 = vpow2.f32 %v2499_v63 }
 0x777   : > { %v9231_v51 = vpop.eup %9230 }
 0x778   : > { %v2488_v56 = vmul.f32 1.0614054, %v9231_v51 }
 0x779   : > { %v9233_v23 = vpop.eup %9232 }
 0x77a   : > { %v2489_v60 = vadd.f32 -1.4531521, %v2488_v56 }
 0x77c   : > { %v2490_v4 = vmul.f32 %v9231_v51, %v2489_v60 }
 0x77e   : > { %v2491_v5 = vadd.f32 1.4214138, %v2490_v4 }
 0x780   : > { %v2492_v9 = vmul.f32 %v9231_v51, %v2491_v5 }
 0x782   : > { %v2493_v12 = vadd.f32 -0.28449672, %v2492_v9 }
 0x784   : > { %v2494_v54 = vmul.f32 %v9231_v51, %v2493_v12 }
 0x786   : > { %v2495_v19 = vadd.f32 0.2548296, %v2494_v54  ;;  %v7053_v54 = vld [vmem:[%s10866_s7 + $0x8] sm:$0xf] }
 0x788   : > { %v2496_v20 = vmul.f32 %v9231_v51, %v2495_v19  ;;  %v2580_v51 = vld [vmem:[%s10866_s7] sm:$0xf] }
 0x78a   : > { %v2501_v25 = vmul.f32 %v9233_v23, %v2496_v20  ;;  %v7057_v23 = vld [vmem:[%s10866_s7 + $0xc] sm:$0xf] }
 0x78c   : > { %v2502_v29 = vsub.f32 1.0, %v2501_v25  ;;  %v7061_v25 = vld [vmem:[%s10866_s7 + $0x10] sm:$0xf] }
 0x78e   : > { %v2503_v46 = vmul.f32 %v2502_v29, %v2483_v32  ;;  %v7065_v29 = vld [vmem:[%s10866_s7 + $0x14] sm:$0xf] }
 0x790   : > { %v2505_v36 = vadd.f32 1.0, %v2503_v46 }
 0x792   : > { %v10285_v42 = vmul.f32 %v2505_v36, %v2504_v35  ;;  %v7069_v35 = vld [vmem:[%s10866_s7 + $0x18] sm:$0xf]  ;;  %v7073_v36 = vld [vmem:[%s10866_s7 + $0x1c] sm:$0xf] }
 0x794   : > { %7924 = vmatmul.mubr.msk.f32.vlgmr.msra.gmra.mrb[14].mxu1 %vm1020_vm1, %v10285_v42 }
 0x795   : > { %8816 = vmatpush3.bf16.msra.mxu1 %v9803_v7  ;;  %7942 = vmatprep.mubr.msk.f32.mxu1 %vm9269_vm0, %v9270_v28 }
 0x796   : > { %8817 = vmatprep.subr.bf16.mxu1 %v9268_v6 }
 0x799   : > { %8819 = vmatpush3.bf16.msra.mxu1 %v9823_v13 }
 0x79a   : > { %8820 = vmatprep.subr.bf16.mxu1 %v9268_v6 }
 0x79d   : > { %8822 = vmatpush3.bf16.msra.mxu1 %v9840_v18 }
 0x79e   : > { %8823 = vmatprep.subr.bf16.mxu1 %v9268_v6 }
 0x7a1   : > { %8825 = vmatpush3.bf16.msra.mxu1 %v9860_v24 }
 0x7a2   : > { %8838 = vmatprep.subr.bf16.mxu1 %v9268_v6 }
 0x7a4   : > { %7943 = vmatmul.mubr.msk.f32.vlgmr.msra.gmra.mrb[16].mxu1 %vm1020_vm1, %v10285_v42 }
 0x7a5   : > { %8840 = vmatpush3.bf16.msra.mxu1 %v10097_v50  ;;  %7995 = vmatprep.mubr.msk.f32.mxu1 %vm9269_vm0, %v9270_v28 }
 0x7a6   : > { %8841 = vmatprep.subr.bf16.mxu1 %v9268_v6 }
 0x7a9   : > { %8843 = vmatpush3.bf16.msra.mxu1 %v10109_v57 }
 0x7aa   : > { %8844 = vmatprep.subr.bf16.mxu1 %v9268_v6 }
 0x7ad   : > { %8846 = vmatpush3.bf16.msra.mxu1 %v10121_v62 }
 0x7ae   : > { %8847 = vmatprep.subr.bf16.mxu1 %v9268_v6 }
 0x7b1   : > { %8849 = vmatpush3.bf16.msra.mxu1 %v10131_v2 }
 0x7b2   : > { %8850 = vmatprep.subr.bf16.mxu1 %v9268_v6 }
 0x7b4   : > { %7996 = vmatmul.mubr.msk.f32.vlgmr.msra.gmra.mrb[18].mxu1 %vm1020_vm1, %v10285_v42 }
 0x7b5   : > { %8852 = vmatpush3.bf16.msra.mxu1 %v9933_v58  ;;  %8019 = vmatprep.mubr.msk.f32.mxu1 %vm9269_vm0, %v9270_v28 }
 0x7b6   : > { %8853 = vmatprep.subr.bf16.mxu1 %v9268_v6 }
 0x7b9   : > { %8855 = vmatpush3.bf16.msra.mxu1 %v9945_v61 }
 0x7ba   : > { %8856 = vmatprep.subr.bf16.mxu1 %v9268_v6 }
 0x7bd   : > { %8858 = vmatpush3.bf16.msra.mxu1 %v9957_v0 }
 0x7be   : > { %8859 = vmatprep.subr.bf16.mxu1 %v9268_v6 }
 0x7c1   : > { %8861 = vmatpush3.bf16.msra.mxu1 %v9967_v3 }
 0x7c2   : > { %8874 = vmatprep.subr.bf16.mxu1 %v9268_v6 }
 0x7c4   : > { %8020 = vmatmul.mubr.msk.f32.vlgmr.msra.gmra.mrb[20].mxu1 %vm1020_vm1, %v10285_v42 }
 0x7c5   : > { %8876 = vmatpush3.bf16.msra.mxu1 %v10167_v33  ;;  %8067 = vmatprep.mubr.msk.f32.mxu1 %vm9269_vm0, %v9270_v28 }
 0x7c6   : > { %8877 = vmatprep.subr.bf16.mxu1 %v9268_v6 }
 0x7c9   : > { %8879 = vmatpush3.bf16.msra.mxu1 %v10177_v38 }
 0x7ca   : > { %8880 = vmatprep.subr.bf16.mxu1 %v9268_v6 }
 0x7cd   : > { %8882 = vmatpush3.bf16.msra.mxu1 %v10189_v41 }
 0x7ce   : > { %8883 = vmatprep.subr.bf16.mxu1 %v9268_v6 }
 0x7d1   : > { %8885 = vmatpush3.bf16.msra.mxu1 %v10199_v44 }
 0x7d2   : > { %8898 = vmatprep.subr.bf16.mxu1 %v9268_v6 }
 0x7d4   : > { %8068 = vmatmul.mubr.msk.f32.vlgmr.msra.gmra.mrb[22].mxu1 %vm1020_vm1, %v10285_v42 }
 0x7d5   : > { %8900 = vmatpush3.bf16.msra.mxu1 %v10227_v59  ;;  %8115 = vmatprep.mubr.msk.f32.mxu1 %vm9269_vm0, %v9270_v28 }
 0x7d6   : > { %8901 = vmatprep.subr.bf16.mxu1 %v9268_v6 }
 0x7d9   : > { %8903 = vmatpush3.bf16.msra.mxu1 %v10237_v1 }
 0x7da   : > { %8904 = vmatprep.subr.bf16.mxu1 %v9268_v6 }
 0x7dd   : > { %8906 = vmatpush3.bf16.msra.mxu1 %v10249_v8 }
 0x7de   : > { %8907 = vmatprep.subr.bf16.mxu1 %v9268_v6 }
 0x7e1   : > { %8909 = vmatpush3.bf16.msra.mxu1 %v10259_v15 }
 0x7e2   : > { %8910 = vmatprep.subr.bf16.mxu1 %v9268_v6 }
 0x7e4   : > { %8116 = vmatmul.mubr.msk.f32.vlgmr.msra.gmra.mrb[24].mxu1 %vm1020_vm1, %v10285_v42 }
 0x7e5   : > { %8912 = vmatpush3.bf16.msra.mxu1 %v9814_v10  ;;  %8139 = vmatprep.mubr.msk.f32.mxu1 %vm9269_vm0, %v9270_v28 }
 0x7e6   : > { %8913 = vmatprep.subr.bf16.mxu1 %v9268_v6 }
 0x7e9   : > { %8915 = vmatpush3.bf16.msra.mxu1 %v9827_v14 }
 0x7ea   : > { %8916 = vmatprep.subr.bf16.mxu1 %v9268_v6 }
 0x7ed   : > { %8918 = vmatpush3.bf16.msra.mxu1 %v9848_v21 }
 0x7ee   : > { %8919 = vmatprep.subr.bf16.mxu1 %v9268_v6 }
 0x7f1   : > { %8921 = vmatpush3.bf16.msra.mxu1 %v9868_v27 }
 0x7f2   : > { %8161 = vmatprep.subr.mxu1 %v9270_v28 }
 0x867   : > { %v2576_v39 = vpop.f32.mrb[14].mxu1 }
 0x868   : > { %v7925_v40 = vpop.f32.mrb[15].mxu1 }
 0x877   : > { %v2647_v47 = vpop.f32.mrb[16].mxu1 }
 0x878   : > { %v7944_v48 = vpop.f32.mrb[17].mxu1  ;;  %7946 = vmatpush3.msk.msra.mxu0 %vm1180_vm2, %v2647_v47 }
 0x879   : > { %7948 = vmatmul.mubr.msk.f32.vlgmr.msra.gmra.mrb[14].mxu0 %vm1176_vm3, %v7047_v43  ;;  %7950 = vmatprep.subr.mxu0 %v9270_v28 }
 0x87a   : > { %7951 = vmatpush3.msk.msra.mxu0 %vm1180_vm2, %v2576_v39  ;;  %7952 = vmatprep.mubr.msk.f32.mxu0 %vm9269_vm0, %v9270_v28 }
 0x87b   : > { %8826 = vmatprep.subr.bf16.mxu0 %v9268_v6 }
 0x881   : > { %7953 = vmatmul.mubr.msk.f32.vlgmr.msra.gmra.mrb[14].mxu0 %vm1176_vm3, %v2580_v51  ;;  %v3877_v51 = vld [vmem:[%s10867_s8] sm:$0xf] }
 0x882   : > { %8828 = vmatpush3.bf16.msra.mxu0 %v9884_v45  ;;  %7971 = vmatprep.mubr.msk.f32.mxu0 %vm9269_vm0, %v9270_v28 }
 0x883   : > { %8829 = vmatprep.subr.bf16.mxu0 %v9268_v6 }
 0x886   : > { %8831 = vmatpush3.bf16.msra.mxu0 %v9899_v49 }
 0x887   : > { %v3020_v53 = vpop.f32.mrb[18].mxu1  ;;  %8832 = vmatprep.subr.bf16.mxu0 %v9268_v6 }
 0x888   : > { %v7997_v56 = vpop.f32.mrb[19].mxu1 }
 0x88a   : > { %8834 = vmatpush3.bf16.msra.mxu0 %v9913_v52 }
 0x88b   : > { %8835 = vmatprep.subr.bf16.mxu0 %v9268_v6 }
 0x88e   : > { %8837 = vmatpush3.bf16.msra.mxu0 %v9923_v55 }
 0x88f   : > { %7974 = vmatprep.subr.mxu0 %v9270_v28 }
 0x891   : > { %7972 = vmatmul.mubr.msk.f32.vlgmr.msra.gmra.mrb[16].mxu0 %vm1020_vm1, %v10285_v42 }
 0x892   : > { %7976 = vmatprep.mubr.msk.f32.mxu0 %vm9269_vm0, %v9270_v28 }
 0x897   : > { %v3169_v60 = vpop.f32.mrb[20].mxu1 }
 0x898   : > { %v8021_v63 = vpop.f32.mrb[21].mxu1 }
 0x8a7   : > { %v3467_v4 = vpop.f32.mrb[22].mxu1 }
 0x8a8   : > { %v8069_v5 = vpop.f32.mrb[23].mxu1 }
 0x8b7   : > { %v3765_v9 = vpop.f32.mrb[24].mxu1 }
 0x8b8   : > { %v8117_v12 = vpop.f32.mrb[25].mxu1 }
 0x964   : > { %v2871_v19 = vpop.f32.mrb[16].mxu0 }
 0x965   : > { %v7973_v20 = vpop.f32.mrb[17].mxu0  ;;  %7975 = vmatpush3.msk.msra.mxu0 %vm1180_vm2, %v2871_v19 }
 0x966   : > { %7977 = vmatmul.mubr.msk.f32.vlgmr.msra.gmra.mrb[14].mxu0 %vm1176_vm3, %v7053_v54  ;;  %7998 = vmatprep.subr.mxu0 %v9270_v28 }
 0x967   : > { %7999 = vmatpush3.msk.msra.mxu0 %vm1180_vm2, %v3020_v53  ;;  %8000 = vmatprep.mubr.msk.f32.mxu0 %vm9269_vm0, %v9270_v28 }
 0x968   : > { %8022 = vmatprep.subr.mxu0 %v9270_v28 }
 0x96e   : > { %8001 = vmatmul.mubr.msk.f32.vlgmr.msra.gmra.mrb[14].mxu0 %vm1176_vm3, %v7057_v23 }
 0x96f   : > { %8023 = vmatpush3.msk.msra.mxu0 %vm1180_vm2, %v3169_v60  ;;  %8024 = vmatprep.mubr.msk.f32.mxu0 %vm9269_vm0, %v9270_v28 }
 0x970   : > { %8862 = vmatprep.subr.bf16.mxu0 %v9268_v6 }
 0x976   : > { %8025 = vmatmul.mubr.msk.f32.vlgmr.msra.gmra.mrb[14].mxu0 %vm1176_vm3, %v7061_v25  ;;  %v3884_v25 = vld [vmem:[%s10868_s9] sm:$0xf] }
 0x977   : > { %8864 = vmatpush3.bf16.msra.mxu0 %v9977_v16  ;;  %8043 = vmatprep.mubr.msk.f32.mxu0 %vm9269_vm0, %v9270_v28 }
 0x978   : > { %8865 = vmatprep.subr.bf16.mxu0 %v9268_v6 }
 0x97b   : > { %8867 = vmatpush3.bf16.msra.mxu0 %v9989_v11 }
 0x97c   : > { %8868 = vmatprep.subr.bf16.mxu0 %v9268_v6 }
 0x97f   : > { %8870 = vmatpush3.bf16.msra.mxu0 %v10001_v17 }
 0x980   : > { %8871 = vmatprep.subr.bf16.mxu0 %v9268_v6 }
 0x983   : > { %8873 = vmatpush3.bf16.msra.mxu0 %v10011_v22 }
 0x984   : > { %8046 = vmatprep.subr.mxu0 %v9270_v28 }
 0x986   : > { %8044 = vmatmul.mubr.msk.f32.vlgmr.msra.gmra.mrb[18].mxu0 %vm1020_vm1, %v10285_v42 }
 0x987   : > { %8048 = vmatprep.mubr.msk.f32.mxu0 %vm9269_vm0, %v9270_v28 }
 0xa59   : > { %v3318_v32 = vpop.f32.mrb[18].mxu0 }
 0xa5a   : > { %v8045_v46 = vpop.f32.mrb[19].mxu0  ;;  %8047 = vmatpush3.msk.msra.mxu0 %vm1180_vm2, %v3318_v32 }
 0xa5b   : > { %8049 = vmatmul.mubr.msk.f32.vlgmr.msra.gmra.mrb[14].mxu0 %vm1176_vm3, %v7065_v29  ;;  %8070 = vmatprep.subr.mxu0 %v9270_v28 }
 0xa5c   : > { %8071 = vmatpush3.msk.msra.mxu0 %vm1180_vm2, %v3467_v4  ;;  %8072 = vmatprep.mubr.msk.f32.mxu0 %vm9269_vm0, %v9270_v28 }
 0xa5d   : > { %8886 = vmatprep.subr.bf16.mxu0 %v9268_v6 }
 0xa63   : > { %8073 = vmatmul.mubr.msk.f32.vlgmr.msra.gmra.mrb[14].mxu0 %vm1176_vm3, %v7069_v35 }
 0xa64   : > { %8888 = vmatpush3.bf16.msra.mxu0 %v10021_v26  ;;  %8091 = vmatprep.mubr.msk.f32.mxu0 %vm9269_vm0, %v9270_v28 }
 0xa65   : > { %8889 = vmatprep.subr.bf16.mxu0 %v9268_v6 }
 0xa68   : > { %8891 = vmatpush3.bf16.msra.mxu0 %v10033_v31 }
 0xa69   : > { %8892 = vmatprep.subr.bf16.mxu0 %v9268_v6 }
 0xa6c   : > { %8894 = vmatpush3.bf16.msra.mxu0 %v10045_v34 }
 0xa6d   : > { %8895 = vmatprep.subr.bf16.mxu0 %v9268_v6 }
 0xa70   : > { %8897 = vmatpush3.bf16.msra.mxu0 %v10055_v37 }
 0xa71   : > { %8094 = vmatprep.subr.mxu0 %v9270_v28 }
 0xa73   : > { %8092 = vmatmul.mubr.msk.f32.vlgmr.msra.gmra.mrb[20].mxu0 %vm1020_vm1, %v10285_v42  ;;  %v7077_v42 = vld [vmem:[%s10866_s7 + $0x20] sm:$0xf] }
 0xa74   : > { %8096 = vmatprep.mubr.msk.f32.mxu0 %vm9269_vm0, %v9270_v28 }
 0xb46   : > { %v3616_v39 = vpop.f32.mrb[20].mxu0 }
 0xb47   : > { %v8093_v40 = vpop.f32.mrb[21].mxu0  ;;  %8095 = vmatpush3.msk.msra.mxu0 %vm1180_vm2, %v3616_v39 }
 0xb48   : > { %8097 = vmatmul.mubr.msk.f32.vlgmr.msra.gmra.mrb[14].mxu0 %vm1176_vm3, %v7073_v36  ;;  %8118 = vmatprep.subr.mxu0 %v9270_v28 }
 0xb49   : > { %8119 = vmatpush3.msk.msra.mxu0 %vm1180_vm2, %v3765_v9  ;;  %8120 = vmatprep.mubr.msk.f32.mxu0 %vm9269_vm0, %v9270_v28 }
 0xb4a   : > { %8922 = vmatprep.subr.bf16.mxu0 %v9268_v6 }
 0xb50   : > { %8121 = vmatmul.mubr.msk.f32.vlgmr.msra.gmra.mrb[14].mxu0 %vm1176_vm3, %v7077_v42 }
 0xb51   : > { %8924 = vmatpush3.bf16.msra.mxu0 %v9803_v7  ;;  %8158 = vmatprep.mubr.msk.f32.mxu0 %vm9269_vm0, %v9270_v28 }
 0xb52   : > { %8925 = vmatprep.subr.bf16.mxu0 %v9268_v6 }
 0xb55   : > { %8927 = vmatpush3.bf16.msra.mxu0 %v9823_v13 }
 0xb56   : > { %8928 = vmatprep.subr.bf16.mxu0 %v9268_v6 }
 0xb59   : > { %8930 = vmatpush3.bf16.msra.mxu0 %v9840_v18 }
 0xb5a   : > { %8931 = vmatprep.subr.bf16.mxu0 %v9268_v6 }
 0xb5d   : > { %8933 = vmatpush3.bf16.msra.mxu0 %v9860_v24 }
 0xb5e   : > { %8934 = vmatprep.subr.bf16.mxu0 %v9268_v6 }
 0xc23   : > { %v3843_v43 = vpop.f32.mrb[14].mxu0 }
 0xc24   : > { %v8122_v47 = vpop.f32.mrb[15].mxu0  ;;  %v3848_v48 = vsel %vm2436_vm4, %v3843_v43, 0.0 }
 0xc25   : > { %3849 = vadd.xlane.f32.xlu0 %v3848_v48 }
 0xc3b   : > { %3880 = vperm.xlu0 %9226, %v3877_v51  }
 0xcb2   : > { %v3850_v53 = vpop.xlane.xlu0 %3849 }
 0xcb3   : > { %v3851_v56 = vrot.slane %v3850_v53, 4 }
 0xcb5   : > { %v3852_v60 = vadd.f32 %v3851_v56, %v3850_v53 }
 0xcb7   : > { %v3853_v63 = vrot.slane %v3852_v60, 2 }
 0xcb9   : > { %v3854_v4 = vadd.f32 %v3853_v63, %v3852_v60 }
 0xcba   : > { %v3881_v51 = vpop.permute.xlu0 %3880 }
 0xcbb   : > { %v3855_v5 = vrot.slane %v3854_v4, 1 }
 0xcbd   : > { %v3856_v9 = vadd.f32 %v3855_v5, %v3854_v4 }
 0xcbf   : > { %9200 = vpush %v3856_v9 }
 0xcf0   : > { %s9201_s21 = spop %9200 }
 0xcf1   : > { %v3858_v12 = vstv %s9201_s21 }
 0xcf2   : > { %v3859_v54 = vmul.f32 0.00390625, %v3858_v12 }
 0xcf4   : > { %v3860_v19 = vsub.f32 %v3843_v43, %v3859_v54 }
 0xcf6   : > { %v3861_v20 = vmul.f32 %v3860_v19, %v3860_v19 }
 0xcf8   : > { %v3862_v23 = vsel %vm2436_vm4, %v3861_v20, 0.0 }
 0xcf9   : > { %3863 = vadd.xlane.f32.xlu1 %v3862_v23 }
 0xd0a   : > { %3887 = vperm.xlu1 %9225, %v3884_v25  }
 0xd86   : > { %v3864_v29 = vpop.xlane.xlu1 %3863 }
 0xd87   : > { %v3865_v32 = vrot.slane %v3864_v29, 4 }
 0xd89   : > { %v3866_v46 = vadd.f32 %v3865_v32, %v3864_v29 }
 0xd8a   : > { %v3888_v60 = vpop.permute.xlu1 %3887 }
 0xd8b   : > { %v3867_v35 = vrot.slane %v3866_v46, 2 }
 0xd8d   : > { %v3868_v36 = vadd.f32 %v3867_v35, %v3866_v46  ;;  %v7092_v46 = vld [vmem:[%s10869_s10 + $0x18] sm:$0xff] }
 0xd8f   : > { %v3869_v39 = vrot.slane %v3868_v36, 1 }
 0xd91   : > { %v3870_v40 = vadd.f32 %v3869_v39, %v3868_v36  ;;  %v7096_v39 = vld [vmem:[%s10869_s10 + $0x20] sm:$0xff] }
 0xd93   : > { %9202 = vpush %v3870_v40  ;;  %v7100_v40 = vld [vmem:[%s10869_s10 + $0x28] sm:$0xff] }
 0xdc4   : > { %s9203_s2 = spop %9202 }
 0xdc5   : > { %v3872_v42 = vstv %s9203_s2  ;;  %s7149_s2 = sshll.u32 %s10894_s19, 5 }
 0xdc6   : > { %v3873_v43 = vmul.f32 0.00390625, %v3872_v42  ;;  %s589_s24 = scalar_lea.vmem %s10890_s23, %s7149_s2 }
 0xdc8   : > { %v3874_v47 = vadd.f32 1e-05, %v3873_v43 }
 0xdca   : > { %9234 = vrsqrt.f32 %v3874_v47  ;;  %v7104_v47 = vld [vmem:[%s10869_s10 + $0x30] sm:$0xff] }
 0xdd4   : > { %v9235_v48 = vpop.eup %9234 }
 0xdd5   : > { %v3876_v53 = vmul.f32 %v9235_v48, %v3860_v19  ;;  %v7108_v48 = vld [vmem:[%s10869_s10 + $0x38] sm:$0xff] }
 0xdd7   : > { %v3883_v56 = vmul.f32 %v3881_v51, %v3876_v53  ;;  %v7112_v51 = vld [vmem:[%s10869_s10 + $0x40] sm:$0xff] }
 0xdd9   : > { %v10483_v63 = vadd.f32 %v3888_v60, %v3883_v56 }
 0xddb   : > { %8140 = vmatmul.mubr.msk.f32.vlgmr.msra.gmra.mrb[26].mxu1 %vm1020_vm1, %v10483_v63  ;;  %8159 = vmatmul.mubr.msk.f32.vlgmr.msra.gmra.mrb[22].mxu0 %vm1020_vm1, %v10483_v63 }
 0xddc   : > { %8936 = vmatpush3.bf16.msra.mxu0 %v9884_v45  ;;  %8187 = vmatprep.mubr.msk.f32.mxu0 %vm9269_vm0, %v9270_v28 }
 0xddd   : > { %8937 = vmatprep.subr.bf16.mxu0 %v9268_v6  ;;  %8163 = vmatprep.mubr.msk.f32.mxu1 %vm9269_vm0, %v9270_v28 }
 0xde0   : > { %8939 = vmatpush3.bf16.msra.mxu0 %v9899_v49 }
 0xde1   : > { %8940 = vmatprep.subr.bf16.mxu0 %v9268_v6 }
 0xde4   : > { %8942 = vmatpush3.bf16.msra.mxu0 %v9913_v52 }
 0xde5   : > { %8943 = vmatprep.subr.bf16.mxu0 %v9268_v6 }
 0xde8   : > { %8945 = vmatpush3.bf16.msra.mxu0 %v9923_v55 }
 0xde9   : > { %8958 = vmatprep.subr.bf16.mxu0 %v9268_v6 }
 0xdeb   : > { %8188 = vmatmul.mubr.msk.f32.vlgmr.msra.gmra.mrb[24].mxu0 %vm1020_vm1, %v10483_v63 }
 0xdec   : > { %8960 = vmatpush3.bf16.msra.mxu0 %v9933_v58  ;;  %8235 = vmatprep.mubr.msk.f32.mxu0 %vm9269_vm0, %v9270_v28 }
 0xded   : > { %8961 = vmatprep.subr.bf16.mxu0 %v9268_v6 }
 0xdf0   : > { %8963 = vmatpush3.bf16.msra.mxu0 %v9945_v61 }
 0xdf1   : > { %8964 = vmatprep.subr.bf16.mxu0 %v9268_v6 }
 0xdf4   : > { %8966 = vmatpush3.bf16.msra.mxu0 %v9957_v0 }
 0xdf5   : > { %8967 = vmatprep.subr.bf16.mxu0 %v9268_v6 }
 0xdf8   : > { %8969 = vmatpush3.bf16.msra.mxu0 %v9967_v3 }
 0xdf9   : > { %8982 = vmatprep.subr.bf16.mxu0 %v9268_v6 }
 0xdfb   : > { %8236 = vmatmul.mubr.msk.f32.vlgmr.msra.gmra.mrb[26].mxu0 %vm1020_vm1, %v10483_v63 }
 0xdfc   : > { %8984 = vmatpush3.bf16.msra.mxu0 %v10167_v33  ;;  %8283 = vmatprep.mubr.msk.f32.mxu0 %vm9269_vm0, %v9270_v28 }
 0xdfd   : > { %8985 = vmatprep.subr.bf16.mxu0 %v9268_v6 }
 0xe00   : > { %8987 = vmatpush3.bf16.msra.mxu0 %v10177_v38 }
 0xe01   : > { %8988 = vmatprep.subr.bf16.mxu0 %v9268_v6 }
 0xe04   : > { %8990 = vmatpush3.bf16.msra.mxu0 %v10189_v41 }
 0xe05   : > { %8991 = vmatprep.subr.bf16.mxu0 %v9268_v6 }
 0xe08   : > { %8993 = vmatpush3.bf16.msra.mxu0 %v10199_v44 }
 0xe09   : > { %8994 = vmatprep.subr.bf16.mxu0 %v9268_v6 }
 0xe0b   : > { %8284 = vmatmul.mubr.msk.f32.vlgmr.msra.gmra.mrb[28].mxu0 %vm1020_vm1, %v10483_v63 }
 0xe0c   : > { %8996 = vmatpush3.bf16.msra.mxu0 %v10021_v26  ;;  %8307 = vmatprep.mubr.msk.f32.mxu0 %vm9269_vm0, %v9270_v28 }
 0xe0d   : > { %8997 = vmatprep.subr.bf16.mxu0 %v9268_v6 }
 0xe10   : > { %8999 = vmatpush3.bf16.msra.mxu0 %v10033_v31 }
 0xe11   : > { %9000 = vmatprep.subr.bf16.mxu0 %v9268_v6 }
 0xe14   : > { %9002 = vmatpush3.bf16.msra.mxu0 %v10045_v34 }
 0xe15   : > { %9003 = vmatprep.subr.bf16.mxu0 %v9268_v6 }
 0xe18   : > { %9005 = vmatpush3.bf16.msra.mxu0 %v10055_v37 }
 0xe19   : > { %9018 = vmatprep.subr.bf16.mxu0 %v9268_v6 }
 0xe1b   : > { %8308 = vmatmul.mubr.msk.f32.vlgmr.msra.gmra.mrb[30].mxu0 %vm1020_vm1, %v10483_v63 }
 0xe1c   : > { %9020 = vmatpush3.bf16.msra.mxu0 %v9814_v10  ;;  %8355 = vmatprep.mubr.msk.f32.mxu0 %vm9269_vm0, %v9270_v28  ;;  %v7082_v10 = vld [vmem:[%s10869_s10 + $0x8] sm:$0xff] }
 0xe1d   : > { %9021 = vmatprep.subr.bf16.mxu0 %v9268_v6 }
 0xe20   : > { %9023 = vmatpush3.bf16.msra.mxu0 %v9827_v14  ;;  %v3964_v14 = vld [vmem:[%s10869_s10] sm:$0xff] }
 0xe21   : > { %9024 = vmatprep.subr.bf16.mxu0 %v9268_v6 }
 0xe24   : > { %9026 = vmatpush3.bf16.msra.mxu0 %v9848_v21  ;;  %v7088_v21 = vld [vmem:[%s10869_s10 + $0x10] sm:$0xff] }
 0xe25   : > { %9027 = vmatprep.subr.bf16.mxu0 %v9268_v6 }
 0xe28   : > { %9029 = vmatpush3.bf16.msra.mxu0 %v9868_v27 }
 0xe29   : > { %8377 = vmatprep.subr.mxu0 %v9270_v28 }
 0xeae   : > { %v3960_v4 = vpop.f32.mrb[26].mxu1  ;;  %v4031_v5 = vpop.f32.mrb[22].mxu0 }
 0xeaf   : > { %v8141_v9 = vpop.f32.mrb[27].mxu1  ;;  %v8160_v12 = vpop.f32.mrb[23].mxu0  ;;  %8162 = vmatpush3.msk.msra.mxu1 %vm1180_vm2, %v4031_v5 }
 0xeb0   : > { %8164 = vmatmul.mubr.msk.f32.vlgmr.msra.gmra.mrb[28].mxu1 %vm1176_vm3, %v7082_v10  ;;  %8166 = vmatprep.subr.mxu1 %v9270_v28  ;;  %v5262_v10 = vld [vmem:[%s10870_s11] sm:$0xff] }
 0xeb1   : > { %8167 = vmatpush3.msk.msra.mxu1 %vm1180_vm2, %v3960_v4  ;;  %8168 = vmatprep.mubr.msk.f32.mxu1 %vm9269_vm0, %v9270_v28 }
 0xeb2   : > { %8190 = vmatprep.subr.mxu1 %v9270_v28 }
 0xeb8   : > { %8169 = vmatmul.mubr.msk.f32.vlgmr.msra.gmra.mrb[28].mxu1 %vm1176_vm3, %v3964_v14 }
 0xeb9   : > { %8192 = vmatprep.mubr.msk.f32.mxu1 %vm9269_vm0, %v9270_v28 }
 0xebe   : > { %v4255_v27 = vpop.f32.mrb[24].mxu0 }
 0xebf   : > { %v8189_v54 = vpop.f32.mrb[25].mxu0  ;;  %8191 = vmatpush3.msk.msra.mxu1 %vm1180_vm2, %v4255_v27 }
 0xec0   : > { %8946 = vmatprep.subr.bf16.mxu1 %v9268_v6  ;;  %8193 = vmatmul.mubr.msk.f32.vlgmr.msra.gmra.mrb[28].mxu1 %vm1176_vm3, %v7088_v21 }
 0xec1   : > { %8948 = vmatpush3.bf16.msra.mxu1 %v10097_v50  ;;  %8211 = vmatprep.mubr.msk.f32.mxu1 %vm9269_vm0, %v9270_v28 }
 0xec2   : > { %8949 = vmatprep.subr.bf16.mxu1 %v9268_v6 }
 0xec5   : > { %8951 = vmatpush3.bf16.msra.mxu1 %v10109_v57 }
 0xec6   : > { %8952 = vmatprep.subr.bf16.mxu1 %v9268_v6 }
 0xec9   : > { %8954 = vmatpush3.bf16.msra.mxu1 %v10121_v62 }
 0xeca   : > { %8955 = vmatprep.subr.bf16.mxu1 %v9268_v6 }
 0xecd   : > { %8957 = vmatpush3.bf16.msra.mxu1 %v10131_v2 }
 0xece   : > { %v4553_v19 = vpop.f32.mrb[26].mxu0  ;;  %8214 = vmatprep.subr.mxu1 %v9270_v28 }
 0xecf   : > { %v8237_v20 = vpop.f32.mrb[27].mxu0 }
 0xed0   : > { %8212 = vmatmul.mubr.msk.f32.vlgmr.msra.gmra.mrb[30].mxu1 %vm1020_vm1, %v10483_v63  ;;  %v5269_v20 = vld [vmem:[%s10871_s12] sm:$0xff] }
 0xed1   : > { %8216 = vmatprep.mubr.msk.f32.mxu1 %vm9269_vm0, %v9270_v28 }
 0xede   : > { %v4851_v23 = vpop.f32.mrb[28].mxu0 }
 0xedf   : > { %v8285_v25 = vpop.f32.mrb[29].mxu0 }
 0xeee   : > { %v5000_v29 = vpop.f32.mrb[30].mxu0 }
 0xeef   : > { %v8309_v32 = vpop.f32.mrb[31].mxu0 }
 0xfa3   : > { %v4404_v35 = vpop.f32.mrb[30].mxu1 }
 0xfa4   : > { %v8213_v36 = vpop.f32.mrb[31].mxu1  ;;  %8215 = vmatpush3.msk.msra.mxu1 %vm1180_vm2, %v4404_v35 }
 0xfa5   : > { %8217 = vmatmul.mubr.msk.f32.vlgmr.msra.gmra.mrb[28].mxu1 %vm1176_vm3, %v7092_v46  ;;  %8238 = vmatprep.subr.mxu1 %v9270_v28 }
 0xfa6   : > { %8239 = vmatpush3.msk.msra.mxu1 %vm1180_vm2, %v4553_v19  ;;  %8240 = vmatprep.mubr.msk.f32.mxu1 %vm9269_vm0, %v9270_v28 }
 0xfa7   : > { %8970 = vmatprep.subr.bf16.mxu1 %v9268_v6 }
 0xfad   : > { %8241 = vmatmul.mubr.msk.f32.vlgmr.msra.gmra.mrb[28].mxu1 %vm1176_vm3, %v7096_v39 }
 0xfae   : > { %8972 = vmatpush3.bf16.msra.mxu1 %v9977_v16  ;;  %8259 = vmatprep.mubr.msk.f32.mxu1 %vm9269_vm0, %v9270_v28 }
 0xfaf   : > { %8973 = vmatprep.subr.bf16.mxu1 %v9268_v6 }
 0xfb2   : > { %8975 = vmatpush3.bf16.msra.mxu1 %v9989_v11 }
 0xfb3   : > { %8976 = vmatprep.subr.bf16.mxu1 %v9268_v6 }
 0xfb6   : > { %8978 = vmatpush3.bf16.msra.mxu1 %v10001_v17 }
 0xfb7   : > { %8979 = vmatprep.subr.bf16.mxu1 %v9268_v6 }
 0xfba   : > { %8981 = vmatpush3.bf16.msra.mxu1 %v10011_v22 }
 0xfbb   : > { %8262 = vmatprep.subr.mxu1 %v9270_v28 }
 0xfbd   : > { %8260 = vmatmul.mubr.msk.f32.vlgmr.msra.gmra.mrb[32].mxu1 %vm1020_vm1, %v10483_v63 }
 0xfbe   : > { %8264 = vmatprep.mubr.msk.f32.mxu1 %vm9269_vm0, %v9270_v28 }
0x1090   : > { %v4702_v42 = vpop.f32.mrb[32].mxu1 }
0x1091   : > { %v8261_v43 = vpop.f32.mrb[33].mxu1  ;;  %8263 = vmatpush3.msk.msra.mxu1 %vm1180_vm2, %v4702_v42 }
0x1092   : > { %8265 = vmatmul.mubr.msk.f32.vlgmr.msra.gmra.mrb[28].mxu1 %vm1176_vm3, %v7100_v40  ;;  %8286 = vmatprep.subr.mxu1 %v9270_v28 }
0x1093   : > { %8287 = vmatpush3.msk.msra.mxu1 %vm1180_vm2, %v4851_v23  ;;  %8288 = vmatprep.mubr.msk.f32.mxu1 %vm9269_vm0, %v9270_v28 }
0x1094   : > { %8310 = vmatprep.subr.mxu1 %v9270_v28 }
0x109a   : > { %8289 = vmatmul.mubr.msk.f32.vlgmr.msra.gmra.mrb[28].mxu1 %vm1176_vm3, %v7104_v47 }
0x109b   : > { %8311 = vmatpush3.msk.msra.mxu1 %vm1180_vm2, %v5000_v29  ;;  %8312 = vmatprep.mubr.msk.f32.mxu1 %vm9269_vm0, %v9270_v28 }
0x109c   : > { %9006 = vmatprep.subr.bf16.mxu1 %v9268_v6 }
0x10a2   : > { %8313 = vmatmul.mubr.msk.f32.vlgmr.msra.gmra.mrb[28].mxu1 %vm1176_vm3, %v7108_v48 }
0x10a3   : > { %9008 = vmatpush3.bf16.msra.mxu1 %v10227_v59  ;;  %8331 = vmatprep.mubr.msk.f32.mxu1 %vm9269_vm0, %v9270_v28 }
0x10a4   : > { %9009 = vmatprep.subr.bf16.mxu1 %v9268_v6 }
0x10a7   : > { %9011 = vmatpush3.bf16.msra.mxu1 %v10237_v1 }
0x10a8   : > { %9012 = vmatprep.subr.bf16.mxu1 %v9268_v6 }
0x10ab   : > { %9014 = vmatpush3.bf16.msra.mxu1 %v10249_v8 }
0x10ac   : > { %9015 = vmatprep.subr.bf16.mxu1 %v9268_v6 }
0x10af   : > { %9017 = vmatpush3.bf16.msra.mxu1 %v10259_v15 }
0x10b0   : > { %8334 = vmatprep.subr.mxu1 %v9270_v28 }
0x10b2   : > { %8332 = vmatmul.mubr.msk.f32.vlgmr.msra.gmra.mrb[34].mxu1 %vm1020_vm1, %v10483_v63 }
0x10b3   : > { %8336 = vmatprep.mubr.msk.f32.mxu1 %vm9269_vm0, %v9270_v28 }
0x1185   : > { %v5149_v53 = vpop.f32.mrb[34].mxu1 }
0x1186   : > { %v8333_v56 = vpop.f32.mrb[35].mxu1  ;;  %8335 = vmatpush3.msk.msra.mxu1 %vm1180_vm2, %v5149_v53 }
0x1187   : > { %8337 = vmatmul.mubr.msk.f32.vlgmr.msra.gmra.mrb[28].mxu1 %vm1176_vm3, %v7112_v51  ;;  %9030 = vmatprep.subr.bf16.mxu1 %v9268_v6 }
0x1188   : > { %9032 = vmatpush3.bf16.msra.mxu1 %v9803_v7  ;;  %8374 = vmatprep.mubr.msk.f32.mxu1 %vm9269_vm0, %v9270_v28 }
0x1189   : > { %9033 = vmatprep.subr.bf16.mxu1 %v9268_v6 }
0x118c   : > { %9035 = vmatpush3.bf16.msra.mxu1 %v9823_v13 }
0x118d   : > { %9036 = vmatprep.subr.bf16.mxu1 %v9268_v6 }
0x1190   : > { %9038 = vmatpush3.bf16.msra.mxu1 %v9840_v18 }
0x1191   : > { %9039 = vmatprep.subr.bf16.mxu1 %v9268_v6 }
0x1194   : > { %9041 = vmatpush3.bf16.msra.mxu1 %v9860_v24 }
0x1195   : > { %9054 = vmatprep.subr.bf16.mxu1 %v9268_v6 }
0x125a   : > { %v5227_v60 = vpop.f32.mrb[28].mxu1 }
0x125b   : > { %v8338_v63 = vpop.f32.mrb[29].mxu1  ;;  %v5232_v7 = vsel %vm1020_vm1, %v5227_v60, 0.0 }
0x125c   : > { %5233 = vadd.xlane.f32.xlu0 %v5232_v7 }
0x1272   : > { %5265 = vperm.xlu0 %9226, %v5262_v10  }
0x12e9   : > { %v5234_v13 = vpop.xlane.xlu0 %5233 }
0x12ea   : > { %v5235_v4 = vrot.slane %v5234_v13, 4 }
0x12ec   : > { %v5236_v5 = vadd.f32 %v5235_v4, %v5234_v13 }
0x12ee   : > { %v5237_v18 = vrot.slane %v5236_v5, 2 }
0x12f0   : > { %v5238_v9 = vadd.f32 %v5237_v18, %v5236_v5 }
0x12f1   : > { %v5266_v48 = vpop.permute.xlu0 %5265 }
0x12f2   : > { %v5239_v12 = vrot.slane %v5238_v9, 1 }
0x12f4   : > { %v5240_v14 = vadd.f32 %v5239_v12, %v5238_v9 }
0x12f6   : > { %9204 = vpush %v5240_v14 }
0x1327   : > { %s9205_s1 = spop %9204 }
0x1328   : > { %v5242_v24 = vstv %s9205_s1  ;;  %s10891_s1 = sld [smem:[#allocation6_spill]] }
0x1329   : > { %v5244_v21 = vmul.f32 0.001953125, %v5242_v24 }
0x132b   : > { %v5245_v27 = vsub.f32 %v5227_v60, %v5244_v21 }
0x132d   : > { %v5246_v54 = vmul.f32 %v5245_v27, %v5245_v27 }
0x132e   : > { %s593_s20 = scalar_lea.vmem %s10891_s1, %s7148_s28 }
0x132f   : > { %v5247_v19 = vsel %vm1020_vm1, %v5246_v54, 0.0 }
0x1330   : > { %5248 = vadd.xlane.f32.xlu1 %v5247_v19 }
0x1341   : > { %5272 = vperm.xlu1 %9225, %v5269_v20  }
0x13bd   : > { %v5249_v23 = vpop.xlane.xlu1 %5248 }
0x13be   : > { %v5250_v25 = vrot.slane %v5249_v23, 4 }
0x13c0   : > { %v5251_v29 = vadd.f32 %v5250_v25, %v5249_v23 }
0x13c1   : > { %v5273_v53 = vpop.permute.xlu1 %5272 }
0x13c2   : > { %v5252_v32 = vrot.slane %v5251_v29, 2 }
0x13c4   : > { %v5253_v46 = vadd.f32 %v5252_v32, %v5251_v29 }
0x13c6   : > { %v5254_v35 = vrot.slane %v5253_v46, 1 }
0x13c8   : > { %v5255_v36 = vadd.f32 %v5254_v35, %v5253_v46 }
0x13ca   : > { %9206 = vpush %v5255_v36 }
0x13fb   : > { %s9207_s22 = spop %9206 }
0x13fc   : > { %v5257_v39 = vstv %s9207_s22 }
0x13fd   : > { %v5258_v40 = vmul.f32 0.001953125, %v5257_v39 }
0x13ff   : > { %v5259_v42 = vadd.f32 1e-05, %v5258_v40 }
0x1401   : > { %9236 = vrsqrt.f32 %v5259_v42 }
0x140b   : > { %v9237_v43 = vpop.eup %9236 }
0x140c   : > { %v5261_v47 = vmul.f32 %v9237_v43, %v5245_v27 }
0x140e   : > { %v5268_v51 = vmul.f32 %v5266_v48, %v5261_v47 }
0x1410   : > { %v5275_v56 = vadd.f32 %v5273_v53, %v5268_v51 }
0x1412   : > { %v5276_v60 = vmul.f32 0.70710677, %v5275_v56  ;;  %v5299_v35 = vmul.f32 0.5, %v5275_v56 }
0x1414   : > { %v5279_v63 = vand.u32 2147483647, %v5276_v60  ;;  %vm5277_vm6 = vcmp.ge.f32.partialorder %v5276_v60, 0.0 }
0x1415   : > { %v5278_v32 = vsel %vm5277_vm6, 1.0, %v9272_v30  ;;  %v6663_v30 = vld [vmem:[%s589_s24 + $0x18] sm:$0xff] }
0x1416   : > { %v5280_v7 = vmul.f32 0.3275911, %v5279_v63  ;;  %v5292_v13 = vsub.f32 0.0, %v5279_v63  ;;  %v7144_v42 = vmul.f32 -1.442695, %v6663_v30 }
0x1418   : > { %v5281_v10 = vadd.f32 1.0, %v5280_v7  ;;  %v5293_v5 = vmul.f32 %v5292_v13, %v5279_v63 }
0x141a   : > { %9238 = vrcp.f32 %v5281_v10  ;;  %v5294_v12 = vmul.f32 1.442695, %v5293_v5 }
0x141c   : > { %9240 = vpow2.f32 %v5294_v12 }
0x1424   : > { %v9239_v4 = vpop.eup %9238 }
0x1425   : > { %v5283_v18 = vmul.f32 1.0614054, %v9239_v4 }
0x1426   : > { %v9241_v23 = vpop.eup %9240 }
0x1427   : > { %v5284_v9 = vadd.f32 -1.4531521, %v5283_v18 }
0x1429   : > { %v5285_v14 = vmul.f32 %v9239_v4, %v5284_v9 }
0x142b   : > { %v5286_v24 = vadd.f32 1.4214138, %v5285_v14 }
0x142d   : > { %v5287_v21 = vmul.f32 %v9239_v4, %v5286_v24 }
0x142f   : > { %v5288_v27 = vadd.f32 -0.28449672, %v5287_v21  ;;  %v6692_v21 = vld [vmem:[%s10875_s16] sm:$0xff] }
0x1431   : > { %v5289_v54 = vmul.f32 %v9239_v4, %v5288_v27  ;;  %v7136_v27 = vld [vmem:[%s10872_s13 + $0x38] sm:$0xff] }
0x1433   : > { %v5290_v19 = vadd.f32 0.2548296, %v5289_v54 }
0x1435   : > { %v5291_v20 = vmul.f32 %v9239_v4, %v5290_v19 }
0x1437   : > { %v5296_v25 = vmul.f32 %v9241_v23, %v5291_v20 }
0x1439   : > { %v5297_v29 = vsub.f32 1.0, %v5296_v25 }
0x143b   : > { %v5298_v46 = vmul.f32 %v5297_v29, %v5278_v32 }
0x143d   : > { %v5300_v36 = vadd.f32 1.0, %v5298_v46  ;;  %v6646_v46 = vld [vmem:[%s10873_s14] sm:$0xff] }
0x143f   : > { %v10674_v39 = vmul.f32 %v5300_v36, %v5299_v35 }
0x1441   : > { %8356 = vmatmul.mubr.msk.f32.vlgmr.msra.gmra.mrb[32].mxu0 %vm1020_vm1, %v10674_v39  ;;  %8375 = vmatmul.mubr.msk.f32.vlgmr.msra.gmra.mrb[36].mxu1 %vm1020_vm1, %v10674_v39 }
0x1442   : > { %9056 = vmatpush3.bf16.msra.mxu1 %v10097_v50  ;;  %8427 = vmatprep.mubr.msk.f32.mxu1 %vm9269_vm0, %v9270_v28 }
0x1443   : > { %9057 = vmatprep.subr.bf16.mxu1 %v9268_v6  ;;  %8379 = vmatprep.mubr.msk.f32.mxu0 %vm9269_vm0, %v9270_v28 }
0x1446   : > { %9059 = vmatpush3.bf16.msra.mxu1 %v10109_v57  ;;  %v5375_v57 = vld [vmem:[%s10872_s13] sm:$0xff] }
0x1447   : > { %9060 = vmatprep.subr.bf16.mxu1 %v9268_v6 }
0x144a   : > { %9062 = vmatpush3.bf16.msra.mxu1 %v10121_v62 }
0x144b   : > { %9063 = vmatprep.subr.bf16.mxu1 %v9268_v6 }
0x144e   : > { %9065 = vmatpush3.bf16.msra.mxu1 %v10131_v2 }
0x144f   : > { %9066 = vmatprep.subr.bf16.mxu1 %v9268_v6 }
0x1451   : > { %8428 = vmatmul.mubr.msk.f32.vlgmr.msra.gmra.mrb[38].mxu1 %vm1020_vm1, %v10674_v39 }
0x1452   : > { %9068 = vmatpush3.bf16.msra.mxu1 %v9933_v58  ;;  %8451 = vmatprep.mubr.msk.f32.mxu1 %vm9269_vm0, %v9270_v28  ;;  %v7117_v58 = vld [vmem:[%s10872_s13 + $0x8] sm:$0xff] }
0x1453   : > { %9069 = vmatprep.subr.bf16.mxu1 %v9268_v6 }
0x1456   : > { %9071 = vmatpush3.bf16.msra.mxu1 %v9945_v61 }
0x1457   : > { %9072 = vmatprep.subr.bf16.mxu1 %v9268_v6 }
0x145a   : > { %9074 = vmatpush3.bf16.msra.mxu1 %v9957_v0 }
0x145b   : > { %9075 = vmatprep.subr.bf16.mxu1 %v9268_v6 }
0x145e   : > { %9077 = vmatpush3.bf16.msra.mxu1 %v9967_v3 }
0x145f   : > { %9090 = vmatprep.subr.bf16.mxu1 %v9268_v6 }
0x1461   : > { %8452 = vmatmul.mubr.msk.f32.vlgmr.msra.gmra.mrb[40].mxu1 %vm1020_vm1, %v10674_v39 }
0x1462   : > { %9092 = vmatpush3.bf16.msra.mxu1 %v10167_v33  ;;  %8499 = vmatprep.mubr.msk.f32.mxu1 %vm9269_vm0, %v9270_v28 }
0x1463   : > { %9093 = vmatprep.subr.bf16.mxu1 %v9268_v6 }
0x1466   : > { %9095 = vmatpush3.bf16.msra.mxu1 %v10177_v38 }
0x1467   : > { %9096 = vmatprep.subr.bf16.mxu1 %v9268_v6 }
0x146a   : > { %9098 = vmatpush3.bf16.msra.mxu1 %v10189_v41 }
0x146b   : > { %9099 = vmatprep.subr.bf16.mxu1 %v9268_v6 }
0x146e   : > { %9101 = vmatpush3.bf16.msra.mxu1 %v10199_v44 }
0x146f   : > { %9114 = vmatprep.subr.bf16.mxu1 %v9268_v6 }
0x1471   : > { %8500 = vmatmul.mubr.msk.f32.vlgmr.msra.gmra.mrb[42].mxu1 %vm1020_vm1, %v10674_v39 }
0x1472   : > { %9116 = vmatpush3.bf16.msra.mxu1 %v10227_v59  ;;  %8547 = vmatprep.mubr.msk.f32.mxu1 %vm9269_vm0, %v9270_v28 }
0x1473   : > { %9117 = vmatprep.subr.bf16.mxu1 %v9268_v6 }
0x1476   : > { %9119 = vmatpush3.bf16.msra.mxu1 %v10237_v1  ;;  %v7124_v1 = vld [vmem:[%s10872_s13 + $0x18] sm:$0xff] }
0x1477   : > { %9120 = vmatprep.subr.bf16.mxu1 %v9268_v6 }
0x147a   : > { %9122 = vmatpush3.bf16.msra.mxu1 %v10249_v8  ;;  %v7127_v8 = vld [vmem:[%s10872_s13 + $0x20] sm:$0xff] }
0x147b   : > { %9123 = vmatprep.subr.bf16.mxu1 %v9268_v6 }
0x147e   : > { %9125 = vmatpush3.bf16.msra.mxu1 %v10259_v15 }
0x147f   : > { %9126 = vmatprep.subr.bf16.mxu1 %v9268_v6 }
0x1481   : > { %8548 = vmatmul.mubr.msk.f32.vlgmr.msra.gmra.mrb[44].mxu1 %vm1020_vm1, %v10674_v39 }
0x1482   : > { %8563 = vmatprep.mubr.msk.f32.mxu1 %vm9269_vm0, %v9270_v28 }
0x1514   : > { %v5371_v61 = vpop.f32.mrb[32].mxu0  ;;  %v5442_v0 = vpop.f32.mrb[36].mxu1 }
0x1515   : > { %v8357_v3 = vpop.f32.mrb[33].mxu0  ;;  %v8376_v50 = vpop.f32.mrb[37].mxu1  ;;  %8378 = vmatpush3.msra.mxu0 %v5442_v0 }
0x1516   : > { %8380 = vmatmul.mubr.msk.f32.vlgmr.msra.gmra.mrb[34].mxu0 %vm5448_vm7, %v7117_v58  ;;  %8382 = vmatprep.subr.mxu0 %v9270_v28 }
0x1517   : > { %8383 = vmatpush3.msra.mxu0 %v5371_v61  ;;  %8384 = vmatprep.mubr.msk.f32.mxu0 %vm9269_vm0, %v9270_v28 }
0x1518   : > { %9042 = vmatprep.subr.bf16.mxu0 %v9268_v6 }
0x151e   : > { %8385 = vmatmul.mubr.msk.f32.vlgmr.msra.gmra.mrb[34].mxu0 %vm5448_vm7, %v5375_v57 }
0x151f   : > { %9044 = vmatpush3.bf16.msra.mxu0 %v9884_v45  ;;  %8403 = vmatprep.mubr.msk.f32.mxu0 %vm9269_vm0, %v9270_v28 }
0x1520   : > { %9045 = vmatprep.subr.bf16.mxu0 %v9268_v6 }
0x1523   : > { %9047 = vmatpush3.bf16.msra.mxu0 %v9899_v49 }
0x1524   : > { %v5807_v62 = vpop.f32.mrb[38].mxu1  ;;  %9048 = vmatprep.subr.bf16.mxu0 %v9268_v6 }
0x1525   : > { %v8429_v2 = vpop.f32.mrb[39].mxu1 }
0x1527   : > { %9050 = vmatpush3.bf16.msra.mxu0 %v9913_v52  ;;  %v7121_v52 = vld [vmem:[%s10872_s13 + $0x10] sm:$0xff] }
0x1528   : > { %9051 = vmatprep.subr.bf16.mxu0 %v9268_v6 }
0x152b   : > { %9053 = vmatpush3.bf16.msra.mxu0 %v9923_v55 }
0x152c   : > { %8406 = vmatprep.subr.mxu0 %v9270_v28 }
0x152e   : > { %8404 = vmatmul.mubr.msk.f32.vlgmr.msra.gmra.mrb[36].mxu0 %vm1020_vm1, %v10674_v39 }
0x152f   : > { %8408 = vmatprep.mubr.msk.f32.mxu0 %vm9269_vm0, %v9270_v28 }
0x1534   : > { %v5953_v45 = vpop.f32.mrb[40].mxu1 }
0x1535   : > { %v8453_v49 = vpop.f32.mrb[41].mxu1 }
0x1544   : > { %v6245_v33 = vpop.f32.mrb[42].mxu1 }
0x1545   : > { %v8501_v38 = vpop.f32.mrb[43].mxu1 }
0x1554   : > { %v10758_v41 = vpop.f32.mrb[44].mxu1 }
0x1555   : > { %v8549_v44 = vpop.f32.mrb[45].mxu1 }
0x1601   : > { %v5661_v55 = vpop.f32.mrb[36].mxu0 }
0x1602   : > { %v8405_v59 = vpop.f32.mrb[37].mxu0  ;;  %8407 = vmatpush3.msra.mxu0 %v5661_v55 }
0x1603   : > { %8409 = vmatmul.mubr.msk.f32.vlgmr.msra.gmra.mrb[34].mxu0 %vm5448_vm7, %v7121_v52  ;;  %8430 = vmatprep.subr.mxu0 %v9270_v28 }
0x1604   : > { %8431 = vmatpush3.msra.mxu0 %v5807_v62  ;;  %8432 = vmatprep.mubr.msk.f32.mxu0 %vm9269_vm0, %v9270_v28 }
0x1605   : > { %8454 = vmatprep.subr.mxu0 %v9270_v28 }
0x160b   : > { %8433 = vmatmul.mubr.msk.f32.vlgmr.msra.gmra.mrb[34].mxu0 %vm5448_vm7, %v7124_v1 }
0x160c   : > { %8455 = vmatpush3.msra.mxu0 %v5953_v45  ;;  %8456 = vmatprep.mubr.msk.f32.mxu0 %vm9269_vm0, %v9270_v28 }
0x160d   : > { %9078 = vmatprep.subr.bf16.mxu0 %v9268_v6 }
0x1613   : > { %8457 = vmatmul.mubr.msk.f32.vlgmr.msra.gmra.mrb[34].mxu0 %vm5448_vm7, %v7127_v8 }
0x1614   : > { %9080 = vmatpush3.bf16.msra.mxu0 %v9977_v16  ;;  %8475 = vmatprep.mubr.msk.f32.mxu0 %vm9269_vm0, %v9270_v28  ;;  %v7130_v16 = vld [vmem:[%s10872_s13 + $0x28] sm:$0xff] }
0x1615   : > { %9081 = vmatprep.subr.bf16.mxu0 %v9268_v6 }
0x1618   : > { %9083 = vmatpush3.bf16.msra.mxu0 %v9989_v11 }
0x1619   : > { %9084 = vmatprep.subr.bf16.mxu0 %v9268_v6 }
0x161c   : > { %9086 = vmatpush3.bf16.msra.mxu0 %v10001_v17  ;;  %v7133_v17 = vld [vmem:[%s10872_s13 + $0x30] sm:$0xff] }
0x161d   : > { %9087 = vmatprep.subr.bf16.mxu0 %v9268_v6 }
0x1620   : > { %9089 = vmatpush3.bf16.msra.mxu0 %v10011_v22  ;;  %v6660_v22 = vld [vmem:[%s589_s24] sm:$0xff] }
0x1621   : > { %8478 = vmatprep.subr.mxu0 %v9270_v28 }
0x1623   : > { %8476 = vmatmul.mubr.msk.f32.vlgmr.msra.gmra.mrb[38].mxu0 %vm1020_vm1, %v10674_v39 }
0x1624   : > { %8480 = vmatprep.mubr.msk.f32.mxu0 %vm9269_vm0, %v9270_v28 }
0x16f6   : > { %v6099_v11 = vpop.f32.mrb[38].mxu0 }
0x16f7   : > { %v8477_v15 = vpop.f32.mrb[39].mxu0  ;;  %8479 = vmatpush3.msra.mxu0 %v6099_v11 }
0x16f8   : > { %8481 = vmatmul.mubr.msk.f32.vlgmr.msra.gmra.mrb[34].mxu0 %vm5448_vm7, %v7130_v16  ;;  %8502 = vmatprep.subr.mxu0 %v9270_v28 }
0x16f9   : > { %8503 = vmatpush3.msra.mxu0 %v6245_v33  ;;  %8504 = vmatprep.mubr.msk.f32.mxu0 %vm9269_vm0, %v9270_v28  ;;  %v6653_v33 = vld [vmem:[%s10874_s15] sm:$0xff] }
0x16fa   : > { %9102 = vmatprep.subr.bf16.mxu0 %v9268_v6 }
0x1700   : > { %8505 = vmatmul.mubr.msk.f32.vlgmr.msra.gmra.mrb[34].mxu0 %vm5448_vm7, %v7133_v17 }
0x1701   : > { %9104 = vmatpush3.bf16.msra.mxu0 %v10021_v26  ;;  %8523 = vmatprep.mubr.msk.f32.mxu0 %vm9269_vm0, %v9270_v28  ;;  %v6661_v26 = vld [vmem:[%s589_s24 + $0x8] sm:$0xff] }
0x1702   : > { %9105 = vmatprep.subr.bf16.mxu0 %v9268_v6 }
0x1705   : > { %9107 = vmatpush3.bf16.msra.mxu0 %v10033_v31  ;;  %v7141_v31 = vmul.f32 -1.442695, %v6660_v22 }
0x1706   : > { %9108 = vmatprep.subr.bf16.mxu0 %v9268_v6 }
0x1707   : > { %9242 = vpow2.f32 %v7141_v31 }
0x1709   : > { %9110 = vmatpush3.bf16.msra.mxu0 %v10045_v34  ;;  %v7142_v34 = vmul.f32 -1.442695, %v6661_v26 }
0x170a   : > { %9111 = vmatprep.subr.bf16.mxu0 %v9268_v6 }
0x170b   : > { %9244 = vpow2.f32 %v7142_v34 }
0x170d   : > { %9113 = vmatpush3.bf16.msra.mxu0 %v10055_v37  ;;  %v6662_v37 = vld [vmem:[%s589_s24 + $0x10] sm:$0xff] }
0x170e   : > { %8526 = vmatprep.subr.mxu0 %v9270_v28  ;;  %v7143_v40 = vmul.f32 -1.442695, %v6662_v37 }
0x1710   : > { %8524 = vmatmul.mubr.msk.f32.vlgmr.msra.gmra.mrb[40].mxu0 %vm1020_vm1, %v10674_v39  ;;  %9246 = vpow2.f32 %v7143_v40 }
0x1711   : > { %8528 = vmatprep.mubr.msk.f32.mxu0 %vm9269_vm0, %v9270_v28  ;;  %9248 = vpow2.f32 %v7144_v42  ;;  %v9243_v43 = vpop.eup %9242 }
0x1712   : > { %v6676_v48 = vadd.f32 1.0, %v9243_v43 }
0x1714   : > { %9250 = vrcp.f32 %v6676_v48 }
0x1715   : > { %v9245_v47 = vpop.eup %9244 }
0x1716   : > { %v6677_v51 = vadd.f32 1.0, %v9245_v47 }
0x1718   : > { %9252 = vrcp.f32 %v6677_v51 }
0x171a   : > { %v9247_v53 = vpop.eup %9246 }
0x171b   : > { %v9249_v56 = vpop.eup %9248  ;;  %v6678_v60 = vadd.f32 1.0, %v9247_v53 }
0x171c   : > { %v6679_v63 = vadd.f32 1.0, %v9249_v56 }
0x171d   : > { %9254 = vrcp.f32 %v6678_v60 }
0x171e   : > { %9256 = vrcp.f32 %v6679_v63  ;;  %v9251_v7 = vpop.eup %9250 }
0x171f   : > { %v6688_v13 = vmul.f32 %v9251_v7, %v6660_v22 }
0x1722   : > { %v9253_v10 = vpop.eup %9252 }
0x1723   : > { %v6689_v4 = vmul.f32 %v9253_v10, %v6661_v26 }
0x1725   : > { %v9127_v18 = vpack.c.bf16 %v6689_v4, %v6688_v13 }
0x1727   : > { %v9255_v5 = vpop.eup %9254  ;;  %9128 = vmatpush3.bf16.msra.mxu1 %v9127_v18 }
0x1728   : > { %v9257_v9 = vpop.eup %9256  ;;  %v6690_v12 = vmul.f32 %v9255_v5, %v6662_v37  ;;  %9129 = vmatprep.subr.bf16.mxu1 %v9268_v6  ;;  %v7139_v6 = vld [vmem:[%s10872_s13 + $0x40] sm:$0xff] }
0x1729   : > { %v6691_v14 = vmul.f32 %v9257_v9, %v6663_v30 }
0x172b   : > { %v9130_v24 = vpack.c.bf16 %v6691_v14, %v6690_v12 }
0x172d   : > { %9131 = vmatpush3.bf16.msra.mxu1 %v9130_v24 }
0x1730   : > { %8564 = vmatmul.mubr.msk.f32.vlgmr.msra.gmra.mrb[46].mxu1 %vm6694_vm8, %v6692_v21 }
0x17e3   : > { %v6391_v54 = vpop.f32.mrb[40].mxu0 }
0x17e4   : > { %v8525_v19 = vpop.f32.mrb[41].mxu0  ;;  %8527 = vmatpush3.msra.mxu0 %v6391_v54 }
0x17e5   : > { %8529 = vmatmul.mubr.msk.f32.vlgmr.msra.gmra.mrb[34].mxu0 %vm5448_vm7, %v7136_v27  ;;  %8550 = vmatprep.subr.mxu0 %v9270_v28 }
0x17e6   : > { %8551 = vmatpush3.msra.mxu0 %v10758_v41  ;;  %8552 = vmatprep.mubr.msk.f32.mxu0 %vm9269_vm0, %v9270_v28  ;;  %v6693_v28 = vld [vmem:[%s10876_s17] sm:$0xff] }
0x17ed   : > { %8553 = vmatmul.mubr.msk.f32.vlgmr.msra.gmra.mrb[34].mxu0 %vm5448_vm7, %v7139_v6 }
0x1803   : > { %v6764_v20 = vpop.f32.mrb[46].mxu1 }
0x1804   : > { %v8565_v23 = vpop.f32.mrb[47].mxu1  ;;  %v6765_v35 = vadd.f32 %v6764_v20, %v6693_v28 }
0x18c0   : > { %v6612_v25 = vpop.f32.mrb[34].mxu0 }
0x18c1   : > { %v8554_v29 = vpop.f32.mrb[35].mxu0  ;;  %v6617_v32 = vsel %vm1020_vm1, %v6612_v25, 0.0 }
0x18c2   : > { %6618 = vadd.xlane.f32.xlu0 %v6617_v32 }
0x18d8   : > { %6649 = vperm.xlu0 %9226, %v6646_v46  }
0x18dc   : > { %6770 = vperm.xlu0 %9226, %v6765_v35  }
0x194f   : > { %v6619_v36 = vpop.xlane.xlu0 %6618 }
0x1950   : > { %v6620_v39 = vrot.slane %v6619_v36, 4 }
0x1952   : > { %v6621_v58 = vadd.f32 %v6620_v39, %v6619_v36 }
0x1954   : > { %v6622_v61 = vrot.slane %v6621_v58, 2 }
0x1956   : > { %v6623_v0 = vadd.f32 %v6622_v61, %v6621_v58 }
0x1957   : > { %v6650_v17 = vpop.permute.xlu0 %6649 }
0x1958   : > { %v6624_v3 = vrot.slane %v6623_v0, 1 }
0x195a   : > { %v6625_v50 = vadd.f32 %v6624_v3, %v6623_v0 }
0x195b   : > { %v6771_v37 = vpop.permute.xlu0 %6770 }
0x195c   : > { %9208 = vpush %v6625_v50 }
0x198d   : > { %s9209_s29 = spop %9208 }
0x198e   : > { %v6627_v57 = vstv %s9209_s29 }
0x198f   : > { %v6628_v62 = vmul.f32 0.001953125, %v6627_v57 }
0x1991   : > { %v6629_v2 = vsub.f32 %v6612_v25, %v6628_v62 }
0x1993   : > { %v6630_v45 = vmul.f32 %v6629_v2, %v6629_v2 }
0x1995   : > { %v6631_v49 = vsel %vm1020_vm1, %v6630_v45, 0.0 }
0x1996   : > { %6632 = vadd.xlane.f32.xlu1 %v6631_v49 }
0x19a7   : > { %6656 = vperm.xlu1 %9225, %v6653_v33  }
0x1a23   : > { %v6633_v38 = vpop.xlane.xlu1 %6632 }
0x1a24   : > { %v6634_v41 = vrot.slane %v6633_v38, 4 }
0x1a26   : > { %v6635_v44 = vadd.f32 %v6634_v41, %v6633_v38 }
0x1a27   : > { %v6657_v31 = vpop.permute.xlu1 %6656 }
0x1a28   : > { %v6636_v52 = vrot.slane %v6635_v44, 2 }
0x1a2a   : > { %v6637_v55 = vadd.f32 %v6636_v52, %v6635_v44 }
0x1a2c   : > { %v6638_v59 = vrot.slane %v6637_v55, 1 }
0x1a2e   : > { %v6639_v1 = vadd.f32 %v6638_v59, %v6637_v55 }
0x1a30   : > { %9210 = vpush %v6639_v1 }
0x1a61   : > { %s9211_s26 = spop %9210 }
0x1a62   : > { %v6641_v8 = vstv %s9211_s26 }
0x1a63   : > { %v6642_v16 = vmul.f32 0.001953125, %v6641_v8 }
0x1a65   : > { %v6643_v11 = vadd.f32 1e-05, %v6642_v16 }
0x1a67   : > { %9258 = vrsqrt.f32 %v6643_v11 }
0x1a71   : > { %v9259_v15 = vpop.eup %9258 }
0x1a72   : > { %v6645_v22 = vmul.f32 %v9259_v15, %v6629_v2 }
0x1a74   : > { %v6652_v26 = vmul.f32 %v6650_v17, %v6645_v22 }
0x1a76   : > { %v6659_v34 = vadd.f32 %v6657_v31, %v6652_v26 }
0x1a78   : > { %v6773_v30 = vadd.f32 %v6771_v37, %v6659_v34 }
0x1a7a   : > { %6774 = vst.msk [vmem:[%s593_s20] sm:$0xff] %vm1020_vm1, %v6773_v30 }
0x1a7b PF: > { %s10892_s21 = sld [smem:[#allocation2_spill]] }
0x1a81   : > { %s28_s27 = sadd.s32 1, %s10892_s21  }
0x1a82   : > { %p25_p4 = scmp.ge.s32.totalorder %s28_s27, 4  }
0x1a84   :  { %27 = sbr.rel (!%p25_p4) target bundleno = 5 (0x5), region = 168 }

</bundles_post_ra>
